<compile_context>
chip_gen: v7x
topology: tpu7x:2x2x1
jax: 0.10.0
libtpu: 0.0.40
codegen_flags: <defaults>
</compile_context>

<pallas_src>
import jax
import jax.numpy as jnp
from jax.experimental import pallas as pl
from jax.experimental.pallas import tpu as pltpu


# ----------------------------------------------------------------------------
# Pallas kernels
# ----------------------------------------------------------------------------
def _conv1_relu_pool_kernel(cols_ref, w_ref, b_ref, o_ref):
    """Fused conv1-as-matmul + 2x2 max-pool + bias + ReLU.

    cols_ref: (4, K, P) bf16  im2col columns; leading axis = pool quadrant,
                              columns p = (batch, pooled_y, pooled_x)
    w_ref:    (Cout, K) bf16  conv weight (K padded to 80 with zeros)
    b_ref:    (Cout, 1) f32
    o_ref:    (Cout, P) bf16  pooled activations, lane-dense along P
    """
    w = w_ref[...]
    acc = jnp.dot(w, cols_ref[0], preferred_element_type=jnp.float32)
    for q in range(1, cols_ref.shape[0]):            # static unroll, 4 quadrants
        acc = jnp.maximum(
            acc, jnp.dot(w, cols_ref[q], preferred_element_type=jnp.float32))
    # bias + ReLU hoisted out of the quadrant loop (monotone => equivalent)
    o_ref[...] = jnp.maximum(acc + b_ref[...], 0.0).astype(o_ref.dtype)


def _conv2_pool_fc_kernel(cols_ref, w2_ref, b2_ref, wf1_ref, bf1_ref,
                          wf2_ref, bf2_ref, o_ref):
    """conv2 + bias + ReLU + 2x2 max-pool + flatten + fc1 + tanh + fc2, fused.

    cols_ref: (B, 800, 144) bf16  im2col cols; lane = q*36 + yo*6 + xo
    w2_ref:   (32, 800)     bf16
    b2_ref:   (1, 32, 1)    f32
    wf1_ref:  (32, 36, H)   bf16  fc1 weight re-laid-out as [c, s, n]
    bf1_ref:  (1, H)        f32
    wf2_ref:  (H, O)        bf16
    bf2_ref:  (1, O)        f32
    o_ref:    (B, O)        f32
    """
    B, K2, N2 = cols_ref.shape
    Cout = w2_ref.shape[0]
    S = 36                                             # pooled 6x6 spatial
    nq = N2 // S                                       # 4 pool quadrants

    # conv2: one lane-dense batched matmul (batch = b), like the flash pattern.
    w2b = jnp.broadcast_to(w2_ref[...], (B, Cout, K2))
    y = jnp.einsum('bck,bkn->bcn', w2b, cols_ref[...],
                   preferred_element_type=jnp.float32)  # (B, 32, 144)

    # 2x2 max-pool: quadrants are lane blocks -> 3 elementwise maxima.
    p = y[:, :, 0:S]
    for q in range(1, nq):
        p = jnp.maximum(p, y[:, :, q * S:(q + 1) * S])
    a2 = jnp.maximum(p + b2_ref[...], 0.0).astype(jnp.bfloat16)   # (B, 32, 36)

    # fc1 over the flattened (c, s) features, accumulated per conv channel so
    # no in-kernel relayout of the (B, 32, 36) activation is ever needed.
    wf1 = wf1_ref[...]                                  # (32, 36, H)
    h = None
    for c in range(Cout):                               # static unroll (32 dots)
        part = jnp.dot(a2[:, c, :], wf1[c],
                       preferred_element_type=jnp.float32)        # (B, H)
        h = part if h is None else h + part
    h = jnp.tanh(h + bf1_ref[...]).astype(jnp.bfloat16)

    o_ref[...] = jnp.dot(h, wf2_ref[...],
                         preferred_element_type=jnp.float32) + bf2_ref[...]


# ----------------------------------------------------------------------------
# pallas_call wrappers
# ----------------------------------------------------------------------------
def conv1_relu_pool(cols, w, b):
    """cols: (4, K, P) bf16, w: (Cout, K) bf16, b: (Cout,) f32 -> (Cout, P) bf16."""
    Q, K, P = cols.shape
    Cout = w.shape[0]
    return pl.pallas_call(
        _conv1_relu_pool_kernel,
        out_shape=jax.ShapeDtypeStruct((Cout, P), jnp.bfloat16),
        grid=(1,),
        in_specs=[
            pl.BlockSpec((Q, K, P), lambda i: (0, 0, 0)),
            pl.BlockSpec((Cout, K), lambda i: (0, 0)),
            pl.BlockSpec((Cout, 1), lambda i: (0, 0)),
        ],
        out_specs=pl.BlockSpec((Cout, P), lambda i: (0, 0)),
        compiler_params=pltpu.CompilerParams(dimension_semantics=("arbitrary",)),
    )(cols, w, b.reshape(Cout, 1))


def conv2_pool_fc_fused(cols2, w2, b2, wf1r, bf1, wf2t, bf2):
    """Fused conv2+pool+relu+flatten+fc1+tanh+fc2.  cols2: (B, 800, 144) bf16."""
    B, K2, N2 = cols2.shape
    Cout = w2.shape[0]
    S, H = wf1r.shape[1], wf1r.shape[2]
    O = wf2t.shape[1]
    return pl.pallas_call(
        _conv2_pool_fc_kernel,
        out_shape=jax.ShapeDtypeStruct((B, O), jnp.float32),
        grid=(1,),
        in_specs=[
            pl.BlockSpec((B, K2, N2), lambda i: (0, 0, 0)),
            pl.BlockSpec((Cout, K2), lambda i: (0, 0)),
            pl.BlockSpec((1, Cout, 1), lambda i: (0, 0, 0)),
            pl.BlockSpec((Cout, S, H), lambda i: (0, 0, 0)),
            pl.BlockSpec((1, H), lambda i: (0, 0)),
            pl.BlockSpec((H, O), lambda i: (0, 0)),
            pl.BlockSpec((1, O), lambda i: (0, 0)),
        ],
        out_specs=pl.BlockSpec((B, O), lambda i: (0, 0)),
        compiler_params=pltpu.CompilerParams(dimension_semantics=("arbitrary",)),
    )(cols2, w2, b2.reshape(1, Cout, 1), wf1r, bf1.reshape(1, H),
      wf2t, bf2.reshape(1, O))


# ----------------------------------------------------------------------------
# im2col glue (pool-quadrant grouped; pure strided slices + stack + reshape,
# runs as a small XLA fusion under jit).
# ----------------------------------------------------------------------------
def _im2col_conv1(xp, B):
    """xp: (3, B, 36, 36) f32 (spatially pre-padded) -> (4, 80, B*256) bf16.

    out[dy*2+dx, (i*5+j)*3 + ci, b*256 + yo*16 + xo] = xp[ci, b, 2yo+dy+i, 2xo+dx+j]
    Rows 75..79 are zero (K padded to the bf16 sublane pack of 16).
    """
    quads = []
    for dy in range(2):
        for dx in range(2):
            taps = [xp[:, :, dy + i: dy + i + 32: 2, dx + j: dx + j + 32: 2]
                    for i in range(5) for j in range(5)]          # (3,B,16,16)
            quads.append(jnp.stack(taps, axis=0))                 # (25,3,B,16,16)
    cols = jnp.stack(quads, axis=0).reshape(4, 75, B * 256)
    cols = jnp.pad(cols, ((0, 0), (0, 5), (0, 0)))                # K 75 -> 80
    return cols.astype(jnp.bfloat16)


def _im2col_conv2(a1r, B):
    """a1r: (32, B, 16, 16) bf16 -> (B, 800, 144) bf16.

    out[b, (i*5+j)*32 + ci, q*36 + yo*6 + xo] = a1r[ci, b, 2yo+dy+i, 2xo+dx+j]
    (q = dy*2+dx), i.e. pool quadrants stacked along the lane axis.
    """
    quads = []
    for dy in range(2):
        for dx in range(2):
            taps = [a1r[:, :, dy + i: dy + i + 12: 2, dx + j: dx + j + 12: 2]
                    for i in range(5) for j in range(5)]          # (32,B,6,6)
            quads.append(jnp.stack(taps, axis=0))                 # (25,32,B,6,6)
    cols = jnp.stack(quads, axis=0)                               # (4,25,32,B,6,6)
    cols = cols.transpose(3, 1, 2, 0, 4, 5)                       # (B,25,32,4,6,6)
    return cols.reshape(B, 800, 144)


# ----------------------------------------------------------------------------
# Parameter init (matches the PyTorch __init__ semantics, deterministic)
# ----------------------------------------------------------------------------
def _xavier_uniform(key, shape, fan_in, fan_out, gain=1.0):
    bound = gain * (6.0 / (fan_in + fan_out)) ** 0.5
    return jax.random.uniform(key, shape, jnp.float32, -bound, bound)


def init_params(key, c_in, n_hidden, n_out):
    k1, k2, k3, k4 = jax.random.split(key, 4)
    relu_gain = 2.0 ** 0.5                       # nn.init.calculate_gain('relu')
    # conv weights in PyTorch layout (Cout, Cin, KH, KW), laid out once for the
    # transposed matmul: (Cout, KH*KW*Cin) with k ordered (kh, kw, cin).
    w1 = _xavier_uniform(k1, (32, c_in, 5, 5), c_in * 25, 32 * 25, relu_gain)
    w2 = _xavier_uniform(k2, (32, 32, 5, 5), 32 * 25, 32 * 25, relu_gain)
    w1c = jnp.transpose(w1, (0, 2, 3, 1)).reshape(32, 25 * c_in)
    w1c = jnp.pad(w1c, ((0, 0), (0, 80 - 25 * c_in))).astype(jnp.bfloat16)
    w2c = jnp.transpose(w2, (0, 2, 3, 1)).reshape(32, 25 * 32).astype(jnp.bfloat16)
    b1 = jnp.zeros((32,), jnp.float32)
    b2 = jnp.zeros((32,), jnp.float32)
    # fc weights in PyTorch layout (out, in); fc1 re-laid-out as [c, s, n].
    wf1 = _xavier_uniform(k3, (n_hidden, 32 * 6 * 6), 32 * 6 * 6, n_hidden, 1.0)
    wf2 = _xavier_uniform(k4, (n_out, n_hidden), n_hidden, n_out, 1.0)
    wf1r = wf1.reshape(n_hidden, 32, 36).transpose(1, 2, 0).astype(jnp.bfloat16)
    wf2t = wf2.T.astype(jnp.bfloat16)
    bf1 = jnp.zeros((n_hidden,), jnp.float32)
    bf2 = jnp.zeros((n_out,), jnp.float32)
    return (w1c, b1, w2c, b2, wf1r, bf1, wf2t, bf2)


# ----------------------------------------------------------------------------
# Forward pass (jit this; the im2col glue fuses around the two pallas_calls)
# ----------------------------------------------------------------------------
def cnn_forward(x_nchw, params):
    w1c, b1, w2c, b2, wf1r, bf1, wf2t, bf2 = params
    B, _, H, W = x_nchw.shape
    assert (H, W) == (32, 32), "fc1 hard-codes 32*6*6 => requires 32x32 spatial input"

    # channel-major activations (C, B, H, W); keeps every im2col step a pure slice
    xc = jnp.transpose(x_nchw, (1, 0, 2, 3)).astype(jnp.float32)
    xp = jnp.pad(xc, ((0, 0), (0, 0), (2, 2), (2, 2)))            # conv1 padding=2

    # conv1 (5x5, pad 2) + ReLU + 2x2 maxpool, fused; bf16 output
    cols1 = _im2col_conv1(xp, B)                                  # (4, 80, B*256)
    a1 = conv1_relu_pool(cols1, w1c, b1)                          # (32, B*256) bf16
    a1r = a1.reshape(32, B, 16, 16)

    # conv2 (5x5, pad 0) + ReLU + 2x2 maxpool + flatten + fc1 + tanh + fc2,
    # all fused in a single pallas_call
    cols2 = _im2col_conv2(a1r, B)                                 # (B, 800, 144)
    return conv2_pool_fc_fused(cols2, w2c, b2, wf1r, bf1, wf2t, bf2)   # (B, n_out)


# ----------------------------------------------------------------------------
if __name__ == "__main__":
    # The module hard-codes fc1 input = 32*6*6, which implies 32x32 spatial input.
    B, C_IN, H, W = 2, 3, 32, 32          # n_in = (B, 3, 32, 32)
    N_HIDDEN, N_OUT = 32, 10

    key = jax.random.PRNGKey(0)
    kx, kp = jax.random.split(key)
    x = jax.random.normal(kx, (B, C_IN, H, W), dtype=jnp.float32)
    params = init_params(kp, C_IN, N_HIDDEN, N_OUT)

    fwd = jax.jit(cnn_forward)
    out = jax.block_until_ready(fwd(x, params))
    assert out.shape == (B, N_OUT), out.shape
    assert bool(jnp.all(jnp.isfinite(out)))
    print("KERNEL_OK")
</pallas_src>

<mosaic_0001>
module attributes {stable_mosaic.version = 11 : i64} {
  func.func @_conv1_relu_pool_kernel(%arg0: i32, %arg1: memref<4x80x512xbf16, #tpu.memory_space<vmem>>, %arg2: memref<32x80xbf16, #tpu.memory_space<vmem>>, %arg3: memref<32x1xf32, #tpu.memory_space<vmem>>, %arg4: memref<32x512xbf16, #tpu.memory_space<vmem>>) attributes {dimension_semantics = [#tpu.dimension_semantics<arbitrary>], iteration_bounds = array<i64: 1>, scalar_prefetch = 0 : i64, scratch_operands = 0 : i64, tpu.core_type = #tpu.core_type<tc>, window_params = [{pipeline_mode = #tpu.pipeline_mode<synchronous>, transform_indices = @transform_0, window_bounds = array<i64: 4, 80, 512>}, {pipeline_mode = #tpu.pipeline_mode<synchronous>, transform_indices = @transform_1, window_bounds = array<i64: 32, 80>}, {pipeline_mode = #tpu.pipeline_mode<synchronous>, transform_indices = @transform_2, window_bounds = array<i64: 32, 1>}, {pipeline_mode = #tpu.pipeline_mode<synchronous>, transform_indices = @transform_3, window_bounds = array<i64: 32, 512>}]} {
    %c0 = arith.constant 0 : index
    %c0_0 = arith.constant 0 : index
    %0 = vector.load %arg2[%c0, %c0_0] : memref<32x80xbf16, #tpu.memory_space<vmem>>, vector<32x80xbf16>
    %c0_1 = arith.constant 0 : index
    %c0_2 = arith.constant 0 : index
    %c0_3 = arith.constant 0 : index
    %1 = vector.load %arg1[%c0_1, %c0_2, %c0_3] : memref<4x80x512xbf16, #tpu.memory_space<vmem>>, vector<1x80x512xbf16>
    %2 = vector.shape_cast %1 : vector<1x80x512xbf16> to vector<80x512xbf16>
    %cst = arith.constant dense<0.000000e+00> : vector<32x512xf32>
    %3 = tpu.matmul %0, %2, %cst {dimension_numbers = #tpu.dot_dimension_numbers<[1], [0], [0], [1], [0, 0, 1, 1], [], []>} : vector<32x80xbf16>, vector<80x512xbf16>, vector<32x512xf32> -> vector<32x512xf32>
    %c1 = arith.constant 1 : index
    %c0_4 = arith.constant 0 : index
    %c0_5 = arith.constant 0 : index
    %4 = vector.load %arg1[%c1, %c0_4, %c0_5] : memref<4x80x512xbf16, #tpu.memory_space<vmem>>, vector<1x80x512xbf16>
    %5 = vector.shape_cast %4 : vector<1x80x512xbf16> to vector<80x512xbf16>
    %cst_6 = arith.constant dense<0.000000e+00> : vector<32x512xf32>
    %6 = tpu.matmul %0, %5, %cst_6 {dimension_numbers = #tpu.dot_dimension_numbers<[1], [0], [0], [1], [0, 0, 1, 1], [], []>} : vector<32x80xbf16>, vector<80x512xbf16>, vector<32x512xf32> -> vector<32x512xf32>
    %7 = arith.maximumf %3, %6 : vector<32x512xf32>
    %c2 = arith.constant 2 : index
    %c0_7 = arith.constant 0 : index
    %c0_8 = arith.constant 0 : index
    %8 = vector.load %arg1[%c2, %c0_7, %c0_8] : memref<4x80x512xbf16, #tpu.memory_space<vmem>>, vector<1x80x512xbf16>
    %9 = vector.shape_cast %8 : vector<1x80x512xbf16> to vector<80x512xbf16>
    %cst_9 = arith.constant dense<0.000000e+00> : vector<32x512xf32>
    %10 = tpu.matmul %0, %9, %cst_9 {dimension_numbers = #tpu.dot_dimension_numbers<[1], [0], [0], [1], [0, 0, 1, 1], [], []>} : vector<32x80xbf16>, vector<80x512xbf16>, vector<32x512xf32> -> vector<32x512xf32>
    %11 = arith.maximumf %7, %10 : vector<32x512xf32>
    %c3 = arith.constant 3 : index
    %c0_10 = arith.constant 0 : index
    %c0_11 = arith.constant 0 : index
    %12 = vector.load %arg1[%c3, %c0_10, %c0_11] : memref<4x80x512xbf16, #tpu.memory_space<vmem>>, vector<1x80x512xbf16>
    %13 = vector.shape_cast %12 : vector<1x80x512xbf16> to vector<80x512xbf16>
    %cst_12 = arith.constant dense<0.000000e+00> : vector<32x512xf32>
    %14 = tpu.matmul %0, %13, %cst_12 {dimension_numbers = #tpu.dot_dimension_numbers<[1], [0], [0], [1], [0, 0, 1, 1], [], []>} : vector<32x80xbf16>, vector<80x512xbf16>, vector<32x512xf32> -> vector<32x512xf32>
    %15 = arith.maximumf %11, %14 : vector<32x512xf32>
    %c0_13 = arith.constant 0 : index
    %c0_14 = arith.constant 0 : index
    %16 = vector.load %arg3[%c0_13, %c0_14] : memref<32x1xf32, #tpu.memory_space<vmem>>, vector<32x1xf32>
    %17 = vector.broadcast %16 : vector<32x1xf32> to vector<32x512xf32>
    %18 = arith.addf %15, %17 : vector<32x512xf32>
    %cst_15 = arith.constant 0.000000e+00 : f32
    %19 = vector.broadcast %cst_15 : f32 to vector<32x512xf32>
    %20 = arith.maximumf %18, %19 : vector<32x512xf32>
    %21 = arith.truncf %20 : vector<32x512xf32> to vector<32x512xbf16>
    %c0_16 = arith.constant 0 : index
    %c0_17 = arith.constant 0 : index
    %22 = vector.load %arg4[%c0_16, %c0_17] : memref<32x512xbf16, #tpu.memory_space<vmem>>, vector<32x512xbf16>
    tpu.vector_store %arg4[%c0_16, %c0_17], %21 {strides = array<i32>} : memref<32x512xbf16, #tpu.memory_space<vmem>>, vector<32x512xbf16>,
    return
  }
  func.func @transform_0(%arg0: i32) -> (i32, i32, i32) {
    %c0_i32 = arith.constant 0 : i32
    %c0_i32_0 = arith.constant 0 : i32
    %c0_i32_1 = arith.constant 0 : i32
    %c0_i32_2 = arith.constant 0 : i32
    return %c0_i32, %c0_i32_0, %c0_i32_1 : i32, i32, i32
  }
  func.func @transform_1(%arg0: i32) -> (i32, i32) {
    %c0_i32 = arith.constant 0 : i32
    %c0_i32_0 = arith.constant 0 : i32
    %c0_i32_1 = arith.constant 0 : i32
    return %c0_i32, %c0_i32_0 : i32, i32
  }
  func.func @transform_2(%arg0: i32) -> (i32, i32) {
    %c0_i32 = arith.constant 0 : i32
    %c0_i32_0 = arith.constant 0 : i32
    %c0_i32_1 = arith.constant 0 : i32
    return %c0_i32, %c0_i32_0 : i32, i32
  }
  func.func @transform_3(%arg0: i32) -> (i32, i32) {
    %c0_i32 = arith.constant 0 : i32
    %c0_i32_0 = arith.constant 0 : i32
    %c0_i32_1 = arith.constant 0 : i32
    return %c0_i32, %c0_i32_0 : i32, i32
  }
}

module attributes {stable_mosaic.version = 11 : i64} {
  func.func @_conv2_pool_fc_kernel(%arg0: i32, %arg1: memref<2x800x144xbf16, #tpu.memory_space<vmem>>, %arg2: memref<32x800xbf16, #tpu.memory_space<vmem>>, %arg3: memref<1x32x1xf32, #tpu.memory_space<vmem>>, %arg4: memref<32x36x32xbf16, #tpu.memory_space<vmem>>, %arg5: memref<1x32xf32, #tpu.memory_space<vmem>>, %arg6: memref<32x10xbf16, #tpu.memory_space<vmem>>, %arg7: memref<1x10xf32, #tpu.memory_space<vmem>>, %arg8: memref<2x10xf32, #tpu.memory_space<vmem>>) attributes {dimension_semantics = [#tpu.dimension_semantics<arbitrary>], iteration_bounds = array<i64: 1>, scalar_prefetch = 0 : i64, scratch_operands = 0 : i64, tpu.core_type = #tpu.core_type<tc>, window_params = [{pipeline_mode = #tpu.pipeline_mode<synchronous>, transform_indices = @transform_0, window_bounds = array<i64: 2, 800, 144>}, {pipeline_mode = #tpu.pipeline_mode<synchronous>, transform_indices = @transform_1, window_bounds = array<i64: 32, 800>}, {pipeline_mode = #tpu.pipeline_mode<synchronous>, transform_indices = @transform_2, window_bounds = array<i64: 1, 32, 1>}, {pipeline_mode = #tpu.pipeline_mode<synchronous>, transform_indices = @transform_3, window_bounds = array<i64: 32, 36, 32>}, {pipeline_mode = #tpu.pipeline_mode<synchronous>, transform_indices = @transform_4, window_bounds = array<i64: 1, 32>}, {pipeline_mode = #tpu.pipeline_mode<synchronous>, transform_indices = @transform_5, window_bounds = array<i64: 32, 10>}, {pipeline_mode = #tpu.pipeline_mode<synchronous>, transform_indices = @transform_6, window_bounds = array<i64: 1, 10>}, {pipeline_mode = #tpu.pipeline_mode<synchronous>, transform_indices = @transform_7, window_bounds = array<i64: 2, 10>}]} {
    %c0 = arith.constant 0 : index
    %c0_0 = arith.constant 0 : index
    %0 = vector.load %arg2[%c0, %c0_0] : memref<32x800xbf16, #tpu.memory_space<vmem>>, vector<32x800xbf16>
    %1 = vector.shape_cast %0 : vector<32x800xbf16> to vector<1x32x800xbf16>
    %2 = vector.broadcast %1 : vector<1x32x800xbf16> to vector<2x32x800xbf16>
    %c0_1 = arith.constant 0 : index
    %c0_2 = arith.constant 0 : index
    %c0_3 = arith.constant 0 : index
    %3 = vector.load %arg1[%c0_1, %c0_2, %c0_3] : memref<2x800x144xbf16, #tpu.memory_space<vmem>>, vector<2x800x144xbf16>
    "tpu.trace_start"() <{level = 10 : i32, message = "bck,bkn->bcn"}> : () -> ()
    %cst = arith.constant dense<0.000000e+00> : vector<2x32x144xf32>
    %4 = tpu.matmul %2, %3, %cst {dimension_numbers = #tpu.dot_dimension_numbers<[2], [1], [1], [2], [0, 0, 0, 1, 1, 2], [0], [0]>} : vector<2x32x800xbf16>, vector<2x800x144xbf16>, vector<2x32x144xf32> -> vector<2x32x144xf32>
    "tpu.trace_stop"() : () -> ()
    %5 = vector.extract_strided_slice %4 {offsets = [0, 0, 0], sizes = [2, 32, 36], strides = [1, 1, 1]} : vector<2x32x144xf32> to vector<2x32x36xf32>
    %6 = vector.extract_strided_slice %4 {offsets = [0, 0, 36], sizes = [2, 32, 36], strides = [1, 1, 1]} : vector<2x32x144xf32> to vector<2x32x36xf32>
    %7 = arith.maximumf %5, %6 : vector<2x32x36xf32>
    %8 = vector.extract_strided_slice %4 {offsets = [0, 0, 72], sizes = [2, 32, 36], strides = [1, 1, 1]} : vector<2x32x144xf32> to vector<2x32x36xf32>
    %9 = arith.maximumf %7, %8 : vector<2x32x36xf32>
    %10 = vector.extract_strided_slice %4 {offsets = [0, 0, 108], sizes = [2, 32, 36], strides = [1, 1, 1]} : vector<2x32x144xf32> to vector<2x32x36xf32>
    %11 = arith.maximumf %9, %10 : vector<2x32x36xf32>
    %c0_4 = arith.constant 0 : index
    %c0_5 = arith.constant 0 : index
    %c0_6 = arith.constant 0 : index
    %12 = vector.load %arg3[%c0_4, %c0_5, %c0_6] : memref<1x32x1xf32, #tpu.memory_space<vmem>>, vector<1x32x1xf32>
    %13 = vector.broadcast %12 : vector<1x32x1xf32> to vector<2x32x36xf32>
    %14 = arith.addf %11, %13 : vector<2x32x36xf32>
    %cst_7 = arith.constant 0.000000e+00 : f32
    %15 = vector.broadcast %cst_7 : f32 to vector<2x32x36xf32>
    %16 = arith.maximumf %14, %15 : vector<2x32x36xf32>
    %17 = arith.truncf %16 : vector<2x32x36xf32> to vector<2x32x36xbf16>
    %c0_8 = arith.constant 0 : index
    %c0_9 = arith.constant 0 : index
    %c0_10 = arith.constant 0 : index
    %18 = vector.load %arg4[%c0_8, %c0_9, %c0_10] : memref<32x36x32xbf16, #tpu.memory_space<vmem>>, vector<32x36x32xbf16>
    %19 = vector.extract_strided_slice %17 {offsets = [0, 0, 0], sizes = [2, 1, 36], strides = [1, 1, 1]} : vector<2x32x36xbf16> to vector<2x1x36xbf16>
    %20 = vector.shape_cast %19 : vector<2x1x36xbf16> to vector<2x36xbf16>
    %21 = vector.extract_strided_slice %18 {offsets = [0, 0, 0], sizes = [1, 36, 32], strides = [1, 1, 1]} : vector<32x36x32xbf16> to vector<1x36x32xbf16>
    %22 = vector.shape_cast %21 : vector<1x36x32xbf16> to vector<36x32xbf16>
    %cst_11 = arith.constant dense<0.000000e+00> : vector<2x32xf32>
    %23 = tpu.matmul %20, %22, %cst_11 {dimension_numbers = #tpu.dot_dimension_numbers<[1], [0], [0], [1], [0, 0, 1, 1], [], []>} : vector<2x36xbf16>, vector<36x32xbf16>, vector<2x32xf32> -> vector<2x32xf32>
    %24 = vector.extract_strided_slice %17 {offsets = [0, 1, 0], sizes = [2, 1, 36], strides = [1, 1, 1]} : vector<2x32x36xbf16> to vector<2x1x36xbf16>
    %25 = vector.shape_cast %24 : vector<2x1x36xbf16> to vector<2x36xbf16>
    %26 = vector.extract_strided_slice %18 {offsets = [1, 0, 0], sizes = [1, 36, 32], strides = [1, 1, 1]} : vector<32x36x32xbf16> to vector<1x36x32xbf16>
    %27 = vector.shape_cast %26 : vector<1x36x32xbf16> to vector<36x32xbf16>
    %cst_12 = arith.constant dense<0.000000e+00> : vector<2x32xf32>
    %28 = tpu.matmul %25, %27, %cst_12 {dimension_numbers = #tpu.dot_dimension_numbers<[1], [0], [0], [1], [0, 0, 1, 1], [], []>} : vector<2x36xbf16>, vector<36x32xbf16>, vector<2x32xf32> -> vector<2x32xf32>
    %29 = arith.addf %23, %28 : vector<2x32xf32>
    %30 = vector.extract_strided_slice %17 {offsets = [0, 2, 0], sizes = [2, 1, 36], strides = [1, 1, 1]} : vector<2x32x36xbf16> to vector<2x1x36xbf16>
    %31 = vector.shape_cast %30 : vector<2x1x36xbf16> to vector<2x36xbf16>
    %32 = vector.extract_strided_slice %18 {offsets = [2, 0, 0], sizes = [1, 36, 32], strides = [1, 1, 1]} : vector<32x36x32xbf16> to vector<1x36x32xbf16>
    %33 = vector.shape_cast %32 : vector<1x36x32xbf16> to vector<36x32xbf16>
    %cst_13 = arith.constant dense<0.000000e+00> : vector<2x32xf32>
    %34 = tpu.matmul %31, %33, %cst_13 {dimension_numbers = #tpu.dot_dimension_numbers<[1], [0], [0], [1], [0, 0, 1, 1], [], []>} : vector<2x36xbf16>, vector<36x32xbf16>, vector<2x32xf32> -> vector<2x32xf32>
    %35 = arith.addf %29, %34 : vector<2x32xf32>
    %36 = vector.extract_strided_slice %17 {offsets = [0, 3, 0], sizes = [2, 1, 36], strides = [1, 1, 1]} : vector<2x32x36xbf16> to vector<2x1x36xbf16>
    %37 = vector.shape_cast %36 : vector<2x1x36xbf16> to vector<2x36xbf16>
    %38 = vector.extract_strided_slice %18 {offsets = [3, 0, 0], sizes = [1, 36, 32], strides = [1, 1, 1]} : vector<32x36x32xbf16> to vector<1x36x32xbf16>
    %39 = vector.shape_cast %38 : vector<1x36x32xbf16> to vector<36x32xbf16>
    %cst_14 = arith.constant dense<0.000000e+00> : vector<2x32xf32>
    %40 = tpu.matmul %37, %39, %cst_14 {dimension_numbers = #tpu.dot_dimension_numbers<[1], [0], [0], [1], [0, 0, 1, 1], [], []>} : vector<2x36xbf16>, vector<36x32xbf16>, vector<2x32xf32> -> vector<2x32xf32>
    %41 = arith.addf %35, %40 : vector<2x32xf32>
    %42 = vector.extract_strided_slice %17 {offsets = [0, 4, 0], sizes = [2, 1, 36], strides = [1, 1, 1]} : vector<2x32x36xbf16> to vector<2x1x36xbf16>
    %43 = vector.shape_cast %42 : vector<2x1x36xbf16> to vector<2x36xbf16>
    %44 = vector.extract_strided_slice %18 {offsets = [4, 0, 0], sizes = [1, 36, 32], strides = [1, 1, 1]} : vector<32x36x32xbf16> to vector<1x36x32xbf16>
    %45 = vector.shape_cast %44 : vector<1x36x32xbf16> to vector<36x32xbf16>
    %cst_15 = arith.constant dense<0.000000e+00> : vector<2x32xf32>
    %46 = tpu.matmul %43, %45, %cst_15 {dimension_numbers = #tpu.dot_dimension_numbers<[1], [0], [0], [1], [0, 0, 1, 1], [], []>} : vector<2x36xbf16>, vector<36x32xbf16>, vector<2x32xf32> -> vector<2x32xf32>
    %47 = arith.addf %41, %46 : vector<2x32xf32>
    %48 = vector.extract_strided_slice %17 {offsets = [0, 5, 0], sizes = [2, 1, 36], strides = [1, 1, 1]} : vector<2x32x36xbf16> to vector<2x1x36xbf16>
    %49 = vector.shape_cast %48 : vector<2x1x36xbf16> to vector<2x36xbf16>
    %50 = vector.extract_strided_slice %18 {offsets = [5, 0, 0], sizes = [1, 36, 32], strides = [1, 1, 1]} : vector<32x36x32xbf16> to vector<1x36x32xbf16>
    %51 = vector.shape_cast %50 : vector<1x36x32xbf16> to vector<36x32xbf16>
    %cst_16 = arith.constant dense<0.000000e+00> : vector<2x32xf32>
    %52 = tpu.matmul %49, %51, %cst_16 {dimension_numbers = #tpu.dot_dimension_numbers<[1], [0], [0], [1], [0, 0, 1, 1], [], []>} : vector<2x36xbf16>, vector<36x32xbf16>, vector<2x32xf32> -> vector<2x32xf32>
    %53 = arith.addf %47, %52 : vector<2x32xf32>
    %54 = vector.extract_strided_slice %17 {offsets = [0, 6, 0], sizes = [2, 1, 36], strides = [1, 1, 1]} : vector<2x32x36xbf16> to vector<2x1x36xbf16>
    %55 = vector.shape_cast %54 : vector<2x1x36xbf16> to vector<2x36xbf16>
    %56 = vector.extract_strided_slice %18 {offsets = [6, 0, 0], sizes = [1, 36, 32], strides = [1, 1, 1]} : vector<32x36x32xbf16> to vector<1x36x32xbf16>
    %57 = vector.shape_cast %56 : vector<1x36x32xbf16> to vector<36x32xbf16>
    %cst_17 = arith.constant dense<0.000000e+00> : vector<2x32xf32>
    %58 = tpu.matmul %55, %57, %cst_17 {dimension_numbers = #tpu.dot_dimension_numbers<[1], [0], [0], [1], [0, 0, 1, 1], [], []>} : vector<2x36xbf16>, vector<36x32xbf16>, vector<2x32xf32> -> vector<2x32xf32>
    %59 = arith.addf %53, %58 : vector<2x32xf32>
    %60 = vector.extract_strided_slice %17 {offsets = [0, 7, 0], sizes = [2, 1, 36], strides = [1, 1, 1]} : vector<2x32x36xbf16> to vector<2x1x36xbf16>
    %61 = vector.shape_cast %60 : vector<2x1x36xbf16> to vector<2x36xbf16>
    %62 = vector.extract_strided_slice %18 {offsets = [7, 0, 0], sizes = [1, 36, 32], strides = [1, 1, 1]} : vector<32x36x32xbf16> to vector<1x36x32xbf16>
    %63 = vector.shape_cast %62 : vector<1x36x32xbf16> to vector<36x32xbf16>
    %cst_18 = arith.constant dense<0.000000e+00> : vector<2x32xf32>
    %64 = tpu.matmul %61, %63, %cst_18 {dimension_numbers = #tpu.dot_dimension_numbers<[1], [0], [0], [1], [0, 0, 1, 1], [], []>} : vector<2x36xbf16>, vector<36x32xbf16>, vector<2x32xf32> -> vector<2x32xf32>
    %65 = arith.addf %59, %64 : vector<2x32xf32>
    %66 = vector.extract_strided_slice %17 {offsets = [0, 8, 0], sizes = [2, 1, 36], strides = [1, 1, 1]} : vector<2x32x36xbf16> to vector<2x1x36xbf16>
    %67 = vector.shape_cast %66 : vector<2x1x36xbf16> to vector<2x36xbf16>
    %68 = vector.extract_strided_slice %18 {offsets = [8, 0, 0], sizes = [1, 36, 32], strides = [1, 1, 1]} : vector<32x36x32xbf16> to vector<1x36x32xbf16>
    %69 = vector.shape_cast %68 : vector<1x36x32xbf16> to vector<36x32xbf16>
    %cst_19 = arith.constant dense<0.000000e+00> : vector<2x32xf32>
    %70 = tpu.matmul %67, %69, %cst_19 {dimension_numbers = #tpu.dot_dimension_numbers<[1], [0], [0], [1], [0, 0, 1, 1], [], []>} : vector<2x36xbf16>, vector<36x32xbf16>, vector<2x32xf32> -> vector<2x32xf32>
    %71 = arith.addf %65, %70 : vector<2x32xf32>
    %72 = vector.extract_strided_slice %17 {offsets = [0, 9, 0], sizes = [2, 1, 36], strides = [1, 1, 1]} : vector<2x32x36xbf16> to vector<2x1x36xbf16>
    %73 = vector.shape_cast %72 : vector<2x1x36xbf16> to vector<2x36xbf16>
    %74 = vector.extract_strided_slice %18 {offsets = [9, 0, 0], sizes = [1, 36, 32], strides = [1, 1, 1]} : vector<32x36x32xbf16> to vector<1x36x32xbf16>
    %75 = vector.shape_cast %74 : vector<1x36x32xbf16> to vector<36x32xbf16>
    %cst_20 = arith.constant dense<0.000000e+00> : vector<2x32xf32>
    %76 = tpu.matmul %73, %75, %cst_20 {dimension_numbers = #tpu.dot_dimension_numbers<[1], [0], [0], [1], [0, 0, 1, 1], [], []>} : vector<2x36xbf16>, vector<36x32xbf16>, vector<2x32xf32> -> vector<2x32xf32>
    %77 = arith.addf %71, %76 : vector<2x32xf32>
    %78 = vector.extract_strided_slice %17 {offsets = [0, 10, 0], sizes = [2, 1, 36], strides = [1, 1, 1]} : vector<2x32x36xbf16> to vector<2x1x36xbf16>
    %79 = vector.shape_cast %78 : vector<2x1x36xbf16> to vector<2x36xbf16>
    %80 = vector.extract_strided_slice %18 {offsets = [10, 0, 0], sizes = [1, 36, 32], strides = [1, 1, 1]} : vector<32x36x32xbf16> to vector<1x36x32xbf16>
    %81 = vector.shape_cast %80 : vector<1x36x32xbf16> to vector<36x32xbf16>
    %cst_21 = arith.constant dense<0.000000e+00> : vector<2x32xf32>
    %82 = tpu.matmul %79, %81, %cst_21 {dimension_numbers = #tpu.dot_dimension_numbers<[1], [0], [0], [1], [0, 0, 1, 1], [], []>} : vector<2x36xbf16>, vector<36x32xbf16>, vector<2x32xf32> -> vector<2x32xf32>
    %83 = arith.addf %77, %82 : vector<2x32xf32>
    %84 = vector.extract_strided_slice %17 {offsets = [0, 11, 0], sizes = [2, 1, 36], strides = [1, 1, 1]} : vector<2x32x36xbf16> to vector<2x1x36xbf16>
    %85 = vector.shape_cast %84 : vector<2x1x36xbf16> to vector<2x36xbf16>
    %86 = vector.extract_strided_slice %18 {offsets = [11, 0, 0], sizes = [1, 36, 32], strides = [1, 1, 1]} : vector<32x36x32xbf16> to vector<1x36x32xbf16>
    %87 = vector.shape_cast %86 : vector<1x36x32xbf16> to vector<36x32xbf16>
    %cst_22 = arith.constant dense<0.000000e+00> : vector<2x32xf32>
    %88 = tpu.matmul %85, %87, %cst_22 {dimension_numbers = #tpu.dot_dimension_numbers<[1], [0], [0], [1], [0, 0, 1, 1], [], []>} : vector<2x36xbf16>, vector<36x32xbf16>, vector<2x32xf32> -> vector<2x32xf32>
    %89 = arith.addf %83, %88 : vector<2x32xf32>
    %90 = vector.extract_strided_slice %17 {offsets = [0, 12, 0], sizes = [2, 1, 36], strides = [1, 1, 1]} : vector<2x32x36xbf16> to vector<2x1x36xbf16>
    %91 = vector.shape_cast %90 : vector<2x1x36xbf16> to vector<2x36xbf16>
    %92 = vector.extract_strided_slice %18 {offsets = [12, 0, 0], sizes = [1, 36, 32], strides = [1, 1, 1]} : vector<32x36x32xbf16> to vector<1x36x32xbf16>
    %93 = vector.shape_cast %92 : vector<1x36x32xbf16> to vector<36x32xbf16>
    %cst_23 = arith.constant dense<0.000000e+00> : vector<2x32xf32>
    %94 = tpu.matmul %91, %93, %cst_23 {dimension_numbers = #tpu.dot_dimension_numbers<[1], [0], [0], [1], [0, 0, 1, 1], [], []>} : vector<2x36xbf16>, vector<36x32xbf16>, vector<2x32xf32> -> vector<2x32xf32>
    %95 = arith.addf %89, %94 : vector<2x32xf32>
    %96 = vector.extract_strided_slice %17 {offsets = [0, 13, 0], sizes = [2, 1, 36], strides = [1, 1, 1]} : vector<2x32x36xbf16> to vector<2x1x36xbf16>
    %97 = vector.shape_cast %96 : vector<2x1x36xbf16> to vector<2x36xbf16>
    %98 = vector.extract_strided_slice %18 {offsets = [13, 0, 0], sizes = [1, 36, 32], strides = [1, 1, 1]} : vector<32x36x32xbf16> to vector<1x36x32xbf16>
    %99 = vector.shape_cast %98 : vector<1x36x32xbf16> to vector<36x32xbf16>
    %cst_24 = arith.constant dense<0.000000e+00> : vector<2x32xf32>
    %100 = tpu.matmul %97, %99, %cst_24 {dimension_numbers = #tpu.dot_dimension_numbers<[1], [0], [0], [1], [0, 0, 1, 1], [], []>} : vector<2x36xbf16>, vector<36x32xbf16>, vector<2x32xf32> -> vector<2x32xf32>
    %101 = arith.addf %95, %100 : vector<2x32xf32>
    %102 = vector.extract_strided_slice %17 {offsets = [0, 14, 0], sizes = [2, 1, 36], strides = [1, 1, 1]} : vector<2x32x36xbf16> to vector<2x1x36xbf16>
    %103 = vector.shape_cast %102 : vector<2x1x36xbf16> to vector<2x36xbf16>
    %104 = vector.extract_strided_slice %18 {offsets = [14, 0, 0], sizes = [1, 36, 32], strides = [1, 1, 1]} : vector<32x36x32xbf16> to vector<1x36x32xbf16>
    %105 = vector.shape_cast %104 : vector<1x36x32xbf16> to vector<36x32xbf16>
    %cst_25 = arith.constant dense<0.000000e+00> : vector<2x32xf32>
    %106 = tpu.matmul %103, %105, %cst_25 {dimension_numbers = #tpu.dot_dimension_numbers<[1], [0], [0], [1], [0, 0, 1, 1], [], []>} : vector<2x36xbf16>, vector<36x32xbf16>, vector<2x32xf32> -> vector<2x32xf32>
    %107 = arith.addf %101, %106 : vector<2x32xf32>
    %108 = vector.extract_strided_slice %17 {offsets = [0, 15, 0], sizes = [2, 1, 36], strides = [1, 1, 1]} : vector<2x32x36xbf16> to vector<2x1x36xbf16>
    %109 = vector.shape_cast %108 : vector<2x1x36xbf16> to vector<2x36xbf16>
    %110 = vector.extract_strided_slice %18 {offsets = [15, 0, 0], sizes = [1, 36, 32], strides = [1, 1, 1]} : vector<32x36x32xbf16> to vector<1x36x32xbf16>
    %111 = vector.shape_cast %110 : vector<1x36x32xbf16> to vector<36x32xbf16>
    %cst_26 = arith.constant dense<0.000000e+00> : vector<2x32xf32>
    %112 = tpu.matmul %109, %111, %cst_26 {dimension_numbers = #tpu.dot_dimension_numbers<[1], [0], [0], [1], [0, 0, 1, 1], [], []>} : vector<2x36xbf16>, vector<36x32xbf16>, vector<2x32xf32> -> vector<2x32xf32>
    %113 = arith.addf %107, %112 : vector<2x32xf32>
    %114 = vector.extract_strided_slice %17 {offsets = [0, 16, 0], sizes = [2, 1, 36], strides = [1, 1, 1]} : vector<2x32x36xbf16> to vector<2x1x36xbf16>
    %115 = vector.shape_cast %114 : vector<2x1x36xbf16> to vector<2x36xbf16>
    %116 = vector.extract_strided_slice %18 {offsets = [16, 0, 0], sizes = [1, 36, 32], strides = [1, 1, 1]} : vector<32x36x32xbf16> to vector<1x36x32xbf16>
    %117 = vector.shape_cast %116 : vector<1x36x32xbf16> to vector<36x32xbf16>
    %cst_27 = arith.constant dense<0.000000e+00> : vector<2x32xf32>
    %118 = tpu.matmul %115, %117, %cst_27 {dimension_numbers = #tpu.dot_dimension_numbers<[1], [0], [0], [1], [0, 0, 1, 1], [], []>} : vector<2x36xbf16>, vector<36x32xbf16>, vector<2x32xf32> -> vector<2x32xf32>
    %119 = arith.addf %113, %118 : vector<2x32xf32>
    %120 = vector.extract_strided_slice %17 {offsets = [0, 17, 0], sizes = [2, 1, 36], strides = [1, 1, 1]} : vector<2x32x36xbf16> to vector<2x1x36xbf16>
    %121 = vector.shape_cast %120 : vector<2x1x36xbf16> to vector<2x36xbf16>
    %122 = vector.extract_strided_slice %18 {offsets = [17, 0, 0], sizes = [1, 36, 32], strides = [1, 1, 1]} : vector<32x36x32xbf16> to vector<1x36x32xbf16>
    %123 = vector.shape_cast %122 : vector<1x36x32xbf16> to vector<36x32xbf16>
    %cst_28 = arith.constant dense<0.000000e+00> : vector<2x32xf32>
    %124 = tpu.matmul %121, %123, %cst_28 {dimension_numbers = #tpu.dot_dimension_numbers<[1], [0], [0], [1], [0, 0, 1, 1], [], []>} : vector<2x36xbf16>, vector<36x32xbf16>, vector<2x32xf32> -> vector<2x32xf32>
    %125 = arith.addf %119, %124 : vector<2x32xf32>
    %126 = vector.extract_strided_slice %17 {offsets = [0, 18, 0], sizes = [2, 1, 36], strides = [1, 1, 1]} : vector<2x32x36xbf16> to vector<2x1x36xbf16>
    %127 = vector.shape_cast %126 : vector<2x1x36xbf16> to vector<2x36xbf16>
    %128 = vector.extract_strided_slice %18 {offsets = [18, 0, 0], sizes = [1, 36, 32], strides = [1, 1, 1]} : vector<32x36x32xbf16> to vector<1x36x32xbf16>
    %129 = vector.shape_cast %128 : vector<1x36x32xbf16> to vector<36x32xbf16>
    %cst_29 = arith.constant dense<0.000000e+00> : vector<2x32xf32>
    %130 = tpu.matmul %127, %129, %cst_29 {dimension_numbers = #tpu.dot_dimension_numbers<[1], [0], [0], [1], [0, 0, 1, 1], [], []>} : vector<2x36xbf16>, vector<36x32xbf16>, vector<2x32xf32> -> vector<2x32xf32>
    %131 = arith.addf %125, %130 : vector<2x32xf32>
    %132 = vector.extract_strided_slice %17 {offsets = [0, 19, 0], sizes = [2, 1, 36], strides = [1, 1, 1]} : vector<2x32x36xbf16> to vector<2x1x36xbf16>
    %133 = vector.shape_cast %132 : vector<2x1x36xbf16> to vector<2x36xbf16>
    %134 = vector.extract_strided_slice %18 {offsets = [19, 0, 0], sizes = [1, 36, 32], strides = [1, 1, 1]} : vector<32x36x32xbf16> to vector<1x36x32xbf16>
    %135 = vector.shape_cast %134 : vector<1x36x32xbf16> to vector<36x32xbf16>
    %cst_30 = arith.constant dense<0.000000e+00> : vector<2x32xf32>
    %136 = tpu.matmul %133, %135, %cst_30 {dimension_numbers = #tpu.dot_dimension_numbers<[1], [0], [0], [1], [0, 0, 1, 1], [], []>} : vector<2x36xbf16>, vector<36x32xbf16>, vector<2x32xf32> -> vector<2x32xf32>
    %137 = arith.addf %131, %136 : vector<2x32xf32>
    %138 = vector.extract_strided_slice %17 {offsets = [0, 20, 0], sizes = [2, 1, 36], strides = [1, 1, 1]} : vector<2x32x36xbf16> to vector<2x1x36xbf16>
    %139 = vector.shape_cast %138 : vector<2x1x36xbf16> to vector<2x36xbf16>
    %140 = vector.extract_strided_slice %18 {offsets = [20, 0, 0], sizes = [1, 36, 32], strides = [1, 1, 1]} : vector<32x36x32xbf16> to vector<1x36x32xbf16>
    %141 = vector.shape_cast %140 : vector<1x36x32xbf16> to vector<36x32xbf16>
    %cst_31 = arith.constant dense<0.000000e+00> : vector<2x32xf32>
    %142 = tpu.matmul %139, %141, %cst_31 {dimension_numbers = #tpu.dot_dimension_numbers<[1], [0], [0], [1], [0, 0, 1, 1], [], []>} : vector<2x36xbf16>, vector<36x32xbf16>, vector<2x32xf32> -> vector<2x32xf32>
    %143 = arith.addf %137, %142 : vector<2x32xf32>
    %144 = vector.extract_strided_slice %17 {offsets = [0, 21, 0], sizes = [2, 1, 36], strides = [1, 1, 1]} : vector<2x32x36xbf16> to vector<2x1x36xbf16>
    %145 = vector.shape_cast %144 : vector<2x1x36xbf16> to vector<2x36xbf16>
    %146 = vector.extract_strided_slice %18 {offsets = [21, 0, 0], sizes = [1, 36, 32], strides = [1, 1, 1]} : vector<32x36x32xbf16> to vector<1x36x32xbf16>
    %147 = vector.shape_cast %146 : vector<1x36x32xbf16> to vector<36x32xbf16>
    %cst_32 = arith.constant dense<0.000000e+00> : vector<2x32xf32>
    %148 = tpu.matmul %145, %147, %cst_32 {dimension_numbers = #tpu.dot_dimension_numbers<[1], [0], [0], [1], [0, 0, 1, 1], [], []>} : vector<2x36xbf16>, vector<36x32xbf16>, vector<2x32xf32> -> vector<2x32xf32>
    %149 = arith.addf %143, %148 : vector<2x32xf32>
    %150 = vector.extract_strided_slice %17 {offsets = [0, 22, 0], sizes = [2, 1, 36], strides = [1, 1, 1]} : vector<2x32x36xbf16> to vector<2x1x36xbf16>
    %151 = vector.shape_cast %150 : vector<2x1x36xbf16> to vector<2x36xbf16>
    %152 = vector.extract_strided_slice %18 {offsets = [22, 0, 0], sizes = [1, 36, 32], strides = [1, 1, 1]} : vector<32x36x32xbf16> to vector<1x36x32xbf16>
    %153 = vector.shape_cast %152 : vector<1x36x32xbf16> to vector<36x32xbf16>
    %cst_33 = arith.constant dense<0.000000e+00> : vector<2x32xf32>
    %154 = tpu.matmul %151, %153, %cst_33 {dimension_numbers = #tpu.dot_dimension_numbers<[1], [0], [0], [1], [0, 0, 1, 1], [], []>} : vector<2x36xbf16>, vector<36x32xbf16>, vector<2x32xf32> -> vector<2x32xf32>
    %155 = arith.addf %149, %154 : vector<2x32xf32>
    %156 = vector.extract_strided_slice %17 {offsets = [0, 23, 0], sizes = [2, 1, 36], strides = [1, 1, 1]} : vector<2x32x36xbf16> to vector<2x1x36xbf16>
    %157 = vector.shape_cast %156 : vector<2x1x36xbf16> to vector<2x36xbf16>
    %158 = vector.extract_strided_slice %18 {offsets = [23, 0, 0], sizes = [1, 36, 32], strides = [1, 1, 1]} : vector<32x36x32xbf16> to vector<1x36x32xbf16>
    %159 = vector.shape_cast %158 : vector<1x36x32xbf16> to vector<36x32xbf16>
    %cst_34 = arith.constant dense<0.000000e+00> : vector<2x32xf32>
    %160 = tpu.matmul %157, %159, %cst_34 {dimension_numbers = #tpu.dot_dimension_numbers<[1], [0], [0], [1], [0, 0, 1, 1], [], []>} : vector<2x36xbf16>, vector<36x32xbf16>, vector<2x32xf32> -> vector<2x32xf32>
    %161 = arith.addf %155, %160 : vector<2x32xf32>
    %162 = vector.extract_strided_slice %17 {offsets = [0, 24, 0], sizes = [2, 1, 36], strides = [1, 1, 1]} : vector<2x32x36xbf16> to vector<2x1x36xbf16>
    %163 = vector.shape_cast %162 : vector<2x1x36xbf16> to vector<2x36xbf16>
    %164 = vector.extract_strided_slice %18 {offsets = [24, 0, 0], sizes = [1, 36, 32], strides = [1, 1, 1]} : vector<32x36x32xbf16> to vector<1x36x32xbf16>
    %165 = vector.shape_cast %164 : vector<1x36x32xbf16> to vector<36x32xbf16>
    %cst_35 = arith.constant dense<0.000000e+00> : vector<2x32xf32>
    %166 = tpu.matmul %163, %165, %cst_35 {dimension_numbers = #tpu.dot_dimension_numbers<[1], [0], [0], [1], [0, 0, 1, 1], [], []>} : vector<2x36xbf16>, vector<36x32xbf16>, vector<2x32xf32> -> vector<2x32xf32>
    %167 = arith.addf %161, %166 : vector<2x32xf32>
    %168 = vector.extract_strided_slice %17 {offsets = [0, 25, 0], sizes = [2, 1, 36], strides = [1, 1, 1]} : vector<2x32x36xbf16> to vector<2x1x36xbf16>
    %169 = vector.shape_cast %168 : vector<2x1x36xbf16> to vector<2x36xbf16>
    %170 = vector.extract_strided_slice %18 {offsets = [25, 0, 0], sizes = [1, 36, 32], strides = [1, 1, 1]} : vector<32x36x32xbf16> to vector<1x36x32xbf16>
    %171 = vector.shape_cast %170 : vector<1x36x32xbf16> to vector<36x32xbf16>
    %cst_36 = arith.constant dense<0.000000e+00> : vector<2x32xf32>
    %172 = tpu.matmul %169, %171, %cst_36 {dimension_numbers = #tpu.dot_dimension_numbers<[1], [0], [0], [1], [0, 0, 1, 1], [], []>} : vector<2x36xbf16>, vector<36x32xbf16>, vector<2x32xf32> -> vector<2x32xf32>
    %173 = arith.addf %167, %172 : vector<2x32xf32>
    %174 = vector.extract_strided_slice %17 {offsets = [0, 26, 0], sizes = [2, 1, 36], strides = [1, 1, 1]} : vector<2x32x36xbf16> to vector<2x1x36xbf16>
    %175 = vector.shape_cast %174 : vector<2x1x36xbf16> to vector<2x36xbf16>
    %176 = vector.extract_strided_slice %18 {offsets = [26, 0, 0], sizes = [1, 36, 32], strides = [1, 1, 1]} : vector<32x36x32xbf16> to vector<1x36x32xbf16>
    %177 = vector.shape_cast %176 : vector<1x36x32xbf16> to vector<36x32xbf16>
    %cst_37 = arith.constant dense<0.000000e+00> : vector<2x32xf32>
    %178 = tpu.matmul %175, %177, %cst_37 {dimension_numbers = #tpu.dot_dimension_numbers<[1], [0], [0], [1], [0, 0, 1, 1], [], []>} : vector<2x36xbf16>, vector<36x32xbf16>, vector<2x32xf32> -> vector<2x32xf32>
    %179 = arith.addf %173, %178 : vector<2x32xf32>
    %180 = vector.extract_strided_slice %17 {offsets = [0, 27, 0], sizes = [2, 1, 36], strides = [1, 1, 1]} : vector<2x32x36xbf16> to vector<2x1x36xbf16>
    %181 = vector.shape_cast %180 : vector<2x1x36xbf16> to vector<2x36xbf16>
    %182 = vector.extract_strided_slice %18 {offsets = [27, 0, 0], sizes = [1, 36, 32], strides = [1, 1, 1]} : vector<32x36x32xbf16> to vector<1x36x32xbf16>
    %183 = vector.shape_cast %182 : vector<1x36x32xbf16> to vector<36x32xbf16>
    %cst_38 = arith.constant dense<0.000000e+00> : vector<2x32xf32>
    %184 = tpu.matmul %181, %183, %cst_38 {dimension_numbers = #tpu.dot_dimension_numbers<[1], [0], [0], [1], [0, 0, 1, 1], [], []>} : vector<2x36xbf16>, vector<36x32xbf16>, vector<2x32xf32> -> vector<2x32xf32>
    %185 = arith.addf %179, %184 : vector<2x32xf32>
    %186 = vector.extract_strided_slice %17 {offsets = [0, 28, 0], sizes = [2, 1, 36], strides = [1, 1, 1]} : vector<2x32x36xbf16> to vector<2x1x36xbf16>
    %187 = vector.shape_cast %186 : vector<2x1x36xbf16> to vector<2x36xbf16>
    %188 = vector.extract_strided_slice %18 {offsets = [28, 0, 0], sizes = [1, 36, 32], strides = [1, 1, 1]} : vector<32x36x32xbf16> to vector<1x36x32xbf16>
    %189 = vector.shape_cast %188 : vector<1x36x32xbf16> to vector<36x32xbf16>
    %cst_39 = arith.constant dense<0.000000e+00> : vector<2x32xf32>
    %190 = tpu.matmul %187, %189, %cst_39 {dimension_numbers = #tpu.dot_dimension_numbers<[1], [0], [0], [1], [0, 0, 1, 1], [], []>} : vector<2x36xbf16>, vector<36x32xbf16>, vector<2x32xf32> -> vector<2x32xf32>
    %191 = arith.addf %185, %190 : vector<2x32xf32>
    %192 = vector.extract_strided_slice %17 {offsets = [0, 29, 0], sizes = [2, 1, 36], strides = [1, 1, 1]} : vector<2x32x36xbf16> to vector<2x1x36xbf16>
    %193 = vector.shape_cast %192 : vector<2x1x36xbf16> to vector<2x36xbf16>
    %194 = vector.extract_strided_slice %18 {offsets = [29, 0, 0], sizes = [1, 36, 32], strides = [1, 1, 1]} : vector<32x36x32xbf16> to vector<1x36x32xbf16>
    %195 = vector.shape_cast %194 : vector<1x36x32xbf16> to vector<36x32xbf16>
    %cst_40 = arith.constant dense<0.000000e+00> : vector<2x32xf32>
    %196 = tpu.matmul %193, %195, %cst_40 {dimension_numbers = #tpu.dot_dimension_numbers<[1], [0], [0], [1], [0, 0, 1, 1], [], []>} : vector<2x36xbf16>, vector<36x32xbf16>, vector<2x32xf32> -> vector<2x32xf32>
    %197 = arith.addf %191, %196 : vector<2x32xf32>
    %198 = vector.extract_strided_slice %17 {offsets = [0, 30, 0], sizes = [2, 1, 36], strides = [1, 1, 1]} : vector<2x32x36xbf16> to vector<2x1x36xbf16>
    %199 = vector.shape_cast %198 : vector<2x1x36xbf16> to vector<2x36xbf16>
    %200 = vector.extract_strided_slice %18 {offsets = [30, 0, 0], sizes = [1, 36, 32], strides = [1, 1, 1]} : vector<32x36x32xbf16> to vector<1x36x32xbf16>
    %201 = vector.shape_cast %200 : vector<1x36x32xbf16> to vector<36x32xbf16>
    %cst_41 = arith.constant dense<0.000000e+00> : vector<2x32xf32>
    %202 = tpu.matmul %199, %201, %cst_41 {dimension_numbers = #tpu.dot_dimension_numbers<[1], [0], [0], [1], [0, 0, 1, 1], [], []>} : vector<2x36xbf16>, vector<36x32xbf16>, vector<2x32xf32> -> vector<2x32xf32>
    %203 = arith.addf %197, %202 : vector<2x32xf32>
    %204 = vector.extract_strided_slice %17 {offsets = [0, 31, 0], sizes = [2, 1, 36], strides = [1, 1, 1]} : vector<2x32x36xbf16> to vector<2x1x36xbf16>
    %205 = vector.shape_cast %204 : vector<2x1x36xbf16> to vector<2x36xbf16>
    %206 = vector.extract_strided_slice %18 {offsets = [31, 0, 0], sizes = [1, 36, 32], strides = [1, 1, 1]} : vector<32x36x32xbf16> to vector<1x36x32xbf16>
    %207 = vector.shape_cast %206 : vector<1x36x32xbf16> to vector<36x32xbf16>
    %cst_42 = arith.constant dense<0.000000e+00> : vector<2x32xf32>
    %208 = tpu.matmul %205, %207, %cst_42 {dimension_numbers = #tpu.dot_dimension_numbers<[1], [0], [0], [1], [0, 0, 1, 1], [], []>} : vector<2x36xbf16>, vector<36x32xbf16>, vector<2x32xf32> -> vector<2x32xf32>
    %209 = arith.addf %203, %208 : vector<2x32xf32>
    %c0_43 = arith.constant 0 : index
    %c0_44 = arith.constant 0 : index
    %210 = vector.load %arg5[%c0_43, %c0_44] : memref<1x32xf32, #tpu.memory_space<vmem>>, vector<1x32xf32>
    %211 = vector.broadcast %210 : vector<1x32xf32> to vector<2x32xf32>
    %212 = arith.addf %209, %211 : vector<2x32xf32>
    %213 = math.tanh %212 : vector<2x32xf32>
    %214 = arith.truncf %213 : vector<2x32xf32> to vector<2x32xbf16>
    %c0_45 = arith.constant 0 : index
    %c0_46 = arith.constant 0 : index
    %215 = vector.load %arg6[%c0_45, %c0_46] : memref<32x10xbf16, #tpu.memory_space<vmem>>, vector<32x10xbf16>
    %cst_47 = arith.constant dense<0.000000e+00> : vector<2x10xf32>
    %216 = tpu.matmul %214, %215, %cst_47 {dimension_numbers = #tpu.dot_dimension_numbers<[1], [0], [0], [1], [0, 0, 1, 1], [], []>} : vector<2x32xbf16>, vector<32x10xbf16>, vector<2x10xf32> -> vector<2x10xf32>
    %c0_48 = arith.constant 0 : index
    %c0_49 = arith.constant 0 : index
    %217 = vector.load %arg7[%c0_48, %c0_49] : memref<1x10xf32, #tpu.memory_space<vmem>>, vector<1x10xf32>
    %218 = vector.broadcast %217 : vector<1x10xf32> to vector<2x10xf32>
    %219 = arith.addf %216, %218 : vector<2x10xf32>
    %c0_50 = arith.constant 0 : index
    %c0_51 = arith.constant 0 : index
    %220 = vector.load %arg8[%c0_50, %c0_51] : memref<2x10xf32, #tpu.memory_space<vmem>>, vector<2x10xf32>
    tpu.vector_store %arg8[%c0_50, %c0_51], %219 {strides = array<i32>} : memref<2x10xf32, #tpu.memory_space<vmem>>, vector<2x10xf32>,
    return
  }
  func.func @transform_0(%arg0: i32) -> (i32, i32, i32) {
    %c0_i32 = arith.constant 0 : i32
    %c0_i32_0 = arith.constant 0 : i32
    %c0_i32_1 = arith.constant 0 : i32
    %c0_i32_2 = arith.constant 0 : i32
    return %c0_i32, %c0_i32_0, %c0_i32_1 : i32, i32, i32
  }
  func.func @transform_1(%arg0: i32) -> (i32, i32) {
    %c0_i32 = arith.constant 0 : i32
    %c0_i32_0 = arith.constant 0 : i32
    %c0_i32_1 = arith.constant 0 : i32
    return %c0_i32, %c0_i32_0 : i32, i32
  }
  func.func @transform_2(%arg0: i32) -> (i32, i32, i32) {
    %c0_i32 = arith.constant 0 : i32
    %c0_i32_0 = arith.constant 0 : i32
    %c0_i32_1 = arith.constant 0 : i32
    %c0_i32_2 = arith.constant 0 : i32
    return %c0_i32, %c0_i32_0, %c0_i32_1 : i32, i32, i32
  }
  func.func @transform_3(%arg0: i32) -> (i32, i32, i32) {
    %c0_i32 = arith.constant 0 : i32
    %c0_i32_0 = arith.constant 0 : i32
    %c0_i32_1 = arith.constant 0 : i32
    %c0_i32_2 = arith.constant 0 : i32
    return %c0_i32, %c0_i32_0, %c0_i32_1 : i32, i32, i32
  }
  func.func @transform_4(%arg0: i32) -> (i32, i32) {
    %c0_i32 = arith.constant 0 : i32
    %c0_i32_0 = arith.constant 0 : i32
    %c0_i32_1 = arith.constant 0 : i32
    return %c0_i32, %c0_i32_0 : i32, i32
  }
  func.func @transform_5(%arg0: i32) -> (i32, i32) {
    %c0_i32 = arith.constant 0 : i32
    %c0_i32_0 = arith.constant 0 : i32
    %c0_i32_1 = arith.constant 0 : i32
    return %c0_i32, %c0_i32_0 : i32, i32
  }
  func.func @transform_6(%arg0: i32) -> (i32, i32) {
    %c0_i32 = arith.constant 0 : i32
    %c0_i32_0 = arith.constant 0 : i32
    %c0_i32_1 = arith.constant 0 : i32
    return %c0_i32, %c0_i32_0 : i32, i32
  }
  func.func @transform_7(%arg0: i32) -> (i32, i32) {
    %c0_i32 = arith.constant 0 : i32
    %c0_i32_0 = arith.constant 0 : i32
    %c0_i32_1 = arith.constant 0 : i32
    return %c0_i32, %c0_i32_0 : i32, i32
  }
}

</mosaic_0001>

<bundles_post_ra>
// kernel: cnn_forward.2
= control target key start
LH: loop header
LB: loop body
LE: loop exit
PB: predicated region body
PF: predicated region fallthrough
CT: control target
= control target key end

     0   :  { %v1406_v1 = vmov 0   ;;  %vm149_vm0 = vcmask 654336   ;;  %s1799_s0 = inlined_call_operand.vmem [shape: bf16[4,80,512], index: 0, kind: input, shape index: {}]   ;;  %s1800_s1 = inlined_call_operand.vmem [shape: bf16[32,80], index: 1, kind: input, shape index: {}]   ;;  %s1801_s2 = inlined_call_operand.vmem [shape: f32[32,1], index: 2, kind: input, shape index: {}]   ;;  %s1802_s3 = inlined_call_operand.vmem [shape: bf16[32,512], index: 3, kind: output, shape index: {}]  }
   0x1   :  { %v1284_v0 = vld [vmem:[%s1799_s0 + $0x4] ss:$16 sps:$4 sm:$0xff]   ;;  %188 = vmatprep.mubr.bf16.mxu0 %v1406_v1  ;;  %241 = vmatprep.mubr.bf16.mxu1 %v1406_v1  ;;  %v1286_v2 = vld [vmem:[%s1799_s0 + $0xc] ss:$16 sps:$4 sm:$0xff]   ;;  %v1288_v3 = vld [vmem:[%s1799_s0] ss:$16 sps:$4 sm:$0xff]  }
   0x2   :  { %1282 = vset.pattern.permute.xlu0 %v1406_v1  ;;  %1283 = vset.pattern.permute.xlu1 %v1406_v1  ;;  %v1289_v4 = vld [vmem:[%s1799_s0 + $0x8] ss:$16 sps:$4 sm:$0xff]   ;;  %v1290_v5 = vld [vmem:[%s1799_s0 + $0x24] ss:$16 sps:$4 sm:$0xff]   ;;  %v1292_v6 = vld [vmem:[%s1799_s0 + $0x2c] ss:$16 sps:$4 sm:$0xff]  }
   0x3   :  { %156 = vmatprep.subr.bf16.mxu0 %v1284_v0  ;;  %209 = vmatprep.subr.bf16.mxu1 %v1286_v2  ;;  %v1294_v7 = vld [vmem:[%s1799_s0 + $0x20] ss:$16 sps:$4 sm:$0xff]   ;;  %v1295_v8 = vld [vmem:[%s1799_s0 + $0x28] ss:$16 sps:$4 sm:$0xff]   ;;  %v1296_v9 = vld [vmem:[%s1799_s0 + $0x44] ss:$16 sps:$4 sm:$0xff]  }
   0x4   :  { %157 = vmatpush1.bf16.msra.mxu0 %v1288_v3  ;;  %210 = vmatpush1.bf16.msra.mxu1 %v1289_v4  ;;  %v1298_v10 = vld [vmem:[%s1799_s0 + $0x4c] ss:$16 sps:$4 sm:$0xff]   ;;  %v1300_v11 = vld [vmem:[%s1799_s0 + $0x40] ss:$16 sps:$4 sm:$0xff]   ;;  %v1301_v12 = vld [vmem:[%s1799_s0 + $0x48] ss:$16 sps:$4 sm:$0xff]  }
   0x5   :  { %158 = vmatprep.subr.bf16.mxu0 %v1290_v5  ;;  %211 = vmatprep.subr.bf16.mxu1 %v1292_v6  ;;  %v1302_v13 = vld [vmem:[%s1799_s0 + $0x64] ss:$16 sps:$4 sm:$0xff]   ;;  %v1304_v14 = vld [vmem:[%s1799_s0 + $0x6c] ss:$16 sps:$4 sm:$0xff]   ;;  %v1306_v15 = vld [vmem:[%s1799_s0 + $0x60] ss:$16 sps:$4 sm:$0xff]  }
   0x6   :  { %v1307_v16 = vld [vmem:[%s1799_s0 + $0x68] ss:$16 sps:$4 sm:$0xff]   ;;  %v1308_v17 = vld [vmem:[%s1799_s0 + $0x84] ss:$16 sps:$4 sm:$0xff]   ;;  %v1310_v18 = vld [vmem:[%s1799_s0 + $0x8c] ss:$16 sps:$4 sm:$0xff]  }
   0x7   :  { %v1312_v19 = vld [vmem:[%s1799_s0 + $0x80] ss:$16 sps:$4 sm:$0xff]   ;;  %v1313_v20 = vld [vmem:[%s1799_s0 + $0x88] ss:$16 sps:$4 sm:$0xff]   ;;  %v1317_v21 = vld [vmem:[%s1799_s0 + $0xa4] ss:$16 sps:$4 sm:$0xff]  }
   0x8   :  { %159 = vmatpush1.bf16.msra.mxu0 %v1294_v7  ;;  %212 = vmatpush1.bf16.msra.mxu1 %v1295_v8  ;;  %v1320_v22 = vld [vmem:[%s1799_s0 + $0xac] ss:$16 sps:$4 sm:$0xff]   ;;  %v1500_v23 = vld [vmem:[%s1800_s1] sm:$0xff]   ;;  %v1318_v25 = vld [vmem:[%s1799_s0 + $0xa8] ss:$16 sps:$4 sm:$0xff]  }
   0x9   :  { %160 = vmatprep.subr.bf16.mxu0 %v1296_v9  ;;  %213 = vmatprep.subr.bf16.mxu1 %v1298_v10  ;;  %v1315_v24 = vld [vmem:[%s1799_s0 + $0xa0] ss:$16 sps:$4 sm:$0xff]   ;;  %v1323_v26 = vld [vmem:[%s1799_s0 + $0xc4] ss:$16 sps:$4 sm:$0xff]   ;;  %v1326_v27 = vld [vmem:[%s1799_s0 + $0xcc] ss:$16 sps:$4 sm:$0xff]  }
   0xa   :  { %v1321_v28 = vld [vmem:[%s1799_s0 + $0xc0] ss:$16 sps:$4 sm:$0xff]   ;;  %v1324_v29 = vld [vmem:[%s1799_s0 + $0xc8] ss:$16 sps:$4 sm:$0xff]   ;;  %v1329_v30 = vld [vmem:[%s1799_s0 + $0xe4] ss:$16 sps:$4 sm:$0xff]  }
   0xb   :  { %v1332_v31 = vld [vmem:[%s1799_s0 + $0xec] ss:$16 sps:$4 sm:$0xff]   ;;  %v1327_v33 = vld [vmem:[%s1799_s0 + $0xe0] ss:$16 sps:$4 sm:$0xff]   ;;  %v1330_v34 = vld [vmem:[%s1799_s0 + $0xe8] ss:$16 sps:$4 sm:$0xff]  }
   0xc   :  { %161 = vmatpush1.bf16.msra.mxu0 %v1300_v11  ;;  %214 = vmatpush1.bf16.msra.mxu1 %v1301_v12  ;;  %v1535_v32 = vld [vmem:[%s1800_s1 + $0x8] sm:$0xff]   ;;  %v1336_v35 = vld [vmem:[%s1799_s0 + $0x104] ss:$16 sps:$4 sm:$0xff]   ;;  %v1334_v37 = vld [vmem:[%s1799_s0 + $0x100] ss:$16 sps:$4 sm:$0xff]  }
   0xd   :  { %162 = vmatprep.subr.bf16.mxu0 %v1302_v13  ;;  %215 = vmatprep.subr.bf16.mxu1 %v1304_v14  ;;  %v1339_v36 = vld [vmem:[%s1799_s0 + $0x10c] ss:$16 sps:$4 sm:$0xff]   ;;  %v1337_v38 = vld [vmem:[%s1799_s0 + $0x108] ss:$16 sps:$4 sm:$0xff]   ;;  %v1342_v39 = vld [vmem:[%s1799_s0 + $0x124] ss:$16 sps:$4 sm:$0xff]  }
   0xe   :  { %v1345_v40 = vld [vmem:[%s1799_s0 + $0x12c] ss:$16 sps:$4 sm:$0xff]   ;;  %v1340_v41 = vld [vmem:[%s1799_s0 + $0x120] ss:$16 sps:$4 sm:$0xff]   ;;  %v1343_v42 = vld [vmem:[%s1799_s0 + $0x128] ss:$16 sps:$4 sm:$0xff]  }
   0xf   :  { %v1348_v43 = vld [vmem:[%s1799_s0 + $0x144] ss:$16 sps:$4 sm:$0xff]   ;;  %v1351_v44 = vld [vmem:[%s1799_s0 + $0x14c] ss:$16 sps:$4 sm:$0xff]   ;;  %v1346_v45 = vld [vmem:[%s1799_s0 + $0x140] ss:$16 sps:$4 sm:$0xff]  }
  0x10   :  { %163 = vmatpush1.bf16.msra.mxu0 %v1306_v15  ;;  %216 = vmatpush1.bf16.msra.mxu1 %v1307_v16  ;;  %v1349_v46 = vld [vmem:[%s1799_s0 + $0x148] ss:$16 sps:$4 sm:$0xff]   ;;  %v1354_v47 = vld [vmem:[%s1799_s0 + $0x164] ss:$16 sps:$4 sm:$0xff]   ;;  %v1357_v48 = vld [vmem:[%s1799_s0 + $0x16c] ss:$16 sps:$4 sm:$0xff]  }
  0x11   :  { %164 = vmatprep.subr.bf16.mxu0 %v1308_v17  ;;  %217 = vmatprep.subr.bf16.mxu1 %v1310_v18  ;;  %v1352_v49 = vld [vmem:[%s1799_s0 + $0x160] ss:$16 sps:$4 sm:$0xff]   ;;  %v1355_v50 = vld [vmem:[%s1799_s0 + $0x168] ss:$16 sps:$4 sm:$0xff]   ;;  %v1360_v51 = vld [vmem:[%s1799_s0 + $0x184] ss:$16 sps:$4 sm:$0xff]  }
  0x12   :  { %v1363_v52 = vld [vmem:[%s1799_s0 + $0x18c] ss:$16 sps:$4 sm:$0xff]   ;;  %v1358_v53 = vld [vmem:[%s1799_s0 + $0x180] ss:$16 sps:$4 sm:$0xff]   ;;  %v1361_v54 = vld [vmem:[%s1799_s0 + $0x188] ss:$16 sps:$4 sm:$0xff]  }
  0x13   :  { %v1366_v55 = vld [vmem:[%s1799_s0 + $0x1a4] ss:$16 sps:$4 sm:$0xff]   ;;  %v1369_v56 = vld [vmem:[%s1799_s0 + $0x1ac] ss:$16 sps:$4 sm:$0xff]   ;;  %v1364_v57 = vld [vmem:[%s1799_s0 + $0x1a0] ss:$16 sps:$4 sm:$0xff]  }
  0x14   :  { %165 = vmatpush1.bf16.msra.mxu0 %v1312_v19  ;;  %218 = vmatpush1.bf16.msra.mxu1 %v1313_v20  ;;  %v1367_v58 = vld [vmem:[%s1799_s0 + $0x1a8] ss:$16 sps:$4 sm:$0xff]   ;;  %v1372_v59 = vld [vmem:[%s1799_s0 + $0x1c4] ss:$16 sps:$4 sm:$0xff]   ;;  %v1375_v60 = vld [vmem:[%s1799_s0 + $0x1cc] ss:$16 sps:$4 sm:$0xff]  }
  0x15   :  { %383 = vmatprep.subr.bf16.mxu0 %v1317_v21  ;;  %436 = vmatprep.subr.bf16.mxu1 %v1320_v22  ;;  %v991_v61 = vld [vmem:[%s1801_s2] sm:$0xff]  ;;  %v1373_v63 = vld [vmem:[%s1799_s0 + $0x1c8] ss:$16 sps:$4 sm:$0xff]   ;;  %v993_v0 = vld [vmem:[%s1801_s2 + $0x10] sm:$0xff] }
  0x16   :  { %v1370_v62 = vld [vmem:[%s1799_s0 + $0x1c0] ss:$16 sps:$4 sm:$0xff]   ;;  %v1378_v2 = vld [vmem:[%s1799_s0 + $0x1e4] ss:$16 sps:$4 sm:$0xff]   ;;  %v1381_v3 = vld [vmem:[%s1799_s0 + $0x1ec] ss:$16 sps:$4 sm:$0xff]   ;;  %997 = vperm.xlu0 %1282, %v991_v61   ;;  %1007 = vperm.xlu1 %1283, %v993_v0  }
  0x17   :  { %1129 = vmatmul.mubr.msk.bf16.vlgmr.msra.gmra.mrb[0].mxu0 %vm149_vm0, %v1500_v23  ;;  %1131 = vmatmul.mubr.msk.bf16.vlgmr.msra.gmra.mrb[0].mxu1 %vm149_vm0, %v1500_v23  ;;  %v992_v4 = vld [vmem:[%s1801_s2 + $0x8] sm:$0xff]  ;;  %v994_v5 = vld [vmem:[%s1801_s2 + $0x18] sm:$0xff]  ;;  %v1376_v6 = vld [vmem:[%s1799_s0 + $0x1e0] ss:$16 sps:$4 sm:$0xff]  }
  0x18   :  { %384 = vmatpush1.bf16.msra.mxu0 %v1315_v24  ;;  %437 = vmatpush1.bf16.msra.mxu1 %v1318_v25  ;;  %v1379_v7 = vld [vmem:[%s1799_s0 + $0x1e8] ss:$16 sps:$4 sm:$0xff]   ;;  %v1384_v8 = vld [vmem:[%s1799_s0 + $0x204] ss:$16 sps:$4 sm:$0xff]   ;;  %v1387_v9 = vld [vmem:[%s1799_s0 + $0x20c] ss:$16 sps:$4 sm:$0xff]  }
  0x19   :  { %385 = vmatprep.subr.bf16.mxu0 %v1323_v26  ;;  %438 = vmatprep.subr.bf16.mxu1 %v1326_v27  ;;  %v1382_v10 = vld [vmem:[%s1799_s0 + $0x200] ss:$16 sps:$4 sm:$0xff]   ;;  %v1385_v11 = vld [vmem:[%s1799_s0 + $0x208] ss:$16 sps:$4 sm:$0xff]   ;;  %v1390_v12 = vld [vmem:[%s1799_s0 + $0x224] ss:$16 sps:$4 sm:$0xff]  }
  0x1a   :  { %198 = vmatprep.mubr.bf16.mxu0 %v1406_v1  ;;  %251 = vmatprep.mubr.bf16.mxu1 %v1406_v1  ;;  %v1393_v13 = vld [vmem:[%s1799_s0 + $0x22c] ss:$16 sps:$4 sm:$0xff]   ;;  %v1388_v14 = vld [vmem:[%s1799_s0 + $0x220] ss:$16 sps:$4 sm:$0xff]   ;;  %v1391_v15 = vld [vmem:[%s1799_s0 + $0x228] ss:$16 sps:$4 sm:$0xff]  }
  0x1b   :  { %1002 = vperm.xlu0 %1282, %v992_v4   ;;  %1012 = vperm.xlu1 %1283, %v994_v5   ;;  %v1396_v16 = vld [vmem:[%s1799_s0 + $0x244] ss:$16 sps:$4 sm:$0xff]   ;;  %v1399_v17 = vld [vmem:[%s1799_s0 + $0x24c] ss:$16 sps:$4 sm:$0xff]   ;;  %v1394_v18 = vld [vmem:[%s1799_s0 + $0x240] ss:$16 sps:$4 sm:$0xff]  }
  0x1c   :  { %386 = vmatpush1.bf16.msra.mxu0 %v1321_v28  ;;  %439 = vmatpush1.bf16.msra.mxu1 %v1324_v29  ;;  %v1397_v19 = vld [vmem:[%s1799_s0 + $0x248] ss:$16 sps:$4 sm:$0xff]   ;;  %v1402_v20 = vld [vmem:[%s1799_s0 + $0x264] ss:$16 sps:$4 sm:$0xff]   ;;  %v1405_v21 = vld [vmem:[%s1799_s0 + $0x26c] ss:$16 sps:$4 sm:$0xff]  }
  0x1d   :  { %387 = vmatprep.subr.bf16.mxu0 %v1329_v30  ;;  %440 = vmatprep.subr.bf16.mxu1 %v1332_v31  ;;  %v1400_v22 = vld [vmem:[%s1799_s0 + $0x260] ss:$16 sps:$4 sm:$0xff]   ;;  %v1403_v24 = vld [vmem:[%s1799_s0 + $0x268] ss:$16 sps:$4 sm:$0xff]  }
  0x1f   :  { %1130 = vmatmul.mubr.msk.bf16.gmra.mrb[4].mxu0 %vm149_vm0, %v1535_v32  ;;  %1132 = vmatmul.mubr.msk.bf16.gmra.mrb[4].mxu1 %vm149_vm0, %v1535_v32 }
  0x20   :  { %388 = vmatpush1.bf16.msra.mxu0 %v1327_v33  ;;  %441 = vmatpush1.bf16.msra.mxu1 %v1330_v34 }
  0x21   :  { %389 = vmatprep.subr.bf16.mxu0 %v1336_v35  ;;  %442 = vmatprep.subr.bf16.mxu1 %v1339_v36 }
  0x22   :  { %415 = vmatprep.mubr.bf16.mxu0 %v1406_v1  ;;  %468 = vmatprep.mubr.bf16.mxu1 %v1406_v1 }
  0x24   :  { %390 = vmatpush1.bf16.msra.mxu0 %v1334_v37  ;;  %443 = vmatpush1.bf16.msra.mxu1 %v1337_v38 }
  0x25   :  { %391 = vmatprep.subr.bf16.mxu0 %v1342_v39  ;;  %444 = vmatprep.subr.bf16.mxu1 %v1345_v40 }
  0x28   :  { %392 = vmatpush1.bf16.msra.mxu0 %v1340_v41  ;;  %445 = vmatpush1.bf16.msra.mxu1 %v1343_v42 }
  0x29   :  { %626 = vmatprep.subr.bf16.mxu0 %v1348_v43  ;;  %679 = vmatprep.subr.bf16.mxu1 %v1351_v44 }
  0x2b   :  { %1173 = vmatmul.mubr.msk.bf16.vlgmr.msra.gmra.mrb[8].mxu0 %vm149_vm0, %v1500_v23  ;;  %1175 = vmatmul.mubr.msk.bf16.vlgmr.msra.gmra.mrb[8].mxu1 %vm149_vm0, %v1500_v23 }
  0x2c   :  { %627 = vmatpush1.bf16.msra.mxu0 %v1346_v45  ;;  %680 = vmatpush1.bf16.msra.mxu1 %v1349_v46 }
  0x2d   :  { %628 = vmatprep.subr.bf16.mxu0 %v1354_v47  ;;  %681 = vmatprep.subr.bf16.mxu1 %v1357_v48 }
  0x2e   :  { %425 = vmatprep.mubr.bf16.mxu0 %v1406_v1  ;;  %478 = vmatprep.mubr.bf16.mxu1 %v1406_v1 }
  0x30   :  { %629 = vmatpush1.bf16.msra.mxu0 %v1352_v49  ;;  %682 = vmatpush1.bf16.msra.mxu1 %v1355_v50 }
  0x31   :  { %630 = vmatprep.subr.bf16.mxu0 %v1360_v51  ;;  %683 = vmatprep.subr.bf16.mxu1 %v1363_v52 }
  0x33   :  { %1174 = vmatmul.mubr.msk.bf16.gmra.mrb[12].mxu0 %vm149_vm0, %v1535_v32  ;;  %1176 = vmatmul.mubr.msk.bf16.gmra.mrb[12].mxu1 %vm149_vm0, %v1535_v32 }
  0x34   :  { %631 = vmatpush1.bf16.msra.mxu0 %v1358_v53  ;;  %684 = vmatpush1.bf16.msra.mxu1 %v1361_v54 }
  0x35   :  { %632 = vmatprep.subr.bf16.mxu0 %v1366_v55  ;;  %685 = vmatprep.subr.bf16.mxu1 %v1369_v56 }
  0x36   :  { %658 = vmatprep.mubr.bf16.mxu0 %v1406_v1  ;;  %711 = vmatprep.mubr.bf16.mxu1 %v1406_v1 }
  0x38   :  { %633 = vmatpush1.bf16.msra.mxu0 %v1364_v57  ;;  %686 = vmatpush1.bf16.msra.mxu1 %v1367_v58 }
  0x39   :  { %634 = vmatprep.subr.bf16.mxu0 %v1372_v59  ;;  %687 = vmatprep.subr.bf16.mxu1 %v1375_v60 }
  0x3c   :  { %635 = vmatpush1.bf16.msra.mxu0 %v1370_v62  ;;  %688 = vmatpush1.bf16.msra.mxu1 %v1373_v63 }
  0x3d   :  { %869 = vmatprep.subr.bf16.mxu0 %v1378_v2  ;;  %922 = vmatprep.subr.bf16.mxu1 %v1381_v3 }
  0x3f   :  { %1217 = vmatmul.mubr.msk.bf16.vlgmr.msra.gmra.mrb[16].mxu0 %vm149_vm0, %v1500_v23  ;;  %1219 = vmatmul.mubr.msk.bf16.vlgmr.msra.gmra.mrb[16].mxu1 %vm149_vm0, %v1500_v23 }
  0x40   :  { %870 = vmatpush1.bf16.msra.mxu0 %v1376_v6  ;;  %923 = vmatpush1.bf16.msra.mxu1 %v1379_v7 }
  0x41   :  { %871 = vmatprep.subr.bf16.mxu0 %v1384_v8  ;;  %924 = vmatprep.subr.bf16.mxu1 %v1387_v9 }
  0x42   :  { %668 = vmatprep.mubr.bf16.mxu0 %v1406_v1  ;;  %721 = vmatprep.mubr.bf16.mxu1 %v1406_v1 }
  0x44   :  { %872 = vmatpush1.bf16.msra.mxu0 %v1382_v10  ;;  %925 = vmatpush1.bf16.msra.mxu1 %v1385_v11 }
  0x45   :  { %873 = vmatprep.subr.bf16.mxu0 %v1390_v12  ;;  %926 = vmatprep.subr.bf16.mxu1 %v1393_v13 }
  0x47   :  { %1218 = vmatmul.mubr.msk.bf16.gmra.mrb[20].mxu0 %vm149_vm0, %v1535_v32  ;;  %1220 = vmatmul.mubr.msk.bf16.gmra.mrb[20].mxu1 %vm149_vm0, %v1535_v32 }
  0x48   :  { %874 = vmatpush1.bf16.msra.mxu0 %v1388_v14  ;;  %927 = vmatpush1.bf16.msra.mxu1 %v1391_v15 }
  0x49   :  { %875 = vmatprep.subr.bf16.mxu0 %v1396_v16  ;;  %928 = vmatprep.subr.bf16.mxu1 %v1399_v17 }
  0x4a   :  { %901 = vmatprep.mubr.bf16.mxu0 %v1406_v1  ;;  %954 = vmatprep.mubr.bf16.mxu1 %v1406_v1 }
  0x4c   :  { %876 = vmatpush1.bf16.msra.mxu0 %v1394_v18  ;;  %929 = vmatpush1.bf16.msra.mxu1 %v1397_v19 }
  0x4d   :  { %877 = vmatprep.subr.bf16.mxu0 %v1402_v20  ;;  %930 = vmatprep.subr.bf16.mxu1 %v1405_v21 }
  0x50   :  { %878 = vmatpush1.bf16.msra.mxu0 %v1400_v22  ;;  %931 = vmatpush1.bf16.msra.mxu1 %v1403_v24 }
  0x53   :  { %1261 = vmatmul.mubr.msk.bf16.vlgmr.msra.gmra.mrb[24].mxu0 %vm149_vm0, %v1500_v23  ;;  %1263 = vmatmul.mubr.msk.bf16.vlgmr.msra.gmra.mrb[24].mxu1 %vm149_vm0, %v1500_v23 }
  0x54   :  { %911 = vmatprep.mubr.bf16.mxu0 %v1406_v1  ;;  %964 = vmatprep.mubr.bf16.mxu1 %v1406_v1 }
  0x5b   :  { %1262 = vmatmul.mubr.msk.bf16.gmra.mrb[28].mxu0 %vm149_vm0, %v1535_v32  ;;  %1264 = vmatmul.mubr.msk.bf16.gmra.mrb[28].mxu1 %vm149_vm0, %v1535_v32 }
  0xea   :  { %v190_v25 = vpop.f32.mrb[0].mxu0  ;;  %v243_v26 = vpop.f32.mrb[0].mxu1 }
  0xeb   :  { %v192_v27 = vpop.f32.mrb[1].mxu0  ;;  %v245_v28 = vpop.f32.mrb[1].mxu1 }
  0xec   :  { %v194_v29 = vpop.f32.mrb[2].mxu0  ;;  %v247_v30 = vpop.f32.mrb[2].mxu1 }
  0xed   :  { %v196_v31 = vpop.f32.mrb[3].mxu0  ;;  %v249_v33 = vpop.f32.mrb[3].mxu1 }
  0xf2   :  { %v200_v34 = vpop.f32.mrb[4].mxu0  ;;  %v253_v23 = vpop.f32.mrb[4].mxu1 }
  0xf3   :  { %v202_v35 = vpop.f32.mrb[5].mxu0  ;;  %v255_v36 = vpop.f32.mrb[5].mxu1 }
  0xf4   :  { %v1739_v37 = vpop.f32.mrb[6].mxu0  ;;  %v1741_v1 = vpop.f32.mrb[6].mxu1 }
  0xf5   :  { %v1743_v38 = vpop.f32.mrb[7].mxu0  ;;  %v1745_v39 = vpop.f32.mrb[7].mxu1 }
  0xfe   :  { %v417_v32 = vpop.f32.mrb[8].mxu0  ;;  %v470_v40 = vpop.f32.mrb[8].mxu1 }
  0xff   :  { %v489_v41 = vmax.f32 %v190_v25, %v417_v32  ;;  %v491_v42 = vmax.f32 %v243_v26, %v470_v40  ;;  %v419_v43 = vpop.f32.mrb[9].mxu0  ;;  %v472_v44 = vpop.f32.mrb[9].mxu1 }
 0x100   :  { %v490_v45 = vmax.f32 %v192_v27, %v419_v43  ;;  %v492_v46 = vmax.f32 %v245_v28, %v472_v44  ;;  %v421_v47 = vpop.f32.mrb[10].mxu0  ;;  %v474_v48 = vpop.f32.mrb[10].mxu1 }
 0x101   :  { %v493_v49 = vmax.f32 %v194_v29, %v421_v47  ;;  %v495_v50 = vmax.f32 %v247_v30, %v474_v48  ;;  %v423_v51 = vpop.f32.mrb[11].mxu0  ;;  %v476_v52 = vpop.f32.mrb[11].mxu1 }
 0x102   :  { %v494_v53 = vmax.f32 %v196_v31, %v423_v51  ;;  %v496_v54 = vmax.f32 %v249_v33, %v476_v52  ;;  %v998_v32 = vpop.permute.xlu0 %997 }
 0x106   :  { %v427_v55 = vpop.f32.mrb[12].mxu0  ;;  %v480_v56 = vpop.f32.mrb[12].mxu1 }
 0x107   :  { %v497_v57 = vmax.f32 %v200_v34, %v427_v55  ;;  %v499_v58 = vmax.f32 %v253_v23, %v480_v56  ;;  %v429_v59 = vpop.f32.mrb[13].mxu0  ;;  %v482_v60 = vpop.f32.mrb[13].mxu1 }
 0x108   :  { %v498_v61 = vmax.f32 %v202_v35, %v429_v59  ;;  %v500_v62 = vmax.f32 %v255_v36, %v482_v60  ;;  %v431_v63 = vpop.f32.mrb[14].mxu0  ;;  %v484_v0 = vpop.f32.mrb[14].mxu1 }
 0x109   :  { %v501_v2 = vmax.f32 %v1739_v37, %v431_v63  ;;  %v503_v3 = vmax.f32 %v1741_v1, %v484_v0  ;;  %v433_v4 = vpop.f32.mrb[15].mxu0  ;;  %v486_v5 = vpop.f32.mrb[15].mxu1 }
 0x10a   :  { %v502_v6 = vmax.f32 %v1743_v38, %v433_v4  ;;  %v504_v7 = vmax.f32 %v1745_v39, %v486_v5  ;;  %v1003_v40 = vpop.permute.xlu0 %1002 }
 0x112   :  { %v660_v8 = vpop.f32.mrb[16].mxu0  ;;  %v713_v9 = vpop.f32.mrb[16].mxu1 }
 0x113   :  { %v732_v10 = vmax.f32 %v489_v41, %v660_v8  ;;  %v734_v11 = vmax.f32 %v491_v42, %v713_v9  ;;  %v662_v12 = vpop.f32.mrb[17].mxu0  ;;  %v715_v13 = vpop.f32.mrb[17].mxu1 }
 0x114   :  { %v733_v14 = vmax.f32 %v490_v45, %v662_v12  ;;  %v735_v15 = vmax.f32 %v492_v46, %v715_v13  ;;  %v664_v16 = vpop.f32.mrb[18].mxu0  ;;  %v717_v17 = vpop.f32.mrb[18].mxu1 }
 0x115   :  { %v736_v18 = vmax.f32 %v493_v49, %v664_v16  ;;  %v738_v19 = vmax.f32 %v495_v50, %v717_v17  ;;  %v666_v20 = vpop.f32.mrb[19].mxu0  ;;  %v719_v21 = vpop.f32.mrb[19].mxu1 }
 0x116   :  { %v737_v22 = vmax.f32 %v494_v53, %v666_v20  ;;  %v739_v24 = vmax.f32 %v496_v54, %v719_v21 }
 0x11a   :  { %v670_v25 = vpop.f32.mrb[20].mxu0  ;;  %v723_v26 = vpop.f32.mrb[20].mxu1 }
 0x11b   :  { %v1751_v27 = vmax.f32 %v497_v57, %v670_v25  ;;  %v1753_v28 = vmax.f32 %v499_v58, %v723_v26  ;;  %v672_v29 = vpop.f32.mrb[21].mxu0  ;;  %v725_v30 = vpop.f32.mrb[21].mxu1 }
 0x11c   :  { %v1755_v31 = vmax.f32 %v498_v61, %v672_v29  ;;  %v1757_v33 = vmax.f32 %v500_v62, %v725_v30  ;;  %v674_v34 = vpop.f32.mrb[22].mxu0  ;;  %v727_v23 = vpop.f32.mrb[22].mxu1 }
 0x11d   :  { %v1759_v35 = vmax.f32 %v501_v2, %v674_v34  ;;  %v1761_v36 = vmax.f32 %v503_v3, %v727_v23  ;;  %v676_v37 = vpop.f32.mrb[23].mxu0  ;;  %v729_v1 = vpop.f32.mrb[23].mxu1 }
 0x11e   :  { %v1763_v38 = vmax.f32 %v502_v6, %v676_v37  ;;  %v1765_v39 = vmax.f32 %v504_v7, %v729_v1  ;;  %v1008_v6 = vpop.permute.xlu1 %1007 }
 0x126   :  { %v903_v41 = vpop.f32.mrb[24].mxu0  ;;  %v956_v42 = vpop.f32.mrb[24].mxu1 }
 0x127   :  { %v975_v43 = vmax.f32 %v732_v10, %v903_v41  ;;  %v977_v44 = vmax.f32 %v734_v11, %v956_v42  ;;  %v905_v45 = vpop.f32.mrb[25].mxu0  ;;  %v958_v46 = vpop.f32.mrb[25].mxu1 }
 0x128   :  { %v976_v47 = vmax.f32 %v733_v14, %v905_v45  ;;  %v978_v48 = vmax.f32 %v735_v15, %v958_v46  ;;  %v907_v49 = vpop.f32.mrb[26].mxu0  ;;  %v960_v50 = vpop.f32.mrb[26].mxu1 }
 0x129   :  { %v1015_v51 = vadd.f32 %v998_v32, %v975_v43  ;;  %v1017_v52 = vadd.f32 %v998_v32, %v977_v44  ;;  %v979_v53 = vmax.f32 %v736_v18, %v907_v49  ;;  %v981_v54 = vmax.f32 %v738_v19, %v960_v50  ;;  %v909_v55 = vpop.f32.mrb[27].mxu0  ;;  %v962_v56 = vpop.f32.mrb[27].mxu1 }
 0x12a   :  { %v1016_v57 = vadd.f32 %v998_v32, %v976_v47  ;;  %v1018_v58 = vadd.f32 %v998_v32, %v978_v48  ;;  %v980_v59 = vmax.f32 %v737_v22, %v909_v55  ;;  %v982_v60 = vmax.f32 %v739_v24, %v962_v56 }
 0x12b   :  { %v1031_v61 = vmax.f32 %v1015_v51, 0.0  ;;  %v1033_v62 = vmax.f32 %v1017_v52, 0.0  ;;  %v1019_v63 = vadd.f32 %v1003_v40, %v979_v53  ;;  %v1021_v0 = vadd.f32 %v1003_v40, %v981_v54 }
 0x12c   :  { %v1032_v2 = vmax.f32 %v1016_v57, 0.0  ;;  %v1034_v3 = vmax.f32 %v1018_v58, 0.0  ;;  %v1020_v4 = vadd.f32 %v1003_v40, %v980_v59  ;;  %v1022_v5 = vadd.f32 %v1003_v40, %v982_v60 }
 0x12d   :  { %v1035_v7 = vmax.f32 %v1019_v63, 0.0  ;;  %v1037_v8 = vmax.f32 %v1021_v0, 0.0 }
 0x12e   :  { %v1273_v9 = vpack.c.bf16 %v1032_v2, %v1031_v61  ;;  %v1274_v10 = vpack.c.bf16 %v1034_v3, %v1033_v62  ;;  %v1036_v11 = vmax.f32 %v1020_v4, 0.0  ;;  %v1038_v12 = vmax.f32 %v1022_v5, 0.0  ;;  %v913_v13 = vpop.f32.mrb[28].mxu0  ;;  %v966_v14 = vpop.f32.mrb[28].mxu1 }
 0x12f   :  { %v983_v15 = vmax.f32 %v1751_v27, %v913_v13  ;;  %v985_v16 = vmax.f32 %v1753_v28, %v966_v14  ;;  %v915_v17 = vpop.f32.mrb[29].mxu0  ;;  %v968_v18 = vpop.f32.mrb[29].mxu1 }
 0x130   :  { %1095 = vst [vmem:[%s1802_s3] sm:$0xff] %v1273_v9  ;;  %1096 = vst [vmem:[%s1802_s3 + $0x8] sm:$0xff] %v1274_v10  ;;  %v1275_v19 = vpack.c.bf16 %v1036_v11, %v1035_v7  ;;  %v1276_v20 = vpack.c.bf16 %v1038_v12, %v1037_v8  ;;  %v984_v21 = vmax.f32 %v1755_v31, %v915_v17  ;;  %v917_v24 = vpop.f32.mrb[30].mxu0  ;;  %v970_v25 = vpop.f32.mrb[30].mxu1 }
 0x131   :  { %v986_v22 = vmax.f32 %v1757_v33, %v968_v18  ;;  %v1023_v26 = vadd.f32 %v1008_v6, %v983_v15  ;;  %v1025_v27 = vadd.f32 %v1008_v6, %v985_v16  ;;  %v987_v28 = vmax.f32 %v1759_v35, %v917_v24  ;;  %v919_v30 = vpop.f32.mrb[31].mxu0  ;;  %v972_v34 = vpop.f32.mrb[31].mxu1 }
 0x132   :  { %v989_v29 = vmax.f32 %v1761_v36, %v970_v25  ;;  %1097 = vst [vmem:[%s1802_s3 + $0x10] sm:$0xff] %v1275_v19  ;;  %1098 = vst [vmem:[%s1802_s3 + $0x18] sm:$0xff] %v1276_v20  ;;  %v1013_v31 = vpop.permute.xlu1 %1012  ;;  %v1024_v33 = vadd.f32 %v1008_v6, %v984_v21  ;;  %v988_v37 = vmax.f32 %v1763_v38, %v919_v30 }
 0x133   :  { %v1026_v23 = vadd.f32 %v1008_v6, %v986_v22  ;;  %v990_v1 = vmax.f32 %v1765_v39, %v972_v34  ;;  %v1039_v35 = vmax.f32 %v1023_v26, 0.0  ;;  %v1041_v32 = vmax.f32 %v1025_v27, 0.0 }
 0x134   :  { %v1027_v36 = vadd.f32 %v1013_v31, %v987_v28  ;;  %v1029_v40 = vadd.f32 %v1013_v31, %v989_v29  ;;  %v1040_v41 = vmax.f32 %v1024_v33, 0.0  ;;  %v1028_v43 = vadd.f32 %v1013_v31, %v988_v37 }
 0x135   :  { %v1042_v42 = vmax.f32 %v1026_v23, 0.0  ;;  %v1030_v44 = vadd.f32 %v1013_v31, %v990_v1 }
 0x136   :  { %v1043_v45 = vmax.f32 %v1027_v36, 0.0  ;;  %v1045_v46 = vmax.f32 %v1029_v40, 0.0  ;;  %v1277_v47 = vpack.c.bf16 %v1040_v41, %v1039_v35  ;;  %v1044_v49 = vmax.f32 %v1028_v43, 0.0 }
 0x137   :  { %v1278_v48 = vpack.c.bf16 %v1042_v42, %v1041_v32  ;;  %v1046_v50 = vmax.f32 %v1030_v44, 0.0 }
 0x138   :  { %1099 = vst [vmem:[%s1802_s3 + $0x20] sm:$0xff] %v1277_v47  ;;  %v1279_v38 = vpack.c.bf16 %v1044_v49, %v1043_v45 }
 0x139   :  { %1100 = vst [vmem:[%s1802_s3 + $0x28] sm:$0xff] %v1278_v48  ;;  %v1280_v39 = vpack.c.bf16 %v1046_v50, %v1045_v46 }
 0x13a   :  { %1101 = vst [vmem:[%s1802_s3 + $0x30] sm:$0xff] %v1279_v38 }
 0x13b   :  { %1102 = vst [vmem:[%s1802_s3 + $0x38] sm:$0xff] %v1280_v39 }

// kernel: cnn_forward.3
= control target key start
LH: loop header
LB: loop body
LE: loop exit
PB: predicated region body
PF: predicated region fallthrough
CT: control target
= control target key end

     0   :  { %s7152_s0 = inlined_call_operand.vmem [shape: bf16[2,800,144], index: 0, kind: input, shape index: {}]   ;;  %s7153_s1 = inlined_call_operand.vmem [shape: bf16[32,800], index: 1, kind: input, shape index: {}]   ;;  %s7154_s2 = inlined_call_operand.vmem [shape: f32[1,32,1], index: 2, kind: input, shape index: {}]   ;;  %s7155_s3 = inlined_call_operand.vmem [shape: bf16[32,36,32], index: 3, kind: input, shape index: {}]   ;;  %s7156_s4 = inlined_call_operand.vmem [shape: f32[1,32], index: 4, kind: input, shape index: {}]   ;;  %s7157_s5 = inlined_call_operand.vmem [shape: bf16[32,10], index: 5, kind: input, shape index: {}]   ;;  %s7158_s6 = inlined_call_operand.vmem [shape: f32[1,10], index: 6, kind: input, shape index: {}]   ;;  %s7159_s7 = inlined_call_operand.hbm [shape: f32[2,10], index: 7, kind: output, shape index: {}]  }
   0x1   :  { %v5162_v0 = vld [vmem:[%s7152_s0 + $0x4] ss:$8 sps:$4 sm:$0xff]   ;;  %v5166_v2 = vld [vmem:[%s7152_s0] ss:$8 sps:$4 sm:$0xff]   ;;  %v5168_v4 = vld [vmem:[%s7152_s0 + $0x14] ss:$8 sps:$4 sm:$0xff]  }
   0x2   :  { %v5164_v1 = vld [vmem:[%s7152_s0 + $0x324] ss:$8 sps:$4 sm:$0xff]   ;;  %821 = vmatprep.subr.bf16.mxu0 %v5162_v0  ;;  %v5167_v3 = vld [vmem:[%s7152_s0 + $0x320] ss:$8 sps:$4 sm:$0xff]   ;;  %v5170_v5 = vld [vmem:[%s7152_s0 + $0x334] ss:$8 sps:$4 sm:$0xff]  }
   0x3   :  { %1533 = vmatprep.subr.bf16.mxu1 %v5164_v1  ;;  %822 = vmatpush1.bf16.msra.mxu0 %v5166_v2  ;;  %v5172_v6 = vld [vmem:[%s7152_s0 + $0x10] ss:$8 sps:$4 sm:$0xff]   ;;  %v5174_v8 = vld [vmem:[%s7152_s0 + $0x24] ss:$8 sps:$4 sm:$0xff]   ;;  %v5178_v10 = vld [vmem:[%s7152_s0 + $0x20] ss:$8 sps:$4 sm:$0xff]  }
   0x4   :  { %1534 = vmatpush1.bf16.msra.mxu1 %v5167_v3  ;;  %823 = vmatprep.subr.bf16.mxu0 %v5168_v4  ;;  %v5173_v7 = vld [vmem:[%s7152_s0 + $0x330] ss:$8 sps:$4 sm:$0xff]   ;;  %v5176_v9 = vld [vmem:[%s7152_s0 + $0x344] ss:$8 sps:$4 sm:$0xff]   ;;  %v5179_v11 = vld [vmem:[%s7152_s0 + $0x340] ss:$8 sps:$4 sm:$0xff]  }
   0x5   :  { %1535 = vmatprep.subr.bf16.mxu1 %v5170_v5  ;;  %v5180_v12 = vld [vmem:[%s7152_s0 + $0x34] ss:$8 sps:$4 sm:$0xff]   ;;  %v5184_v14 = vld [vmem:[%s7152_s0 + $0x30] ss:$8 sps:$4 sm:$0xff]   ;;  %v5186_v16 = vld [vmem:[%s7152_s0 + $0x44] ss:$8 sps:$4 sm:$0xff]  }
   0x6   :  { %v5182_v13 = vld [vmem:[%s7152_s0 + $0x354] ss:$8 sps:$4 sm:$0xff]   ;;  %v5185_v15 = vld [vmem:[%s7152_s0 + $0x350] ss:$8 sps:$4 sm:$0xff]   ;;  %v5188_v17 = vld [vmem:[%s7152_s0 + $0x364] ss:$8 sps:$4 sm:$0xff]  }
   0x7   :  { %824 = vmatpush1.bf16.msra.mxu0 %v5172_v6  ;;  %v5190_v18 = vld [vmem:[%s7152_s0 + $0x40] ss:$8 sps:$4 sm:$0xff]   ;;  %v5192_v20 = vld [vmem:[%s7152_s0 + $0x54] ss:$8 sps:$4 sm:$0xff]   ;;  %v5196_v22 = vld [vmem:[%s7152_s0 + $0x50] ss:$8 sps:$4 sm:$0xff]  }
   0x8   :  { %1536 = vmatpush1.bf16.msra.mxu1 %v5173_v7  ;;  %825 = vmatprep.subr.bf16.mxu0 %v5174_v8  ;;  %v5191_v19 = vld [vmem:[%s7152_s0 + $0x360] ss:$8 sps:$4 sm:$0xff]   ;;  %v5194_v21 = vld [vmem:[%s7152_s0 + $0x374] ss:$8 sps:$4 sm:$0xff]   ;;  %v5197_v23 = vld [vmem:[%s7152_s0 + $0x370] ss:$8 sps:$4 sm:$0xff]  }
   0x9   :  { %1537 = vmatprep.subr.bf16.mxu1 %v5176_v9  ;;  %v5198_v24 = vld [vmem:[%s7152_s0 + $0x64] ss:$8 sps:$4 sm:$0xff]   ;;  %v5202_v26 = vld [vmem:[%s7152_s0 + $0x60] ss:$8 sps:$4 sm:$0xff]   ;;  %v5204_v28 = vld [vmem:[%s7152_s0 + $0x74] ss:$8 sps:$4 sm:$0xff]  }
   0xa   :  { %v5200_v25 = vld [vmem:[%s7152_s0 + $0x384] ss:$8 sps:$4 sm:$0xff]   ;;  %v5203_v27 = vld [vmem:[%s7152_s0 + $0x380] ss:$8 sps:$4 sm:$0xff]   ;;  %v5206_v29 = vld [vmem:[%s7152_s0 + $0x394] ss:$8 sps:$4 sm:$0xff]  }
   0xb   :  { %826 = vmatpush1.bf16.msra.mxu0 %v5178_v10  ;;  %v5208_v30 = vld [vmem:[%s7152_s0 + $0x70] ss:$8 sps:$4 sm:$0xff]   ;;  %v5210_v32 = vld [vmem:[%s7152_s0 + $0x84] ss:$8 sps:$4 sm:$0xff]   ;;  %v5214_v34 = vld [vmem:[%s7152_s0 + $0x80] ss:$8 sps:$4 sm:$0xff]  }
   0xc   :  { %1538 = vmatpush1.bf16.msra.mxu1 %v5179_v11  ;;  %827 = vmatprep.subr.bf16.mxu0 %v5180_v12  ;;  %v5209_v31 = vld [vmem:[%s7152_s0 + $0x390] ss:$8 sps:$4 sm:$0xff]   ;;  %v5212_v33 = vld [vmem:[%s7152_s0 + $0x3a4] ss:$8 sps:$4 sm:$0xff]   ;;  %v5215_v35 = vld [vmem:[%s7152_s0 + $0x3a0] ss:$8 sps:$4 sm:$0xff]  }
   0xd   :  { %1539 = vmatprep.subr.bf16.mxu1 %v5182_v13  ;;  %v5216_v36 = vld [vmem:[%s7152_s0 + $0x94] ss:$8 sps:$4 sm:$0xff]   ;;  %v5220_v38 = vld [vmem:[%s7152_s0 + $0x90] ss:$8 sps:$4 sm:$0xff]   ;;  %v5222_v40 = vld [vmem:[%s7152_s0 + $0xa4] ss:$8 sps:$4 sm:$0xff]  }
   0xe   :  { %v5218_v37 = vld [vmem:[%s7152_s0 + $0x3b4] ss:$8 sps:$4 sm:$0xff]   ;;  %v5221_v39 = vld [vmem:[%s7152_s0 + $0x3b0] ss:$8 sps:$4 sm:$0xff]   ;;  %v5224_v41 = vld [vmem:[%s7152_s0 + $0x3c4] ss:$8 sps:$4 sm:$0xff]  }
   0xf   :  { %828 = vmatpush1.bf16.msra.mxu0 %v5184_v14  ;;  %v5226_v42 = vld [vmem:[%s7152_s0 + $0xa0] ss:$8 sps:$4 sm:$0xff]   ;;  %v5228_v44 = vld [vmem:[%s7152_s0 + $0xb4] ss:$8 sps:$4 sm:$0xff]   ;;  %v5232_v46 = vld [vmem:[%s7152_s0 + $0xb0] ss:$8 sps:$4 sm:$0xff]  }
  0x10   :  { %1540 = vmatpush1.bf16.msra.mxu1 %v5185_v15  ;;  %829 = vmatprep.subr.bf16.mxu0 %v5186_v16  ;;  %v5227_v43 = vld [vmem:[%s7152_s0 + $0x3c0] ss:$8 sps:$4 sm:$0xff]   ;;  %v5230_v45 = vld [vmem:[%s7152_s0 + $0x3d4] ss:$8 sps:$4 sm:$0xff]   ;;  %v5233_v47 = vld [vmem:[%s7152_s0 + $0x3d0] ss:$8 sps:$4 sm:$0xff]  }
  0x11   :  { %1541 = vmatprep.subr.bf16.mxu1 %v5188_v17  ;;  %v5260_v48 = vld [vmem:[%s7153_s1 + $0x4] ss:$28 sps:$4 sm:$0xff]   ;;  %v5240_v53 = vld [vmem:[%s7152_s0 + $0xd4] ss:$8 sps:$4 sm:$0xff]   ;;  %v5244_v55 = vld [vmem:[%s7152_s0 + $0xd0] ss:$8 sps:$4 sm:$0xff]  }
  0x12   :  { %v5234_v49 = vld [vmem:[%s7152_s0 + $0xc4] ss:$8 sps:$4 sm:$0xff]   ;;  %853 = vmatprep.mubr.bf16.mxu0 %v5260_v48  ;;  %1565 = vmatprep.mubr.bf16.mxu1 %v5260_v48  ;;  %v5238_v51 = vld [vmem:[%s7152_s0 + $0xc0] ss:$8 sps:$4 sm:$0xff]   ;;  %v5242_v54 = vld [vmem:[%s7152_s0 + $0x3f4] ss:$8 sps:$4 sm:$0xff]  }
  0x13   :  { %830 = vmatpush1.bf16.msra.mxu0 %v5190_v18  ;;  %v5236_v50 = vld [vmem:[%s7152_s0 + $0x3e4] ss:$8 sps:$4 sm:$0xff]   ;;  %v5239_v52 = vld [vmem:[%s7152_s0 + $0x3e0] ss:$8 sps:$4 sm:$0xff]   ;;  %v5245_v56 = vld [vmem:[%s7152_s0 + $0x3f0] ss:$8 sps:$4 sm:$0xff]  }
  0x14   :  { %1542 = vmatpush1.bf16.msra.mxu1 %v5191_v19  ;;  %831 = vmatprep.subr.bf16.mxu0 %v5192_v20  ;;  %v5246_v57 = vld [vmem:[%s7152_s0 + $0xe4] ss:$8 sps:$4 sm:$0xff]   ;;  %v5250_v59 = vld [vmem:[%s7152_s0 + $0xe0] ss:$8 sps:$4 sm:$0xff]   ;;  %v5252_v61 = vld [vmem:[%s7152_s0 + $0xf4] ss:$8 sps:$4 sm:$0xff]  }
  0x15   :  { %1543 = vmatprep.subr.bf16.mxu1 %v5194_v21  ;;  %v5248_v58 = vld [vmem:[%s7152_s0 + $0x404] ss:$8 sps:$4 sm:$0xff]   ;;  %v5251_v60 = vld [vmem:[%s7152_s0 + $0x400] ss:$8 sps:$4 sm:$0xff]   ;;  %v5254_v62 = vld [vmem:[%s7152_s0 + $0x414] ss:$8 sps:$4 sm:$0xff]  }
  0x16   :  { %v5256_v63 = vld [vmem:[%s7152_s0 + $0xf0] ss:$8 sps:$4 sm:$0xff]   ;;  %v5263_v1 = vld [vmem:[%s7152_s0 + $0x104] ss:$8 sps:$4 sm:$0xff]   ;;  %v5258_v3 = vld [vmem:[%s7153_s1] ss:$28 sps:$4 sm:$0xff]  }
  0x17   :  { %832 = vmatpush1.bf16.msra.mxu0 %v5196_v22  ;;  %v5257_v0 = vld [vmem:[%s7152_s0 + $0x410] ss:$8 sps:$4 sm:$0xff]   ;;  %v5266_v2 = vld [vmem:[%s7152_s0 + $0x424] ss:$8 sps:$4 sm:$0xff]   ;;  %v5261_v4 = vld [vmem:[%s7152_s0 + $0x100] ss:$8 sps:$4 sm:$0xff]  }
  0x18   :  { %1544 = vmatpush1.bf16.msra.mxu1 %v5197_v23  ;;  %833 = vmatprep.subr.bf16.mxu0 %v5198_v24  ;;  %v5264_v5 = vld [vmem:[%s7152_s0 + $0x420] ss:$8 sps:$4 sm:$0xff]   ;;  %v5269_v6 = vld [vmem:[%s7152_s0 + $0x114] ss:$8 sps:$4 sm:$0xff]   ;;  %v5267_v8 = vld [vmem:[%s7152_s0 + $0x110] ss:$8 sps:$4 sm:$0xff]  }
  0x19   :  { %1545 = vmatprep.subr.bf16.mxu1 %v5200_v25  ;;  %v5272_v7 = vld [vmem:[%s7152_s0 + $0x434] ss:$8 sps:$4 sm:$0xff]   ;;  %v5270_v9 = vld [vmem:[%s7152_s0 + $0x430] ss:$8 sps:$4 sm:$0xff]   ;;  %v5275_v10 = vld [vmem:[%s7152_s0 + $0x124] ss:$8 sps:$4 sm:$0xff]  }
  0x1a   :  { %v5278_v11 = vld [vmem:[%s7152_s0 + $0x444] ss:$8 sps:$4 sm:$0xff]   ;;  %v5273_v12 = vld [vmem:[%s7152_s0 + $0x120] ss:$8 sps:$4 sm:$0xff]   ;;  %v5281_v14 = vld [vmem:[%s7152_s0 + $0x134] ss:$8 sps:$4 sm:$0xff]  }
  0x1b   :  { %834 = vmatpush1.bf16.msra.mxu0 %v5202_v26  ;;  %v5276_v13 = vld [vmem:[%s7152_s0 + $0x440] ss:$8 sps:$4 sm:$0xff]   ;;  %v5284_v15 = vld [vmem:[%s7152_s0 + $0x454] ss:$8 sps:$4 sm:$0xff]   ;;  %v5279_v16 = vld [vmem:[%s7152_s0 + $0x130] ss:$8 sps:$4 sm:$0xff]  }
  0x1c   :  { %1546 = vmatpush1.bf16.msra.mxu1 %v5203_v27  ;;  %835 = vmatprep.subr.bf16.mxu0 %v5204_v28  ;;  %v5282_v17 = vld [vmem:[%s7152_s0 + $0x450] ss:$8 sps:$4 sm:$0xff]   ;;  %v5287_v18 = vld [vmem:[%s7152_s0 + $0x144] ss:$8 sps:$4 sm:$0xff]   ;;  %v5606_v20 = vmov 0  }
  0x1d   :  { %1547 = vmatprep.subr.bf16.mxu1 %v5206_v29  ;;  %v5290_v19 = vld [vmem:[%s7152_s0 + $0x464] ss:$8 sps:$4 sm:$0xff]   ;;  %5160 = vset.pattern.permute.xlu0 %v5606_v20  ;;  %v5285_v21 = vld [vmem:[%s7152_s0 + $0x140] ss:$8 sps:$4 sm:$0xff]   ;;  %v5293_v23 = vld [vmem:[%s7152_s0 + $0x154] ss:$8 sps:$4 sm:$0xff]  }
  0x1e   :  { %5161 = vset.pattern.permute.xlu1 %v5606_v20  ;;  %v5288_v22 = vld [vmem:[%s7152_s0 + $0x460] ss:$8 sps:$4 sm:$0xff]   ;;  %v5296_v24 = vld [vmem:[%s7152_s0 + $0x474] ss:$8 sps:$4 sm:$0xff]   ;;  %v5291_v26 = vld [vmem:[%s7152_s0 + $0x150] ss:$8 sps:$4 sm:$0xff]  }
  0x1f   :  { %836 = vmatpush1.bf16.msra.mxu0 %v5208_v30  ;;  %v5345_v25 = vld [vmem:[%s7153_s1 + $0x3c] ss:$28 sps:$4 sm:$0xff]   ;;  %v5299_v28 = vld [vmem:[%s7152_s0 + $0x164] ss:$8 sps:$4 sm:$0xff]   ;;  %v5321_v48 = vld [vmem:[%s7152_s0 + $0x1a0] ss:$8 sps:$4 sm:$0xff]  }
  0x20   :  { %1548 = vmatpush1.bf16.msra.mxu1 %v5209_v31  ;;  %837 = vmatprep.subr.bf16.mxu0 %v5210_v32  ;;  %v5294_v27 = vld [vmem:[%s7152_s0 + $0x470] ss:$8 sps:$4 sm:$0xff]   ;;  %v5302_v29 = vld [vmem:[%s7152_s0 + $0x484] ss:$8 sps:$4 sm:$0xff]   ;;  %v5297_v31 = vld [vmem:[%s7152_s0 + $0x160] ss:$8 sps:$4 sm:$0xff]  }
  0x21   :  { %1549 = vmatprep.subr.bf16.mxu1 %v5212_v33  ;;  %v5353_v30 = vld [vmem:[%s7153_s1 + $0x38] ss:$28 sps:$4 sm:$0xff]   ;;  %v5300_v32 = vld [vmem:[%s7152_s0 + $0x480] ss:$8 sps:$4 sm:$0xff]  }
  0x22   :  { %v5305_v33 = vld [vmem:[%s7152_s0 + $0x174] ss:$8 sps:$4 sm:$0xff]  }
  0x23   :  { %838 = vmatpush1.bf16.msra.mxu0 %v5214_v34  ;;  %v5308_v34 = vld [vmem:[%s7152_s0 + $0x494] ss:$8 sps:$4 sm:$0xff]  }
  0x24   :  { %1550 = vmatpush1.bf16.msra.mxu1 %v5215_v35  ;;  %839 = vmatprep.subr.bf16.mxu0 %v5216_v36  ;;  %v5362_v35 = vld [vmem:[%s7153_s1 + $0xc] ss:$28 sps:$4 sm:$0xff]   ;;  %v5303_v36 = vld [vmem:[%s7152_s0 + $0x170] ss:$8 sps:$4 sm:$0xff]  }
  0x25   :  { %1551 = vmatprep.subr.bf16.mxu1 %v5218_v37  ;;  %v5306_v37 = vld [vmem:[%s7152_s0 + $0x490] ss:$8 sps:$4 sm:$0xff]  }
  0x27   :  { %840 = vmatpush1.bf16.msra.mxu0 %v5220_v38  ;;  %v5311_v38 = vld [vmem:[%s7152_s0 + $0x184] ss:$8 sps:$4 sm:$0xff]  }
  0x28   :  { %1552 = vmatpush1.bf16.msra.mxu1 %v5221_v39  ;;  %841 = vmatprep.subr.bf16.mxu0 %v5222_v40  ;;  %v5314_v39 = vld [vmem:[%s7152_s0 + $0x4a4] ss:$8 sps:$4 sm:$0xff]   ;;  %v5309_v40 = vld [vmem:[%s7152_s0 + $0x180] ss:$8 sps:$4 sm:$0xff]  }
  0x29   :  { %1553 = vmatprep.subr.bf16.mxu1 %v5224_v41  ;;  %v5312_v41 = vld [vmem:[%s7152_s0 + $0x4a0] ss:$8 sps:$4 sm:$0xff]  }
  0x2b   :  { %842 = vmatpush1.bf16.msra.mxu0 %v5226_v42  ;;  %v5317_v42 = vld [vmem:[%s7152_s0 + $0x194] ss:$8 sps:$4 sm:$0xff]  }
  0x2c   :  { %1554 = vmatpush1.bf16.msra.mxu1 %v5227_v43  ;;  %843 = vmatprep.subr.bf16.mxu0 %v5228_v44  ;;  %v5320_v43 = vld [vmem:[%s7152_s0 + $0x4b4] ss:$8 sps:$4 sm:$0xff]   ;;  %v5315_v44 = vld [vmem:[%s7152_s0 + $0x190] ss:$8 sps:$4 sm:$0xff]  }
  0x2d   :  { %1555 = vmatprep.subr.bf16.mxu1 %v5230_v45  ;;  %v5318_v45 = vld [vmem:[%s7152_s0 + $0x4b0] ss:$8 sps:$4 sm:$0xff]  }
  0x2f   :  { %844 = vmatpush1.bf16.msra.mxu0 %v5232_v46  ;;  %v5323_v46 = vld [vmem:[%s7152_s0 + $0x1a4] ss:$8 sps:$4 sm:$0xff]  }
  0x30   :  { %1556 = vmatpush1.bf16.msra.mxu1 %v5233_v47  ;;  %845 = vmatprep.subr.bf16.mxu0 %v5234_v49  ;;  %v5326_v47 = vld [vmem:[%s7152_s0 + $0x4c4] ss:$8 sps:$4 sm:$0xff]   ;;  %v5324_v49 = vld [vmem:[%s7152_s0 + $0x4c0] ss:$8 sps:$4 sm:$0xff]  }
  0x31   :  { %1557 = vmatprep.subr.bf16.mxu1 %v5236_v50  ;;  %v5329_v50 = vld [vmem:[%s7152_s0 + $0x1b4] ss:$8 sps:$4 sm:$0xff]  }
  0x33   :  { %846 = vmatpush1.bf16.msra.mxu0 %v5238_v51  ;;  %v5332_v51 = vld [vmem:[%s7152_s0 + $0x4d4] ss:$8 sps:$4 sm:$0xff]  }
  0x34   :  { %1558 = vmatpush1.bf16.msra.mxu1 %v5239_v52  ;;  %847 = vmatprep.subr.bf16.mxu0 %v5240_v53  ;;  %v5327_v52 = vld [vmem:[%s7152_s0 + $0x1b0] ss:$8 sps:$4 sm:$0xff]  }
  0x35   :  { %1559 = vmatprep.subr.bf16.mxu1 %v5242_v54  ;;  %v5330_v53 = vld [vmem:[%s7152_s0 + $0x4d0] ss:$8 sps:$4 sm:$0xff]   ;;  %v5335_v54 = vld [vmem:[%s7152_s0 + $0x1c4] ss:$8 sps:$4 sm:$0xff]  }
  0x37   :  { %848 = vmatpush1.bf16.msra.mxu0 %v5244_v55  ;;  %v5338_v55 = vld [vmem:[%s7152_s0 + $0x4e4] ss:$8 sps:$4 sm:$0xff]  }
  0x38   :  { %1560 = vmatpush1.bf16.msra.mxu1 %v5245_v56  ;;  %849 = vmatprep.subr.bf16.mxu0 %v5246_v57  ;;  %v5333_v56 = vld [vmem:[%s7152_s0 + $0x1c0] ss:$8 sps:$4 sm:$0xff]  }
  0x39   :  { %1561 = vmatprep.subr.bf16.mxu1 %v5248_v58  ;;  %v5336_v57 = vld [vmem:[%s7152_s0 + $0x4e0] ss:$8 sps:$4 sm:$0xff]   ;;  %v5341_v58 = vld [vmem:[%s7152_s0 + $0x1d4] ss:$8 sps:$4 sm:$0xff]  }
  0x3b   :  { %850 = vmatpush1.bf16.msra.mxu0 %v5250_v59  ;;  %v5344_v59 = vld [vmem:[%s7152_s0 + $0x4f4] ss:$8 sps:$4 sm:$0xff]  }
  0x3c   :  { %1562 = vmatpush1.bf16.msra.mxu1 %v5251_v60  ;;  %851 = vmatprep.subr.bf16.mxu0 %v5252_v61  ;;  %v5339_v60 = vld [vmem:[%s7152_s0 + $0x1d0] ss:$8 sps:$4 sm:$0xff]  }
  0x3d   :  { %1563 = vmatprep.subr.bf16.mxu1 %v5254_v62  ;;  %v5342_v61 = vld [vmem:[%s7152_s0 + $0x4f0] ss:$8 sps:$4 sm:$0xff]   ;;  %v5349_v62 = vld [vmem:[%s7152_s0 + $0x1e4] ss:$8 sps:$4 sm:$0xff]  }
  0x3f   :  { %852 = vmatpush1.bf16.msra.mxu0 %v5256_v63  ;;  %v5352_v63 = vld [vmem:[%s7152_s0 + $0x504] ss:$8 sps:$4 sm:$0xff]  }
  0x40   :  { %1564 = vmatpush1.bf16.msra.mxu1 %v5257_v0  ;;  %874 = vmatprep.subr.bf16.mxu0 %v5263_v1  ;;  %v5347_v0 = vld [vmem:[%s7152_s0 + $0x1e0] ss:$8 sps:$4 sm:$0xff]  }
  0x41   :  { %1586 = vmatprep.subr.bf16.mxu1 %v5266_v2  ;;  %v5350_v1 = vld [vmem:[%s7152_s0 + $0x500] ss:$8 sps:$4 sm:$0xff]   ;;  %v5356_v2 = vld [vmem:[%s7152_s0 + $0x1f4] ss:$8 sps:$4 sm:$0xff]  }
  0x42   :  { %854 = vmatmul.mubr.bf16.vlgmr.msra.gmra.mrb[0].mxu0 %v5258_v3 }
  0x43   :  { %1566 = vmatmul.mubr.bf16.vlgmr.msra.gmra.mrb[0].mxu1 %v5258_v3  ;;  %875 = vmatpush1.bf16.msra.mxu0 %v5261_v4  ;;  %v5359_v3 = vld [vmem:[%s7152_s0 + $0x514] ss:$8 sps:$4 sm:$0xff]   ;;  %v5354_v4 = vld [vmem:[%s7152_s0 + $0x1f0] ss:$8 sps:$4 sm:$0xff]  }
  0x44   :  { %1587 = vmatpush1.bf16.msra.mxu1 %v5264_v5  ;;  %876 = vmatprep.subr.bf16.mxu0 %v5269_v6  ;;  %v5357_v5 = vld [vmem:[%s7152_s0 + $0x510] ss:$8 sps:$4 sm:$0xff]   ;;  %v5365_v6 = vld [vmem:[%s7152_s0 + $0x204] ss:$8 sps:$4 sm:$0xff]  }
  0x45   :  { %1588 = vmatprep.subr.bf16.mxu1 %v5272_v7  ;;  %863 = vmatprep.mubr.bf16.mxu0 %v5345_v25  ;;  %v5368_v7 = vld [vmem:[%s7152_s0 + $0x524] ss:$8 sps:$4 sm:$0xff]  }
  0x46   :  { %1575 = vmatprep.mubr.bf16.mxu1 %v5345_v25  ;;  %v5381_v25 = vld [vmem:[%s7152_s0 + $0x230] ss:$8 sps:$4 sm:$0xff]  }
  0x47   :  { %877 = vmatpush1.bf16.msra.mxu0 %v5267_v8  ;;  %v5360_v8 = vld [vmem:[%s7153_s1 + $0x8] ss:$28 sps:$4 sm:$0xff]  }
  0x48   :  { %1589 = vmatpush1.bf16.msra.mxu1 %v5270_v9  ;;  %878 = vmatprep.subr.bf16.mxu0 %v5275_v10  ;;  %v5363_v9 = vld [vmem:[%s7152_s0 + $0x200] ss:$8 sps:$4 sm:$0xff]  }
  0x49   :  { %1590 = vmatprep.subr.bf16.mxu1 %v5278_v11  ;;  %v5366_v10 = vld [vmem:[%s7152_s0 + $0x520] ss:$8 sps:$4 sm:$0xff]   ;;  %v5371_v11 = vld [vmem:[%s7152_s0 + $0x214] ss:$8 sps:$4 sm:$0xff]  }
  0x4a   :  { %864 = vmatmul.mubr.bf16.gmra.mrb[4].mxu0 %v5353_v30 }
  0x4b   :  { %879 = vmatpush1.bf16.msra.mxu0 %v5273_v12  ;;  %1576 = vmatmul.mubr.bf16.gmra.mrb[4].mxu1 %v5353_v30  ;;  %v5374_v12 = vld [vmem:[%s7152_s0 + $0x534] ss:$8 sps:$4 sm:$0xff]   ;;  %v5390_v30 = vld [vmem:[%s7152_s0 + $0x560] ss:$8 sps:$4 sm:$0xff]  }
  0x4c   :  { %1591 = vmatpush1.bf16.msra.mxu1 %v5276_v13  ;;  %880 = vmatprep.subr.bf16.mxu0 %v5281_v14  ;;  %v5447_v13 = vld [vmem:[%s7153_s1 + $0x44] ss:$28 sps:$4 sm:$0xff]   ;;  %v5369_v14 = vld [vmem:[%s7152_s0 + $0x210] ss:$8 sps:$4 sm:$0xff]  }
  0x4d   :  { %1592 = vmatprep.subr.bf16.mxu1 %v5284_v15  ;;  %906 = vmatprep.mubr.bf16.mxu0 %v5362_v35  ;;  %v5372_v15 = vld [vmem:[%s7152_s0 + $0x530] ss:$8 sps:$4 sm:$0xff]  }
  0x4e   :  { %1618 = vmatprep.mubr.bf16.mxu1 %v5362_v35  ;;  %v5393_v35 = vld [vmem:[%s7152_s0 + $0x250] ss:$8 sps:$4 sm:$0xff]  }
  0x4f   :  { %881 = vmatpush1.bf16.msra.mxu0 %v5279_v16  ;;  %v5377_v16 = vld [vmem:[%s7152_s0 + $0x224] ss:$8 sps:$4 sm:$0xff]  }
  0x50   :  { %1593 = vmatpush1.bf16.msra.mxu1 %v5282_v17  ;;  %882 = vmatprep.subr.bf16.mxu0 %v5287_v18  ;;  %v5380_v17 = vld [vmem:[%s7152_s0 + $0x544] ss:$8 sps:$4 sm:$0xff]   ;;  %v5375_v18 = vld [vmem:[%s7152_s0 + $0x220] ss:$8 sps:$4 sm:$0xff]  }
  0x51   :  { %1594 = vmatprep.subr.bf16.mxu1 %v5290_v19  ;;  %v5378_v19 = vld [vmem:[%s7152_s0 + $0x540] ss:$8 sps:$4 sm:$0xff]  }
  0x53   :  { %883 = vmatpush1.bf16.msra.mxu0 %v5285_v21  ;;  %v5449_v21 = vld [vmem:[%s7153_s1 + $0x40] ss:$28 sps:$4 sm:$0xff]  }
  0x54   :  { %1595 = vmatpush1.bf16.msra.mxu1 %v5288_v22  ;;  %884 = vmatprep.subr.bf16.mxu0 %v5293_v23  ;;  %v5383_v22 = vld [vmem:[%s7152_s0 + $0x234] ss:$8 sps:$4 sm:$0xff]  }
  0x55   :  { %1596 = vmatprep.subr.bf16.mxu1 %v5296_v24  ;;  %v5386_v23 = vld [vmem:[%s7152_s0 + $0x554] ss:$8 sps:$4 sm:$0xff]  }
  0x56   :  { %v5464_v24 = vld [vmem:[%s7153_s1 + $0x14] ss:$28 sps:$4 sm:$0xff]  }
  0x57   :  { %885 = vmatpush1.bf16.msra.mxu0 %v5291_v26  ;;  %v5384_v26 = vld [vmem:[%s7152_s0 + $0x550] ss:$8 sps:$4 sm:$0xff]  }
  0x58   :  { %1597 = vmatpush1.bf16.msra.mxu1 %v5294_v27  ;;  %886 = vmatprep.subr.bf16.mxu0 %v5299_v28  ;;  %v5389_v27 = vld [vmem:[%s7152_s0 + $0x244] ss:$8 sps:$4 sm:$0xff]  }
  0x59   :  { %1598 = vmatprep.subr.bf16.mxu1 %v5302_v29  ;;  %v5392_v28 = vld [vmem:[%s7152_s0 + $0x564] ss:$8 sps:$4 sm:$0xff]   ;;  %v5387_v29 = vld [vmem:[%s7152_s0 + $0x240] ss:$8 sps:$4 sm:$0xff]  }
  0x5b   :  { %887 = vmatpush1.bf16.msra.mxu0 %v5297_v31  ;;  %v5395_v31 = vld [vmem:[%s7152_s0 + $0x254] ss:$8 sps:$4 sm:$0xff]  }
  0x5c   :  { %1599 = vmatpush1.bf16.msra.mxu1 %v5300_v32  ;;  %888 = vmatprep.subr.bf16.mxu0 %v5305_v33  ;;  %v5398_v32 = vld [vmem:[%s7152_s0 + $0x574] ss:$8 sps:$4 sm:$0xff]   ;;  %v1882_v33 = vld [vmem:[%s7154_s2] sm:$0xff] }
  0x5d   :  { %1600 = vmatprep.subr.bf16.mxu1 %v5308_v34  ;;  %v1883_v34 = vld [vmem:[%s7154_s2 + $0x8] sm:$0xff]  ;;  %1888 = vperm.xlu0 %5160, %v1882_v33  }
  0x5f   :  { %889 = vmatpush1.bf16.msra.mxu0 %v5303_v36  ;;  %v5396_v36 = vld [vmem:[%s7152_s0 + $0x570] ss:$8 sps:$4 sm:$0xff]  }
  0x60   :  { %1601 = vmatpush1.bf16.msra.mxu1 %v5306_v37  ;;  %890 = vmatprep.subr.bf16.mxu0 %v5311_v38  ;;  %v5401_v37 = vld [vmem:[%s7152_s0 + $0x264] ss:$8 sps:$4 sm:$0xff]  }
  0x61   :  { %1602 = vmatprep.subr.bf16.mxu1 %v5314_v39  ;;  %v5404_v38 = vld [vmem:[%s7152_s0 + $0x584] ss:$8 sps:$4 sm:$0xff]   ;;  %v5399_v39 = vld [vmem:[%s7152_s0 + $0x260] ss:$8 sps:$4 sm:$0xff]   ;;  %1893 = vperm.xlu0 %5160, %v1883_v34  }
  0x63   :  { %891 = vmatpush1.bf16.msra.mxu0 %v5309_v40  ;;  %v5402_v40 = vld [vmem:[%s7152_s0 + $0x580] ss:$8 sps:$4 sm:$0xff]  }
  0x64   :  { %1603 = vmatpush1.bf16.msra.mxu1 %v5312_v41  ;;  %892 = vmatprep.subr.bf16.mxu0 %v5317_v42  ;;  %v5407_v41 = vld [vmem:[%s7152_s0 + $0x274] ss:$8 sps:$4 sm:$0xff]  }
  0x65   :  { %1604 = vmatprep.subr.bf16.mxu1 %v5320_v43  ;;  %v5410_v42 = vld [vmem:[%s7152_s0 + $0x594] ss:$8 sps:$4 sm:$0xff]   ;;  %v5405_v43 = vld [vmem:[%s7152_s0 + $0x270] ss:$8 sps:$4 sm:$0xff]  }
  0x67   :  { %893 = vmatpush1.bf16.msra.mxu0 %v5315_v44  ;;  %v5408_v44 = vld [vmem:[%s7152_s0 + $0x590] ss:$8 sps:$4 sm:$0xff]  }
  0x68   :  { %1605 = vmatpush1.bf16.msra.mxu1 %v5318_v45  ;;  %894 = vmatprep.subr.bf16.mxu0 %v5323_v46  ;;  %v5413_v45 = vld [vmem:[%s7152_s0 + $0x284] ss:$8 sps:$4 sm:$0xff]  }
  0x69   :  { %1606 = vmatprep.subr.bf16.mxu1 %v5326_v47  ;;  %v5416_v46 = vld [vmem:[%s7152_s0 + $0x5a4] ss:$8 sps:$4 sm:$0xff]   ;;  %v5411_v47 = vld [vmem:[%s7152_s0 + $0x280] ss:$8 sps:$4 sm:$0xff]  }
  0x6b   :  { %895 = vmatpush1.bf16.msra.mxu0 %v5321_v48  ;;  %v5414_v48 = vld [vmem:[%s7152_s0 + $0x5a0] ss:$8 sps:$4 sm:$0xff]  }
  0x6c   :  { %1607 = vmatpush1.bf16.msra.mxu1 %v5324_v49  ;;  %896 = vmatprep.subr.bf16.mxu0 %v5329_v50  ;;  %v5419_v49 = vld [vmem:[%s7152_s0 + $0x294] ss:$8 sps:$4 sm:$0xff]  }
  0x6d   :  { %1608 = vmatprep.subr.bf16.mxu1 %v5332_v51  ;;  %v5422_v50 = vld [vmem:[%s7152_s0 + $0x5b4] ss:$8 sps:$4 sm:$0xff]   ;;  %v5417_v51 = vld [vmem:[%s7152_s0 + $0x290] ss:$8 sps:$4 sm:$0xff]  }
  0x6f   :  { %897 = vmatpush1.bf16.msra.mxu0 %v5327_v52  ;;  %v5420_v52 = vld [vmem:[%s7152_s0 + $0x5b0] ss:$8 sps:$4 sm:$0xff]  }
  0x70   :  { %1609 = vmatpush1.bf16.msra.mxu1 %v5330_v53  ;;  %898 = vmatprep.subr.bf16.mxu0 %v5335_v54  ;;  %v5425_v53 = vld [vmem:[%s7152_s0 + $0x2a4] ss:$8 sps:$4 sm:$0xff]  }
  0x71   :  { %1610 = vmatprep.subr.bf16.mxu1 %v5338_v55  ;;  %v5428_v54 = vld [vmem:[%s7152_s0 + $0x5c4] ss:$8 sps:$4 sm:$0xff]   ;;  %v5423_v55 = vld [vmem:[%s7152_s0 + $0x2a0] ss:$8 sps:$4 sm:$0xff]  }
  0x73   :  { %899 = vmatpush1.bf16.msra.mxu0 %v5333_v56  ;;  %v5426_v56 = vld [vmem:[%s7152_s0 + $0x5c0] ss:$8 sps:$4 sm:$0xff]  }
  0x74   :  { %1611 = vmatpush1.bf16.msra.mxu1 %v5336_v57  ;;  %900 = vmatprep.subr.bf16.mxu0 %v5341_v58  ;;  %v5431_v57 = vld [vmem:[%s7152_s0 + $0x2b4] ss:$8 sps:$4 sm:$0xff]  }
  0x75   :  { %1612 = vmatprep.subr.bf16.mxu1 %v5344_v59  ;;  %v5434_v58 = vld [vmem:[%s7152_s0 + $0x5d4] ss:$8 sps:$4 sm:$0xff]   ;;  %v5429_v59 = vld [vmem:[%s7152_s0 + $0x2b0] ss:$8 sps:$4 sm:$0xff]  }
  0x77   :  { %901 = vmatpush1.bf16.msra.mxu0 %v5339_v60  ;;  %v5432_v60 = vld [vmem:[%s7152_s0 + $0x5d0] ss:$8 sps:$4 sm:$0xff]  }
  0x78   :  { %1613 = vmatpush1.bf16.msra.mxu1 %v5342_v61  ;;  %902 = vmatprep.subr.bf16.mxu0 %v5349_v62  ;;  %v5437_v61 = vld [vmem:[%s7152_s0 + $0x2c4] ss:$8 sps:$4 sm:$0xff]  }
  0x79   :  { %1614 = vmatprep.subr.bf16.mxu1 %v5352_v63  ;;  %v5440_v62 = vld [vmem:[%s7152_s0 + $0x5e4] ss:$8 sps:$4 sm:$0xff]   ;;  %v5435_v63 = vld [vmem:[%s7152_s0 + $0x2c0] ss:$8 sps:$4 sm:$0xff]  }
  0x7b   :  { %903 = vmatpush1.bf16.msra.mxu0 %v5347_v0  ;;  %v5438_v0 = vld [vmem:[%s7152_s0 + $0x5e0] ss:$8 sps:$4 sm:$0xff]  }
  0x7c   :  { %1615 = vmatpush1.bf16.msra.mxu1 %v5350_v1  ;;  %904 = vmatprep.subr.bf16.mxu0 %v5356_v2  ;;  %v5443_v1 = vld [vmem:[%s7152_s0 + $0x2d4] ss:$8 sps:$4 sm:$0xff]  }
  0x7d   :  { %1616 = vmatprep.subr.bf16.mxu1 %v5359_v3  ;;  %v5446_v2 = vld [vmem:[%s7152_s0 + $0x5f4] ss:$8 sps:$4 sm:$0xff]   ;;  %v5441_v3 = vld [vmem:[%s7152_s0 + $0x2d0] ss:$8 sps:$4 sm:$0xff]  }
  0x7f   :  { %905 = vmatpush1.bf16.msra.mxu0 %v5354_v4  ;;  %v5444_v4 = vld [vmem:[%s7152_s0 + $0x5f0] ss:$8 sps:$4 sm:$0xff]  }
  0x80   :  { %1617 = vmatpush1.bf16.msra.mxu1 %v5357_v5  ;;  %927 = vmatprep.subr.bf16.mxu0 %v5365_v6  ;;  %v5452_v5 = vld [vmem:[%s7152_s0 + $0x2e4] ss:$8 sps:$4 sm:$0xff]  }
  0x81   :  { %1639 = vmatprep.subr.bf16.mxu1 %v5368_v7  ;;  %v5455_v6 = vld [vmem:[%s7152_s0 + $0x604] ss:$8 sps:$4 sm:$0xff]   ;;  %v5450_v7 = vld [vmem:[%s7152_s0 + $0x2e0] ss:$8 sps:$4 sm:$0xff]  }
  0x82   :  { %907 = vmatmul.mubr.bf16.vlgmr.msra.gmra.mrb[0].mxu0 %v5360_v8 }
  0x83   :  { %1619 = vmatmul.mubr.bf16.vlgmr.msra.gmra.mrb[0].mxu1 %v5360_v8  ;;  %928 = vmatpush1.bf16.msra.mxu0 %v5363_v9  ;;  %v5453_v8 = vld [vmem:[%s7152_s0 + $0x600] ss:$8 sps:$4 sm:$0xff]   ;;  %v5458_v9 = vld [vmem:[%s7152_s0 + $0x2f4] ss:$8 sps:$4 sm:$0xff]  }
  0x84   :  { %1640 = vmatpush1.bf16.msra.mxu1 %v5366_v10  ;;  %929 = vmatprep.subr.bf16.mxu0 %v5371_v11  ;;  %v5461_v10 = vld [vmem:[%s7152_s0 + $0x614] ss:$8 sps:$4 sm:$0xff]   ;;  %v5456_v11 = vld [vmem:[%s7152_s0 + $0x2f0] ss:$8 sps:$4 sm:$0xff]  }
  0x85   :  { %1641 = vmatprep.subr.bf16.mxu1 %v5374_v12  ;;  %916 = vmatprep.mubr.bf16.mxu0 %v5447_v13  ;;  %v5459_v12 = vld [vmem:[%s7152_s0 + $0x610] ss:$8 sps:$4 sm:$0xff]  }
  0x86   :  { %1628 = vmatprep.mubr.bf16.mxu1 %v5447_v13  ;;  %v5467_v13 = vld [vmem:[%s7152_s0 + $0x304] ss:$8 sps:$4 sm:$0xff]  }
  0x87   :  { %930 = vmatpush1.bf16.msra.mxu0 %v5369_v14  ;;  %v5472_v14 = vld [vmem:[%s7152_s0 + $0x624] ss:$8 sps:$4 sm:$0xff]  }
  0x88   :  { %1642 = vmatpush1.bf16.msra.mxu1 %v5372_v15  ;;  %931 = vmatprep.subr.bf16.mxu0 %v5377_v16  ;;  %v5462_v15 = vld [vmem:[%s7153_s1 + $0x10] ss:$28 sps:$4 sm:$0xff]   ;;  %v5465_v16 = vld [vmem:[%s7152_s0 + $0x300] ss:$8 sps:$4 sm:$0xff]  }
  0x89   :  { %1643 = vmatprep.subr.bf16.mxu1 %v5380_v17  ;;  %v5468_v17 = vld [vmem:[%s7153_s1 + $0x4c] ss:$28 sps:$4 sm:$0xff]  }
  0x8a   :  { %917 = vmatmul.mubr.bf16.gmra.mrb[4].mxu0 %v5449_v21 }
  0x8b   :  { %1629 = vmatmul.mubr.bf16.gmra.mrb[4].mxu1 %v5449_v21  ;;  %932 = vmatpush1.bf16.msra.mxu0 %v5375_v18  ;;  %v5476_v18 = vld [vmem:[%s7152_s0 + $0x314] ss:$8 sps:$4 sm:$0xff]  }
  0x8c   :  { %1644 = vmatpush1.bf16.msra.mxu1 %v5378_v19  ;;  %933 = vmatprep.subr.bf16.mxu0 %v5383_v22  ;;  %v5470_v19 = vld [vmem:[%s7152_s0 + $0x620] ss:$8 sps:$4 sm:$0xff]   ;;  %v5479_v21 = vld [vmem:[%s7152_s0 + $0x634] ss:$8 sps:$4 sm:$0xff]   ;;  %v5474_v22 = vld [vmem:[%s7152_s0 + $0x310] ss:$8 sps:$4 sm:$0xff]  }
  0x8d   :  { %1645 = vmatprep.subr.bf16.mxu1 %v5386_v23  ;;  %959 = vmatprep.mubr.bf16.mxu0 %v5464_v24  ;;  %v5477_v23 = vld [vmem:[%s7152_s0 + $0x630] ss:$8 sps:$4 sm:$0xff]  }
  0x8e   :  { %1671 = vmatprep.mubr.bf16.mxu1 %v5464_v24 }
  0x8f   :  { %934 = vmatpush1.bf16.msra.mxu0 %v5381_v25 }
  0x90   :  { %1646 = vmatpush1.bf16.msra.mxu1 %v5384_v26  ;;  %935 = vmatprep.subr.bf16.mxu0 %v5389_v27 }
  0x91   :  { %1647 = vmatprep.subr.bf16.mxu1 %v5392_v28 }
  0x93   :  { %936 = vmatpush1.bf16.msra.mxu0 %v5387_v29 }
  0x94   :  { %1648 = vmatpush1.bf16.msra.mxu1 %v5390_v30  ;;  %937 = vmatprep.subr.bf16.mxu0 %v5395_v31 }
  0x95   :  { %1649 = vmatprep.subr.bf16.mxu1 %v5398_v32 }
  0x97   :  { %938 = vmatpush1.bf16.msra.mxu0 %v5393_v35 }
  0x98   :  { %1650 = vmatpush1.bf16.msra.mxu1 %v5396_v36  ;;  %939 = vmatprep.subr.bf16.mxu0 %v5401_v37 }
  0x99   :  { %1651 = vmatprep.subr.bf16.mxu1 %v5404_v38 }
  0x9b   :  { %940 = vmatpush1.bf16.msra.mxu0 %v5399_v39 }
  0x9c   :  { %1652 = vmatpush1.bf16.msra.mxu1 %v5402_v40  ;;  %941 = vmatprep.subr.bf16.mxu0 %v5407_v41 }
  0x9d   :  { %1653 = vmatprep.subr.bf16.mxu1 %v5410_v42 }
  0x9f   :  { %942 = vmatpush1.bf16.msra.mxu0 %v5405_v43 }
  0xa0   :  { %1654 = vmatpush1.bf16.msra.mxu1 %v5408_v44  ;;  %943 = vmatprep.subr.bf16.mxu0 %v5413_v45 }
  0xa1   :  { %1655 = vmatprep.subr.bf16.mxu1 %v5416_v46 }
  0xa3   :  { %944 = vmatpush1.bf16.msra.mxu0 %v5411_v47 }
  0xa4   :  { %1656 = vmatpush1.bf16.msra.mxu1 %v5414_v48  ;;  %945 = vmatprep.subr.bf16.mxu0 %v5419_v49 }
  0xa5   :  { %1657 = vmatprep.subr.bf16.mxu1 %v5422_v50 }
  0xa7   :  { %946 = vmatpush1.bf16.msra.mxu0 %v5417_v51 }
  0xa8   :  { %1658 = vmatpush1.bf16.msra.mxu1 %v5420_v52  ;;  %947 = vmatprep.subr.bf16.mxu0 %v5425_v53 }
  0xa9   :  { %1659 = vmatprep.subr.bf16.mxu1 %v5428_v54 }
  0xab   :  { %948 = vmatpush1.bf16.msra.mxu0 %v5423_v55 }
  0xac   :  { %1660 = vmatpush1.bf16.msra.mxu1 %v5426_v56  ;;  %949 = vmatprep.subr.bf16.mxu0 %v5431_v57 }
  0xad   :  { %1661 = vmatprep.subr.bf16.mxu1 %v5434_v58 }
  0xaf   :  { %950 = vmatpush1.bf16.msra.mxu0 %v5429_v59 }
  0xb0   :  { %1662 = vmatpush1.bf16.msra.mxu1 %v5432_v60  ;;  %951 = vmatprep.subr.bf16.mxu0 %v5437_v61 }
  0xb1   :  { %1663 = vmatprep.subr.bf16.mxu1 %v5440_v62 }
  0xb3   :  { %952 = vmatpush1.bf16.msra.mxu0 %v5435_v63 }
  0xb4   :  { %1664 = vmatpush1.bf16.msra.mxu1 %v5438_v0  ;;  %953 = vmatprep.subr.bf16.mxu0 %v5443_v1 }
  0xb5   :  { %1665 = vmatprep.subr.bf16.mxu1 %v5446_v2 }
  0xb7   :  { %954 = vmatpush1.bf16.msra.mxu0 %v5441_v3 }
  0xb8   :  { %1666 = vmatpush1.bf16.msra.mxu1 %v5444_v4  ;;  %955 = vmatprep.subr.bf16.mxu0 %v5452_v5 }
  0xb9   :  { %1667 = vmatprep.subr.bf16.mxu1 %v5455_v6 }
  0xbb   :  { %956 = vmatpush1.bf16.msra.mxu0 %v5450_v7 }
  0xbc   :  { %1668 = vmatpush1.bf16.msra.mxu1 %v5453_v8  ;;  %957 = vmatprep.subr.bf16.mxu0 %v5458_v9 }
  0xbd   :  { %1669 = vmatprep.subr.bf16.mxu1 %v5461_v10 }
  0xbf   :  { %958 = vmatpush1.bf16.msra.mxu0 %v5456_v11 }
  0xc0   :  { %1670 = vmatpush1.bf16.msra.mxu1 %v5459_v12  ;;  %980 = vmatprep.subr.bf16.mxu0 %v5467_v13 }
  0xc1   :  { %1692 = vmatprep.subr.bf16.mxu1 %v5472_v14 }
  0xc2   :  { %960 = vmatmul.mubr.bf16.vlgmr.msra.gmra.mrb[0].mxu0 %v5462_v15 }
  0xc3   :  { %1672 = vmatmul.mubr.bf16.vlgmr.msra.gmra.mrb[0].mxu1 %v5462_v15  ;;  %981 = vmatpush1.bf16.msra.mxu0 %v5465_v16 }
  0xc4   :  { %969 = vmatprep.mubr.bf16.mxu0 %v5468_v17  ;;  %1681 = vmatprep.mubr.bf16.mxu1 %v5468_v17 }
  0xc5   :  { %982 = vmatprep.subr.bf16.mxu0 %v5476_v18  ;;  %1693 = vmatpush1.bf16.msra.mxu1 %v5470_v19 }
  0xc6   :  { %12 = vsyncpa [#allocation3], 0  ;;  %v5473_v24 = vld [vmem:[%s7153_s1 + $0x48] ss:$28 sps:$4 sm:$0xff]   ;;  %1694 = vmatprep.subr.bf16.mxu1 %v5479_v21  ;;  %v5480_v25 = vld [vmem:[%s7153_s1 + $0x18] ss:$28 sps:$4 sm:$0xff]  }
  0xc7   :  { %983 = vmatpush1.bf16.msra.mxu0 %v5474_v22  ;;  %vm814_vm0 = vcmask 261120   ;;  %v5481_v26 = vld [vmem:[%s7153_s1 + $0x50] ss:$28 sps:$4 sm:$0xff]   ;;  %s5607_s18 = smov 92   ;;  %s5608_s1 = smov 56   ;;  %v5482_v42 = vld [vmem:[%s7155_s3 + $0x14] sm:$0xff]  }
  0xc8   :  { %s5609_s19 = smov 20   ;;  %v5610_v43 = vmov 0.0   ;;  %v5483_v44 = vld [vmem:[%s7155_s3] sm:$0xff]   ;;  %v1884_v46 = vld [vmem:[%s7154_s2 + $0x10] sm:$0xff]  ;;  %v5485_v47 = vld [vmem:[%s7155_s3 + $0x8] sm:$0xff]   ;;  %vm2113_vm1 = vcmask 1041408  }
  0xc9   :  { %1695 = vmatpush1.bf16.msra.mxu1 %v5477_v23  ;;  %4777 = vmatprep.subr.bf16.mxu0 %v5610_v43  ;;  %v5484_v45 = vld [vmem:[%s7155_s3 + $0x1c] sm:$0xff]   ;;  %v5486_v48 = vld [vmem:[%s7155_s3 + $0x24] ss:$0 sps:$4 sm:$0x33]   ;;  %vm5611_vm2 = vmmov 0   ;;  %vm1857_vm3 = vcmask 162816  }
  0xca   :  { %970 = vmatmul.mubr.bf16.gmra.mrb[4].mxu0 %v5473_v24  ;;  %4787 = vmatprep.subr.bf16.mxu1 %v5610_v43  ;;  %v2115_v49 = vsel %vm2113_vm1, %v5486_v48, 0  ;;  %v5487_v50 = vld [vmem:[%s7155_s3 + $0x10] ss:$0 sps:$4 sm:$0x33]   ;;  %v1885_v52 = vld [vmem:[%s7154_s2 + $0x18] sm:$0xff]  ;;  %vm2091_vm4 = vcmask 1041409  }
  0xcb   :  { %1682 = vmatmul.mubr.bf16.gmra.mrb[4].mxu1 %v5473_v24  ;;  %1012 = vmatprep.mubr.bf16.mxu0 %v5606_v20  ;;  %v2179_v51 = vsel %vm2113_vm1, %v5487_v50, 0  ;;  %vm2109_vm5 = vcmask 293888   ;;  %s5612_s16 = smov [#allocation2]   ;;  %vm4279_vm6 = vcmask 74752  }
  0xcc   :  { %1724 = vmatprep.mubr.bf16.mxu1 %v5606_v20  ;;  %s4287_s0 = sshll.u32 %s5612_s16, 4  ;;  %s4288_s0 = int_to_ptr.vmem [resolvable:$true] %s4287_s0 }
  0xcd   :  { %p5587_p1 = scmp.lt.s32.totalorder %s4288_s0, %s4288_s0 }
  0xd2   :  { %4409 = vmatmul.mubr.msk.bf16.vlgmr.msra.gmra.mrb[0].mxu0 %vm814_vm0, %v5480_v25 }
  0xd3   :  { %4511 = vmatmul.mubr.msk.bf16.vlgmr.msra.gmra.mrb[0].mxu1 %vm814_vm0, %v5480_v25  ;;  %1022 = vmatprep.mubr.bf16.mxu0 %v5606_v20 }
  0xd4   :  { %1734 = vmatprep.mubr.bf16.mxu1 %v5606_v20  ;;  %4778 = vmatpush3.bf16.msra.mxu0 %v5482_v42 }
  0xd5   :  { %4788 = vmatpush3.bf16.msra.mxu1 %v5483_v44  ;;  %4779 = vmatprep.subr.bf16.mxu0 %v5610_v43 }
  0xd6   :  { %4789 = vmatprep.subr.bf16.mxu1 %v5610_v43 }
  0xd8   :  { %4780 = vmatpush3.bf16.msra.mxu0 %v5484_v45 }
  0xd9   :  { %4790 = vmatpush3.bf16.msra.mxu1 %v5485_v47  ;;  %4781 = vmatprep.subr.bf16.mxu0 %v5610_v43 }
  0xda   :  { %4410 = vmatmul.mubr.msk.bf16.gmra.mrb[4].mxu0 %vm814_vm0, %v5481_v26  ;;  %4791 = vmatprep.subr.bf16.mxu1 %v5610_v43 }
  0xdb   :  { %4512 = vmatmul.mubr.msk.bf16.gmra.mrb[4].mxu1 %vm814_vm0, %v5481_v26  ;;  %4783 = vmatprep.mubr.msk.bf16.mxu0 %vm5611_vm2, %v5610_v43 }
  0xdc   :  { %4782 = vmatpush3.bf16.msra.mxu0 %v2115_v49  ;;  %4793 = vmatprep.mubr.msk.bf16.mxu1 %vm5611_vm2, %v5610_v43  ;;  %v1889_v53 = vpop.permute.xlu0 %1888  ;;  %v5488_v49 = vld [vmem:[%s7155_s3 + $0x28] sm:$0xff]  }
  0xdd   :  { %4792 = vmatpush3.bf16.msra.mxu1 %v2179_v51  ;;  %4797 = vmatprep.subr.bf16.mxu0 %v5610_v43 }
  0xde   :  { %4807 = vmatprep.subr.bf16.mxu1 %v5610_v43 }
  0xe0   :  { %v1894_v54 = vpop.permute.xlu0 %1893 }
 0x1a5   :  { %v6311_v27 = vpop.f32.mrb[0].mxu0 }
 0x1a6   :  { %v6313_v28 = vpop.f32.mrb[0].mxu1  ;;  %1753 = vrot.lane.b32.xlu1 %v6311_v27, %s5607_s18  ;;  %v1016_v20 = vpop.f32.mrb[1].mxu0 }
 0x1a7   :  { %1761 = vrot.lane.b32.xlu0 %v6313_v28, %s5607_s18  ;;  %v1728_v29 = vpop.f32.mrb[1].mxu1  ;;  %v6319_v30 = vpop.f32.mrb[2].mxu0 }
 0x1a8   :  { %v6321_v31 = vpop.f32.mrb[2].mxu1  ;;  %v1020_v32 = vpop.f32.mrb[3].mxu0 }
 0x1a9   :  { %v1732_v33 = vpop.f32.mrb[3].mxu1 }
 0x1aa   :  { %1827 = vrot.lane.b32.xlu1 %v1016_v20, %s5609_s19 }
 0x1ab   :  { %1785 = vrot.lane.b32.xlu0 %v6311_v27, %s5608_s1 }
 0x1ad   :  { %v6326_v34 = vpop.f32.mrb[4].mxu0 }
 0x1ae   :  { %v6328_v35 = vpop.f32.mrb[4].mxu1  ;;  %1843 = vrot.lane.b32.xlu1 %v1728_v29, %s5609_s19  ;;  %v1026_v37 = vpop.f32.mrb[5].mxu0 }
 0x1af   :  { %v1738_v36 = vpop.f32.mrb[5].mxu1  ;;  %1825 = vrot.lane.b32.xlu0 %v6311_v27, %s5609_s19  ;;  %v6333_v38 = vpop.f32.mrb[6].mxu0 }
 0x1b0   :  { %v6335_v39 = vpop.f32.mrb[6].mxu1  ;;  %v1030_v40 = vpop.f32.mrb[7].mxu0 }
 0x1b1   :  { %v1742_v41 = vpop.f32.mrb[7].mxu1 }
 0x1b2   :  { %1755 = vrot.lane.b32.xlu1 %v6319_v30, %s5607_s18 }
 0x1b3   :  { %1793 = vrot.lane.b32.xlu0 %v6313_v28, %s5608_s1 }
 0x1b6   :  { %1763 = vrot.lane.b32.xlu1 %v6321_v31, %s5607_s18 }
 0x1b7   :  { %1841 = vrot.lane.b32.xlu0 %v6313_v28, %s5609_s19 }
 0x1ba   :  { %1787 = vrot.lane.b32.xlu1 %v6319_v30, %s5608_s1 }
 0x1bb   :  { %1829 = vrot.lane.b32.xlu0 %v6319_v30, %s5609_s19 }
 0x1be   :  { %1795 = vrot.lane.b32.xlu1 %v6321_v31, %s5608_s1 }
 0x1bf   :  { %1845 = vrot.lane.b32.xlu0 %v6321_v31, %s5609_s19 }
 0x1c2   :  { %1831 = vrot.lane.b32.xlu1 %v1020_v32, %s5609_s19 }
 0x1c3   :  { %1898 = vperm.xlu0 %5160, %v1884_v46  }
 0x1c6   :  { %1847 = vrot.lane.b32.xlu1 %v1732_v33, %s5609_s19 }
 0x1c7   :  { %1765 = vrot.lane.b32.xlu0 %v6328_v35, %s5607_s18 }
 0x1ca   :  { %1903 = vperm.xlu1 %5161, %v1885_v52  }
 0x1cb   :  { %1757 = vrot.lane.b32.xlu0 %v6326_v34, %s5607_s18 }
 0x1ce   :  { %1851 = vrot.lane.b32.xlu1 %v1738_v36, %s5609_s19 }
 0x1cf   :  { %1797 = vrot.lane.b32.xlu0 %v6328_v35, %s5608_s1 }
 0x1d2   :  { %1835 = vrot.lane.b32.xlu1 %v1026_v37, %s5609_s19 }
 0x1d3   :  { %1849 = vrot.lane.b32.xlu0 %v6328_v35, %s5609_s19 }
 0x1d6   :  { %1767 = vrot.lane.b32.xlu1 %v6335_v39, %s5607_s18 }
 0x1d7   :  { %1789 = vrot.lane.b32.xlu0 %v6326_v34, %s5608_s1 }
 0x1da   :  { %1759 = vrot.lane.b32.xlu1 %v6333_v38, %s5607_s18 }
 0x1db   :  { %1833 = vrot.lane.b32.xlu0 %v6326_v34, %s5609_s19 }
 0x1de   :  { %1799 = vrot.lane.b32.xlu1 %v6335_v39, %s5608_s1 }
 0x1df   :  { %1853 = vrot.lane.b32.xlu0 %v6335_v39, %s5609_s19 }
 0x1e2   :  { %1791 = vrot.lane.b32.xlu1 %v6333_v38, %s5608_s1 }
 0x1e3   :  { %1837 = vrot.lane.b32.xlu0 %v6333_v38, %s5609_s19 }
 0x1e6   :  { %1855 = vrot.lane.b32.xlu1 %v1742_v41, %s5609_s19 }
 0x1ea   :  { %1839 = vrot.lane.b32.xlu1 %v1030_v40, %s5609_s19 }
 0x218   :  { %v1754_v56 = vpop.permute.xlu1 %1753 }
 0x219   :  { %v1762_v55 = vpop.permute.xlu0 %1761  ;;  %v1777_v2 = vmax.f32 %v6311_v27, %v1754_v56 }
 0x21a   :  { %v1781_v6 = vmax.f32 %v6313_v28, %v1762_v55 }
 0x21c   :  { %v1828_v58 = vpop.permute.xlu1 %1827 }
 0x21d   :  { %v1786_v57 = vpop.permute.xlu0 %1785 }
 0x21e   :  { %v1809_v4 = vmax.f32 %v1777_v2, %v1786_v57  ;;  %v5490_v2 = vld [vmem:[%s7155_s3 + $0x30] sm:$0xff]  }
 0x220   :  { %v1844_v60 = vpop.permute.xlu1 %1843 }
 0x221   :  { %v1826_v59 = vpop.permute.xlu0 %1825 }
 0x222   :  { %v1858_v3 = vsel %vm1857_vm3, %v1826_v59, %v1828_v58  ;;  %v5489_v59 = vld [vmem:[%s7155_s3 + $0x3c] sm:$0xff]  }
 0x223   :  { %v1874_v7 = vmax.f32 %v1809_v4, %v1858_v3 }
 0x224   :  { %v1756_v61 = vpop.permute.xlu1 %1755 }
 0x225   :  { %v1794_v62 = vpop.permute.xlu0 %1793  ;;  %v1778_v8 = vmax.f32 %v6319_v30, %v1756_v61  ;;  %v1906_v15 = vadd.f32 %v1889_v53, %v1874_v7 }
 0x226   :  { %v1813_v11 = vmax.f32 %v1781_v6, %v1794_v62 }
 0x227   :  { %v1914_v25 = vmax.f32 %v1906_v15, 0.0 }
 0x228   :  { %v1764_v63 = vpop.permute.xlu1 %1763 }
 0x229   :  { %v1842_v0 = vpop.permute.xlu0 %1841  ;;  %v1782_v17 = vmax.f32 %v6321_v31, %v1764_v63 }
 0x22a   :  { %v1862_v10 = vsel %vm1857_vm3, %v1842_v0, %v1844_v60 }
 0x22b   :  { %v1878_v16 = vmax.f32 %v1813_v11, %v1862_v10 }
 0x22c   :  { %v1788_v1 = vpop.permute.xlu1 %1787 }
 0x22d   :  { %v1830_v9 = vpop.permute.xlu0 %1829  ;;  %v1810_v12 = vmax.f32 %v1778_v8, %v1788_v1  ;;  %v1910_v26 = vadd.f32 %v1889_v53, %v1878_v16 }
 0x22f   :  { %v1918_v30 = vmax.f32 %v1910_v26, 0.0 }
 0x230   :  { %v1796_v5 = vpop.permute.xlu1 %1795 }
 0x231   :  { %v1846_v19 = vpop.permute.xlu0 %1845  ;;  %v1814_v21 = vmax.f32 %v1782_v17, %v1796_v5  ;;  %v5493_v17 = vld [vmem:[%s7155_s3 + $0x4c] ss:$0 sps:$4 sm:$0x33]  }
 0x234   :  { %v1832_v13 = vpop.permute.xlu1 %1831 }
 0x235   :  { %v1859_v14 = vsel %vm1857_vm3, %v1830_v9, %v1832_v13  ;;  %v5492_v9 = vld [vmem:[%s7155_s3 + $0x38] ss:$0 sps:$4 sm:$0x33]  }
 0x236   :  { %v1875_v18 = vmax.f32 %v1810_v12, %v1859_v14  ;;  %v5491_v12 = vld [vmem:[%s7155_s3 + $0x44] sm:$0xff]  }
 0x238   :  { %v1907_v22 = vadd.f32 %v1894_v54, %v1875_v18  ;;  %v1848_v23 = vpop.permute.xlu1 %1847 }
 0x239   :  { %v1863_v24 = vsel %vm1857_vm3, %v1846_v19, %v1848_v23 }
 0x23a   :  { %v1915_v27 = vmax.f32 %v1907_v22, 0.0  ;;  %v1879_v28 = vmax.f32 %v1814_v21, %v1863_v24 }
 0x23c   :  { %v1922_v29 = vpack.c.bf16 %v1915_v27, %v1914_v25  ;;  %v1911_v20 = vadd.f32 %v1894_v54, %v1879_v28 }
 0x23e   :  { %v2088_v32 = vunpack.c.l.b16 %v1922_v29  ;;  %v1919_v33 = vmax.f32 %v1911_v20, 0.0  ;;  %v6431_v31 = vunpack.c.h.b16 %v1922_v29  ;;  %v2244_v29 = vsel %vm2113_vm1, %v5492_v9, 0 }
 0x240   :  { %v1924_v36 = vpack.c.bf16 %v1919_v33, %v1918_v30  ;;  %v2090_v41 = vrot.slane %v2088_v32, 1  ;;  %v2221_v42 = vrot.slane %v2088_v32, 2  ;;  %v2287_v45 = vrot.slane %v2088_v32, 3 }
 0x241   :  { %v2353_v46 = vrot.slane %v2088_v32, 4  ;;  %v2419_v47 = vrot.slane %v2088_v32, 5  ;;  %v2485_v62 = vrot.slane %v2088_v32, 6  ;;  %v2684_v1 = vrot.slane %v6431_v31, 1 }
 0x242   :  { %v6429_v37 = vpop.permute.xlu0 %1898  ;;  %v2089_v40 = vunpack.c.l.b16 %v1924_v36  ;;  %v6433_v44 = vunpack.c.h.b16 %v1924_v36  ;;  %v2551_v5 = vrot.slane %v2088_v32, 7  ;;  %v2749_v14 = vrot.slane %v6431_v31, 2 }
 0x243   :  { %v2815_v16 = vrot.slane %v6431_v31, 3  ;;  %v2881_v21 = vrot.slane %v6431_v31, 4  ;;  %v2947_v24 = vrot.slane %v6431_v31, 5  ;;  %v2310_v36 = vsel %vm2113_vm1, %v5493_v17, 0 }
 0x244   :  { %v2092_v48 = vsel %vm2091_vm4, %v2089_v40, %v2090_v41  ;;  %v2157_v50 = vrot.slane %v2089_v40, 7  ;;  %v2222_v51 = vrot.slane %v2089_v40, 1  ;;  %v2288_v52 = vrot.slane %v2089_v40, 2 }
 0x245   :  { %v2093_v54 = vpack.c.b16 %v2092_v48, %v2092_v48  ;;  %v2354_v55 = vrot.slane %v2089_v40, 3  ;;  %v2420_v56 = vrot.slane %v2089_v40, 4  ;;  %v2486_v57 = vrot.slane %v2089_v40, 5 }
 0x246   :  { %v6439_v53 = vpop.permute.xlu0 %1765  ;;  %v2158_v58 = vsel %vm2091_vm4, %v2157_v50, %v2088_v32  ;;  %v6446_v60 = vsel %vm2091_vm4, %v2222_v51, %v2221_v42  ;;  %v6449_v61 = vsel %vm2091_vm4, %v2288_v52, %v2287_v45  ;;  %v2552_v6 = vrot.slane %v2089_v40, 6  ;;  %v5494_v45 = vld [vmem:[%s7155_s3 + $0x50] sm:$0xff]   ;;  %v5496_v50 = vld [vmem:[%s7155_s3 + $0x58] sm:$0xff]   ;;  %v5498_v52 = vld [vmem:[%s7155_s3 + $0x60] ss:$0 sps:$4 sm:$0x33]  }
 0x247   :  { %4784 = vmatmul.mubr.msk.bf16.vlgmr.msra.gmra.mrb[8].mxu0 %vm2109_vm5, %v2093_v54  ;;  %v2159_v63 = vpack.c.b16 %v2158_v58, %v2158_v58  ;;  %v6453_v0 = vsel %vm2091_vm4, %v2354_v55, %v2353_v46  ;;  %v6462_v3 = vsel %vm2091_vm4, %v2420_v56, %v2419_v47  ;;  %v6465_v4 = vsel %vm2091_vm4, %v2486_v57, %v2485_v62  ;;  %v5497_v54 = vld [vmem:[%s7155_s3 + $0x6c] sm:$0xff]   ;;  %v5499_v56 = vld [vmem:[%s7155_s3 + $0x74] ss:$0 sps:$4 sm:$0x33]  }
 0x248   :  { %4798 = vmatpush3.bf16.msra.mxu0 %v5488_v49  ;;  %4803 = vmatprep.mubr.msk.bf16.mxu0 %vm5611_vm2, %v5610_v43  ;;  %v2619_v10 = vrot.slane %v6433_v44, 7  ;;  %v6479_v11 = vsel %vm2091_vm4, %v6433_v44, %v2684_v1  ;;  %v6487_v13 = vsel %vm2091_vm4, %v2552_v6, %v2551_v5  ;;  %v2750_v15 = vrot.slane %v6433_v44, 1  ;;  %v5501_v1 = vld [vmem:[%s7155_s3 + $0x8c] sm:$0xff]  }
 0x249   :  { %4794 = vmatmul.mubr.msk.bf16.vlgmr.msra.gmra.mrb[8].mxu1 %vm2109_vm5, %v2159_v63  ;;  %v6468_v7 = vpop.permute.xlu1 %1903  ;;  %4799 = vmatprep.subr.bf16.mxu0 %v5610_v43  ;;  %v2816_v19 = vrot.slane %v6433_v44, 2  ;;  %v2882_v22 = vrot.slane %v6433_v44, 3  ;;  %v2948_v25 = vrot.slane %v6433_v44, 4  ;;  %v3014_v26 = vrot.slane %v6433_v44, 5 }
 0x24a   :  { %v6470_v8 = vpop.permute.xlu0 %1757  ;;  %4808 = vmatpush3.bf16.msra.mxu1 %v5489_v59  ;;  %4813 = vmatprep.mubr.msk.bf16.mxu1 %vm5611_vm2, %v5610_v43  ;;  %v6498_v18 = vsel %vm2091_vm4, %v2619_v10, %v6431_v31  ;;  %v6504_v23 = vsel %vm2091_vm4, %v2750_v15, %v2749_v14  ;;  %v3013_v32 = vrot.slane %v6431_v31, 6  ;;  %v3079_v41 = vrot.slane %v6431_v31, 7  ;;  %v5495_v31 = vld [vmem:[%s7155_s3 + $0x64] sm:$0xff]   ;;  %v5505_v10 = vld [vmem:[%s7155_s3 + $0x9c] ss:$0 sps:$4 sm:$0x33]  }
 0x24b   :  { %4809 = vmatprep.subr.bf16.mxu1 %v5610_v43  ;;  %v6512_v20 = vsel %vm2091_vm4, %v2816_v19, %v2815_v16  ;;  %v6515_v30 = vsel %vm2091_vm4, %v2882_v22, %v2881_v21  ;;  %v6519_v33 = vsel %vm2091_vm4, %v2948_v25, %v2947_v24  ;;  %v3080_v42 = vrot.slane %v6433_v44, 6 }
 0x24c   :  { %4800 = vmatpush3.bf16.msra.mxu0 %v5490_v2  ;;  %v6524_v40 = vsel %vm2091_vm4, %v3014_v26, %v3013_v32  ;;  %v2224_v48 = vpack.c.b16 %v6446_v60, %v6446_v60  ;;  %v2290_v44 = vpack.c.b16 %v6449_v61, %v6449_v61  ;;  %v2376_v58 = vsel %vm2113_vm1, %v5498_v52, 0  ;;  %v5500_v60 = vld [vmem:[%s7155_s3 + $0x78] sm:$0xff]   ;;  %v5511_v52 = vld [vmem:[%s7155_s3 + $0xc4] ss:$0 sps:$4 sm:$0x33]  }
 0x24d   :  { %v1852_v27 = vpop.permute.xlu1 %1851  ;;  %4801 = vmatprep.subr.bf16.mxu0 %v5610_v43  ;;  %v6535_v49 = vsel %vm2091_vm4, %v3080_v42, %v3079_v41  ;;  %v2442_v59 = vsel %vm2113_vm1, %v5499_v56, 0  ;;  %v2356_v63 = vpack.c.b16 %v6453_v0, %v6453_v0  ;;  %v1783_v2 = vmax.f32 %v6328_v35, %v6439_v53  ;;  %v5502_v0 = vld [vmem:[%s7155_s3 + $0x80] sm:$0xff]   ;;  %v5504_v53 = vld [vmem:[%s7155_s3 + $0x88] ss:$0 sps:$4 sm:$0x33]  }
 0x24e   :  { %v1798_v28 = vpop.permute.xlu0 %1797  ;;  %4810 = vmatpush3.bf16.msra.mxu1 %v5491_v12  ;;  %v2422_v5 = vpack.c.b16 %v6462_v3, %v6462_v3  ;;  %v5503_v3 = vld [vmem:[%s7155_s3 + $0x94] sm:$0xff]   ;;  %v1779_v12 = vmax.f32 %v6326_v34, %v6470_v8  ;;  %v2508_v24 = vsel %vm2113_vm1, %v5504_v53, 0  ;;  %v2574_v34 = vsel %vm2113_vm1, %v5505_v10, 0 }
 0x24f   :  { %4811 = vmatprep.subr.bf16.mxu1 %v5610_v43  ;;  %v1815_v9 = vmax.f32 %v1783_v2, %v1798_v28  ;;  %v5506_v28 = vld [vmem:[%s7155_s3 + $0xa0] sm:$0xff]   ;;  %v2488_v42 = vpack.c.b16 %v6465_v4, %v6465_v4  ;;  %v5508_v4 = vld [vmem:[%s7155_s3 + $0xa8] sm:$0xff]  }
 0x250   :  { %4802 = vmatpush3.bf16.msra.mxu0 %v2244_v29 }
 0x251   :  { %v1836_v47 = vpop.permute.xlu1 %1835  ;;  %4817 = vmatprep.subr.bf16.mxu0 %v5610_v43 }
 0x252   :  { %v1850_v46 = vpop.permute.xlu0 %1849  ;;  %4812 = vmatpush3.bf16.msra.mxu1 %v2310_v36 }
 0x253   :  { %4804 = vmatmul.mubr.msk.bf16.vlgmr.msra.gmra.mrb[12].mxu0 %vm2109_vm5, %v2224_v48  ;;  %4827 = vmatprep.subr.bf16.mxu1 %v5610_v43  ;;  %v1864_v6 = vsel %vm1857_vm3, %v1850_v46, %v1852_v27  ;;  %v5507_v46 = vld [vmem:[%s7155_s3 + $0xb4] sm:$0xff]  }
 0x254   :  { %4818 = vmatpush3.bf16.msra.mxu0 %v5494_v45  ;;  %4823 = vmatprep.mubr.msk.bf16.mxu0 %vm5611_vm2, %v5610_v43  ;;  %v1880_v14 = vmax.f32 %v1815_v9, %v1864_v6  ;;  %v2554_v45 = vpack.c.b16 %v6487_v13, %v6487_v13 }
 0x255   :  { %4814 = vmatmul.mubr.msk.bf16.vlgmr.msra.gmra.mrb[12].mxu1 %vm2109_vm5, %v2290_v44  ;;  %v1768_v51 = vpop.permute.xlu1 %1767  ;;  %4819 = vmatprep.subr.bf16.mxu0 %v5610_v43 }
 0x256   :  { %4828 = vmatpush3.bf16.msra.mxu1 %v5495_v31  ;;  %4833 = vmatprep.mubr.msk.bf16.mxu1 %vm5611_vm2, %v5610_v43  ;;  %v1790_v55 = vpop.permute.xlu0 %1789  ;;  %v1784_v15 = vmax.f32 %v6335_v39, %v1768_v51  ;;  %v1912_v39 = vadd.f32 %v6429_v37, %v1880_v14  ;;  %v5509_v51 = vld [vmem:[%s7155_s3 + $0xbc] sm:$0xff]  }
 0x257   :  { %4829 = vmatprep.subr.bf16.mxu1 %v5610_v43  ;;  %v1811_v19 = vmax.f32 %v1779_v12, %v1790_v55 }
 0x258   :  { %4820 = vmatpush3.bf16.msra.mxu0 %v5496_v50 }
 0x259   :  { %v1760_v57 = vpop.permute.xlu1 %1759  ;;  %4821 = vmatprep.subr.bf16.mxu0 %v5610_v43 }
 0x25a   :  { %4830 = vmatpush3.bf16.msra.mxu1 %v5497_v54  ;;  %v1834_v61 = vpop.permute.xlu0 %1833  ;;  %v1780_v26 = vmax.f32 %v6333_v38, %v1760_v57 }
 0x25b   :  { %4831 = vmatprep.subr.bf16.mxu1 %v5610_v43  ;;  %v1860_v17 = vsel %vm1857_vm3, %v1834_v61, %v1836_v47  ;;  %v1920_v47 = vmax.f32 %v1912_v39, 0.0 }
 0x25c   :  { %4822 = vmatpush3.bf16.msra.mxu0 %v2376_v58  ;;  %v1876_v8 = vmax.f32 %v1811_v19, %v1860_v17  ;;  %v2706_v58 = vsel %vm2113_vm1, %v5511_v52, 0 }
 0x25d   :  { %v1800_v62 = vpop.permute.xlu1 %1799  ;;  %4837 = vmatprep.subr.bf16.mxu0 %v5610_v43 }
 0x25e   :  { %4832 = vmatpush3.bf16.msra.mxu1 %v2442_v59  ;;  %v1854_v16 = vpop.permute.xlu0 %1853  ;;  %v1816_v21 = vmax.f32 %v1784_v15, %v1800_v62  ;;  %v1908_v48 = vadd.f32 %v6429_v37, %v1876_v8  ;;  %v5510_v37 = vld [vmem:[%s7155_s3 + $0xb0] ss:$0 sps:$4 sm:$0x33]   ;;  %v2621_v59 = vpack.c.b16 %v6498_v18, %v6498_v18 }
 0x25f   :  { %4824 = vmatmul.mubr.msk.bf16.vlgmr.msra.gmra.mrb[16].mxu0 %vm2109_vm5, %v2356_v63  ;;  %4847 = vmatprep.subr.bf16.mxu1 %v5610_v43  ;;  %v2641_v57 = vsel %vm2113_vm1, %v5510_v37, 0 }
 0x260   :  { %4838 = vmatpush3.bf16.msra.mxu0 %v5500_v60  ;;  %4843 = vmatprep.mubr.msk.bf16.mxu0 %vm5611_vm2, %v5610_v43  ;;  %v2686_v60 = vpack.c.b16 %v6479_v11, %v6479_v11 }
 0x261   :  { %4834 = vmatmul.mubr.msk.bf16.vlgmr.msra.gmra.mrb[16].mxu1 %vm2109_vm5, %v2422_v5  ;;  %v1792_v35 = vpop.permute.xlu1 %1791  ;;  %4839 = vmatprep.subr.bf16.mxu0 %v5610_v43  ;;  %v5512_v5 = vld [vmem:[%s7155_s3 + $0xc8] sm:$0xff]  }
 0x262   :  { %4848 = vmatpush3.bf16.msra.mxu1 %v5501_v1  ;;  %4853 = vmatprep.mubr.msk.bf16.mxu1 %vm5611_vm2, %v5610_v43  ;;  %v1838_v29 = vpop.permute.xlu0 %1837  ;;  %v1812_v32 = vmax.f32 %v1780_v26, %v1792_v35 }
 0x263   :  { %4849 = vmatprep.subr.bf16.mxu1 %v5610_v43 }
 0x264   :  { %4840 = vmatpush3.bf16.msra.mxu0 %v5502_v0 }
 0x265   :  { %v1856_v22 = vpop.permute.xlu1 %1855  ;;  %4841 = vmatprep.subr.bf16.mxu0 %v5610_v43 }
 0x266   :  { %4850 = vmatpush3.bf16.msra.mxu1 %v5503_v3  ;;  %v1865_v25 = vsel %vm1857_vm3, %v1854_v16, %v1856_v22  ;;  %v5513_v3 = vld [vmem:[%s7155_s3 + $0xdc] sm:$0xff]   ;;  %v5516_v16 = vld [vmem:[%s7155_s3 + $0xd8] ss:$0 sps:$4 sm:$0x33]  }
 0x267   :  { %v1881_v27 = vmax.f32 %v1816_v21, %v1865_v25  ;;  %4851 = vmatprep.subr.bf16.mxu1 %v5610_v43 }
 0x268   :  { %4842 = vmatpush3.bf16.msra.mxu0 %v2508_v24  ;;  %v5514_v24 = vld [vmem:[%s7155_s3 + $0xd0] sm:$0xff]  }
 0x269   :  { %v1913_v36 = vadd.f32 %v6468_v7, %v1881_v27  ;;  %v1840_v41 = vpop.permute.xlu1 %1839  ;;  %4857 = vmatprep.subr.bf16.mxu0 %v5610_v43 }
 0x26a   :  { %4852 = vmatpush3.bf16.msra.mxu1 %v2574_v34  ;;  %v1861_v38 = vsel %vm1857_vm3, %v1838_v29, %v1840_v41 }
 0x26b   :  { %v1921_v31 = vmax.f32 %v1913_v36, 0.0  ;;  %v1877_v44 = vmax.f32 %v1812_v32, %v1861_v38  ;;  %4844 = vmatmul.mubr.msk.bf16.vlgmr.msra.gmra.mrb[20].mxu0 %vm2109_vm5, %v2488_v42  ;;  %4867 = vmatprep.subr.bf16.mxu1 %v5610_v43  ;;  %v5515_v32 = vld [vmem:[%s7155_s3 + $0xe4] sm:$0xff]   ;;  %v5517_v42 = vld [vmem:[%s7155_s3 + $0xec] ss:$0 sps:$4 sm:$0x33]  }
 0x26c   :  { %4858 = vmatpush3.bf16.msra.mxu0 %v5506_v28  ;;  %4863 = vmatprep.mubr.msk.bf16.mxu0 %vm5611_vm2, %v5610_v43 }
 0x26d   :  { %v1925_v13 = vpack.c.bf16 %v1921_v31, %v1920_v47  ;;  %v1909_v50 = vadd.f32 %v6468_v7, %v1877_v44  ;;  %4854 = vmatmul.mubr.msk.bf16.vlgmr.msra.gmra.mrb[20].mxu1 %vm2109_vm5, %v2554_v45  ;;  %4859 = vmatprep.subr.bf16.mxu0 %v5610_v43  ;;  %v1916_v7 = vmax.f32 %v1908_v48, 0.0  ;;  %v2772_v48 = vsel %vm2113_vm1, %v5516_v16, 0 }
 0x26e   :  { %4868 = vmatpush3.bf16.msra.mxu1 %v5507_v46  ;;  %4873 = vmatprep.mubr.msk.bf16.mxu1 %vm5611_vm2, %v5610_v43  ;;  %v3082_v16 = vpack.c.b16 %v6535_v49, %v6535_v49  ;;  %v5533_v49 = vld [vmem:[%s7155_s3 + $0x15c] sm:$0xff]  }
 0x26f   :  { %v3148_v54 = vunpack.c.l.b16 %v1925_v13  ;;  %v1917_v55 = vmax.f32 %v1909_v50, 0.0  ;;  %4869 = vmatprep.subr.bf16.mxu1 %v5610_v43  ;;  %v6656_v61 = vunpack.c.h.b16 %v1925_v13 }
 0x270   :  { %4860 = vmatpush3.bf16.msra.mxu0 %v5508_v4 }
 0x271   :  { %v1923_v56 = vpack.c.bf16 %v1917_v55, %v1916_v7  ;;  %4861 = vmatprep.subr.bf16.mxu0 %v5610_v43  ;;  %v3149_v63 = vrot.slane %v3148_v54, 7  ;;  %v3280_v1 = vrot.slane %v3148_v54, 1  ;;  %v3346_v6 = vrot.slane %v3148_v54, 2 }
 0x272   :  { %4870 = vmatpush3.bf16.msra.mxu1 %v5509_v51  ;;  %v3412_v0 = vrot.slane %v3148_v54, 3  ;;  %v3478_v18 = vrot.slane %v3148_v54, 4  ;;  %v3544_v15 = vrot.slane %v3148_v54, 5  ;;  %v3610_v25 = vrot.slane %v3148_v54, 6 }
 0x273   :  { %v3147_v62 = vunpack.c.l.b16 %v1923_v56  ;;  %4871 = vmatprep.subr.bf16.mxu1 %v5610_v43  ;;  %v6659_v2 = vunpack.c.h.b16 %v1923_v56  ;;  %v3677_v34 = vrot.slane %v6656_v61, 7  ;;  %v3808_v8 = vrot.slane %v6656_v61, 1 }
 0x274   :  { %4862 = vmatpush3.bf16.msra.mxu0 %v2641_v57  ;;  %v3874_v41 = vrot.slane %v6656_v61, 2  ;;  %v3940_v31 = vrot.slane %v6656_v61, 3  ;;  %v4006_v50 = vrot.slane %v6656_v61, 4  ;;  %v4072_v51 = vrot.slane %v6656_v61, 5  ;;  %v5518_v57 = vld [vmem:[%s7155_s3 + $0xf0] sm:$0xff]  }
 0x275   :  { %4877 = vmatprep.subr.bf16.mxu0 %v5610_v43  ;;  %v6666_v11 = vsel %vm2091_vm4, %v3149_v63, %v3147_v62  ;;  %v3214_v9 = vrot.slane %v3147_v62, 1  ;;  %v3279_v35 = vrot.slane %v3147_v62, 2  ;;  %v3345_v53 = vrot.slane %v3147_v62, 3  ;;  %v5522_v63 = vld [vmem:[%s7155_s3 + $0x100] ss:$0 sps:$4 sm:$0x33]  }
 0x276   :  { %4872 = vmatpush3.bf16.msra.mxu1 %v2706_v58  ;;  %v3411_v10 = vrot.slane %v3147_v62, 4  ;;  %v3477_v12 = vrot.slane %v3147_v62, 5  ;;  %v3543_v14 = vrot.slane %v3147_v62, 6  ;;  %v3609_v22 = vrot.slane %v3147_v62, 7 }
 0x277   :  { %4864 = vmatmul.mubr.msk.bf16.vlgmr.msra.gmra.mrb[24].mxu0 %vm2109_vm5, %v2621_v59  ;;  %4887 = vmatprep.subr.bf16.mxu1 %v5610_v43  ;;  %v6677_v17 = vsel %vm2091_vm4, %v3148_v54, %v3214_v9  ;;  %v6680_v19 = vsel %vm2091_vm4, %v3280_v1, %v3279_v35  ;;  %v6683_v21 = vsel %vm2091_vm4, %v3346_v6, %v3345_v53  ;;  %v3742_v39 = vrot.slane %v6659_v2, 1  ;;  %v5523_v1 = vld [vmem:[%s7155_s3 + $0x114] ss:$0 sps:$4 sm:$0x33]   ;;  %v5524_v6 = vld [vmem:[%s7155_s3 + $0x118] sm:$0xff]   ;;  %v5526_v35 = vld [vmem:[%s7155_s3 + $0x120] sm:$0xff]  }
 0x278   :  { %4878 = vmatpush3.bf16.msra.mxu0 %v5512_v5  ;;  %4883 = vmatprep.mubr.msk.bf16.mxu0 %vm5611_vm2, %v5610_v43  ;;  %v6696_v26 = vsel %vm2091_vm4, %v3412_v0, %v3411_v10  ;;  %v6699_v27 = vsel %vm2091_vm4, %v3478_v18, %v3477_v12  ;;  %v6702_v28 = vsel %vm2091_vm4, %v3544_v15, %v3543_v14  ;;  %v3807_v29 = vrot.slane %v6659_v2, 2  ;;  %v5525_v18 = vld [vmem:[%s7155_s3 + $0x12c] sm:$0xff]   ;;  %v5529_v53 = vld [vmem:[%s7155_s3 + $0x13c] ss:$0 sps:$4 sm:$0x33]   ;;  %v5530_v12 = vld [vmem:[%s7155_s3 + $0x140] sm:$0xff]  }
 0x279   :  { %4874 = vmatmul.mubr.msk.bf16.vlgmr.msra.gmra.mrb[24].mxu1 %vm2109_vm5, %v2686_v60  ;;  %4879 = vmatprep.subr.bf16.mxu0 %v5610_v43  ;;  %v3873_v36 = vrot.slane %v6659_v2, 3  ;;  %v6717_v38 = vsel %vm2091_vm4, %v3610_v25, %v3609_v22  ;;  %v6721_v45 = vsel %vm2091_vm4, %v3677_v34, %v6659_v2  ;;  %v6725_v46 = vsel %vm2091_vm4, %v6656_v61, %v3742_v39  ;;  %v5531_v15 = vld [vmem:[%s7155_s3 + $0x154] sm:$0xff]   ;;  %v5532_v22 = vld [vmem:[%s7155_s3 + $0x148] sm:$0xff]  }
 0x27a   :  { %4888 = vmatpush3.bf16.msra.mxu1 %v5513_v3  ;;  %4893 = vmatprep.mubr.msk.bf16.mxu1 %vm5611_vm2, %v5610_v43  ;;  %v6728_v47 = vsel %vm2091_vm4, %v3808_v8, %v3807_v29  ;;  %v3939_v4 = vrot.slane %v6659_v2, 4  ;;  %v4005_v13 = vrot.slane %v6659_v2, 5  ;;  %v4071_v37 = vrot.slane %v6659_v2, 6  ;;  %v5536_v39 = vld [vmem:[%s7155_s3 + $0x168] sm:$0xff]   ;;  %v5537_v29 = vld [vmem:[%s7155_s3 + $0x17c] sm:$0xff]  }
 0x27b   :  { %4889 = vmatprep.subr.bf16.mxu1 %v5610_v43  ;;  %v6734_v44 = vsel %vm2091_vm4, %v3874_v41, %v3873_v36  ;;  %v4137_v52 = vrot.slane %v6659_v2, 7  ;;  %v2838_v7 = vsel %vm2113_vm1, %v5517_v42, 0  ;;  %v4138_v56 = vrot.slane %v6656_v61, 6  ;;  %v5519_v61 = vld [vmem:[%s7155_s3 + $0x104] sm:$0xff]   ;;  %v5538_v36 = vld [vmem:[%s7155_s3 + $0x170] sm:$0xff]  }
 0x27c   :  { %4880 = vmatpush3.bf16.msra.mxu0 %v5514_v24  ;;  %v6745_v54 = vsel %vm2091_vm4, %v3940_v31, %v3939_v4  ;;  %v6748_v55 = vsel %vm2091_vm4, %v4006_v50, %v4005_v13  ;;  %v6755_v58 = vsel %vm2091_vm4, %v4072_v51, %v4071_v37  ;;  %v2752_v59 = vpack.c.b16 %v6504_v23, %v6504_v23  ;;  %v5520_v23 = vld [vmem:[%s7155_s3 + $0xf8] sm:$0xff]   ;;  %v5535_v24 = vld [vmem:[%s7155_s3 + $0x164] ss:$0 sps:$4 sm:$0x33]   ;;  %v5542_v31 = vld [vmem:[%s7155_s3 + $0x190] sm:$0xff]  }
 0x27d   :  { %4881 = vmatprep.subr.bf16.mxu0 %v5610_v43  ;;  %v6761_v60 = vsel %vm2091_vm4, %v4138_v56, %v4137_v52  ;;  %v2818_v62 = vpack.c.b16 %v6512_v20, %v6512_v20  ;;  %v5521_v20 = vld [vmem:[%s7155_s3 + $0x10c] sm:$0xff]   ;;  %v2904_v2 = vsel %vm2113_vm1, %v5522_v63, 0  ;;  %v2970_v5 = vsel %vm2113_vm1, %v5523_v1, 0  ;;  %v5543_v13 = vld [vmem:[%s7155_s3 + $0x1a4] sm:$0xff]   ;;  %v5544_v37 = vld [vmem:[%s7155_s3 + $0x198] sm:$0xff]  }
 0x27e   :  { %4890 = vmatpush3.bf16.msra.mxu1 %v5515_v32  ;;  %v2884_v0 = vpack.c.b16 %v6515_v30, %v6515_v30  ;;  %v2950_v9 = vpack.c.b16 %v6519_v33, %v6519_v33  ;;  %v5528_v30 = vld [vmem:[%s7155_s3 + $0x128] ss:$0 sps:$4 sm:$0x33]   ;;  %v5527_v33 = vld [vmem:[%s7155_s3 + $0x134] sm:$0xff]   ;;  %v3102_v10 = vsel %vm2113_vm1, %v5529_v53, 0  ;;  %v3016_v14 = vpack.c.b16 %v6524_v40, %v6524_v40  ;;  %v5554_v1 = vld [vmem:[%s7155_s3 + $0x1e0] sm:$0xff]  }
 0x27f   :  { %4891 = vmatprep.subr.bf16.mxu1 %v5610_v43  ;;  %v3036_v3 = vsel %vm2113_vm1, %v5528_v30, 0  ;;  %v5534_v40 = vld [vmem:[%s7155_s3 + $0x150] ss:$0 sps:$4 sm:$0x33]   ;;  %v3236_v34 = vsel %vm2113_vm1, %v5535_v24, 0  ;;  %v3151_v8 = vpack.c.b16 %v6666_v11, %v6666_v11  ;;  %v3216_v32 = vpack.c.b16 %v6677_v17, %v6677_v17  ;;  %v5539_v17 = vld [vmem:[%s7155_s3 + $0x184] sm:$0xff]  }
 0x280   :  { %4882 = vmatpush3.bf16.msra.mxu0 %v2772_v48  ;;  %v3171_v25 = vsel %vm2113_vm1, %v5534_v40, 0  ;;  %v5540_v11 = vld [vmem:[%s7155_s3 + $0x178] ss:$0 sps:$4 sm:$0x33]   ;;  %v3282_v4 = vpack.c.b16 %v6680_v19, %v6680_v19  ;;  %v3348_v50 = vpack.c.b16 %v6683_v21, %v6683_v21  ;;  %v5545_v21 = vld [vmem:[%s7155_s3 + $0x1ac] sm:$0xff]   ;;  %v5561_v53 = vld [vmem:[%s7155_s3 + $0x21c] sm:$0xff]  }
 0x281   :  { %4897 = vmatprep.subr.bf16.mxu0 %v5610_v43  ;;  %v5541_v41 = vld [vmem:[%s7155_s3 + $0x18c] ss:$0 sps:$4 sm:$0x33]   ;;  %v3302_v42 = vsel %vm2113_vm1, %v5540_v11, 0  ;;  %v5548_v56 = vld [vmem:[%s7155_s3 + $0x1b8] sm:$0xff]   ;;  %v5567_v40 = vld [vmem:[%s7155_s3 + $0x244] sm:$0xff]  }
 0x282   :  { %4892 = vmatpush3.bf16.msra.mxu1 %v2838_v7  ;;  %v3368_v48 = vsel %vm2113_vm1, %v5541_v41, 0  ;;  %v5546_v19 = vld [vmem:[%s7155_s3 + $0x1a0] ss:$0 sps:$4 sm:$0x33]   ;;  %v5560_v30 = vld [vmem:[%s7155_s3 + $0x208] sm:$0xff]   ;;  %v5568_v24 = vld [vmem:[%s7155_s3 + $0x238] sm:$0xff]  }
 0x283   :  { %4884 = vmatmul.mubr.msk.bf16.vlgmr.msra.gmra.mrb[28].mxu0 %vm2109_vm5, %v2752_v59  ;;  %4907 = vmatprep.subr.bf16.mxu1 %v5610_v43  ;;  %v5547_v51 = vld [vmem:[%s7155_s3 + $0x1b4] ss:$0 sps:$4 sm:$0x33]   ;;  %v3434_v52 = vsel %vm2113_vm1, %v5546_v19, 0  ;;  %v5549_v59 = vld [vmem:[%s7155_s3 + $0x1cc] sm:$0xff]   ;;  %v5574_v11 = vld [vmem:[%s7155_s3 + $0x260] sm:$0xff]  }
 0x284   :  { %4898 = vmatpush3.bf16.msra.mxu0 %v5518_v57  ;;  %4903 = vmatprep.mubr.msk.bf16.mxu0 %vm5611_vm2, %v5610_v43  ;;  %v3500_v7 = vsel %vm2113_vm1, %v5547_v51, 0  ;;  %v3414_v57 = vpack.c.b16 %v6696_v26, %v6696_v26  ;;  %v5552_v26 = vld [vmem:[%s7155_s3 + $0x1c8] ss:$0 sps:$4 sm:$0x33]  }
 0x285   :  { %4894 = vmatmul.mubr.msk.bf16.vlgmr.msra.gmra.mrb[28].mxu1 %vm2109_vm5, %v2818_v62  ;;  %4899 = vmatprep.subr.bf16.mxu0 %v5610_v43  ;;  %v5550_v62 = vld [vmem:[%s7155_s3 + $0x1c0] sm:$0xff]   ;;  %v3566_v63 = vsel %vm2113_vm1, %v5552_v26, 0 }
 0x286   :  { %4908 = vmatpush3.bf16.msra.mxu1 %v5519_v61  ;;  %4913 = vmatprep.mubr.msk.bf16.mxu1 %vm5611_vm2, %v5610_v43  ;;  %v3480_v61 = vpack.c.b16 %v6699_v27, %v6699_v27  ;;  %v5551_v27 = vld [vmem:[%s7155_s3 + $0x1d4] sm:$0xff]  }
 0x287   :  { %4909 = vmatprep.subr.bf16.mxu1 %v5610_v43 }
 0x288   :  { %4900 = vmatpush3.bf16.msra.mxu0 %v5520_v23  ;;  %v5553_v23 = vld [vmem:[%s7155_s3 + $0x1dc] ss:$0 sps:$4 sm:$0x33]  }
 0x289   :  { %4901 = vmatprep.subr.bf16.mxu0 %v5610_v43 }
 0x28a   :  { %4910 = vmatpush3.bf16.msra.mxu1 %v5521_v20  ;;  %v3632_v20 = vsel %vm2113_vm1, %v5553_v23, 0 }
 0x28b   :  { %4911 = vmatprep.subr.bf16.mxu1 %v5610_v43 }
 0x28c   :  { %4902 = vmatpush3.bf16.msra.mxu0 %v2904_v2  ;;  %v3546_v2 = vpack.c.b16 %v6702_v28, %v6702_v28  ;;  %v5558_v28 = vld [vmem:[%s7155_s3 + $0x1f0] ss:$0 sps:$4 sm:$0x33]  }
 0x28d   :  { %4917 = vmatprep.subr.bf16.mxu0 %v5610_v43 }
 0x28e   :  { %4912 = vmatpush3.bf16.msra.mxu1 %v2970_v5  ;;  %v5555_v5 = vld [vmem:[%s7155_s3 + $0x1f4] sm:$0xff]  }
 0x28f   :  { %4904 = vmatmul.mubr.msk.bf16.vlgmr.msra.gmra.mrb[32].mxu0 %vm2109_vm5, %v2884_v0  ;;  %4927 = vmatprep.subr.bf16.mxu1 %v5610_v43  ;;  %v5556_v0 = vld [vmem:[%s7155_s3 + $0x1e8] sm:$0xff]  }
 0x290   :  { %4918 = vmatpush3.bf16.msra.mxu0 %v5524_v6  ;;  %4923 = vmatprep.mubr.msk.bf16.mxu0 %vm5611_vm2, %v5610_v43  ;;  %v3612_v6 = vpack.c.b16 %v6717_v38, %v6717_v38  ;;  %v5557_v38 = vld [vmem:[%s7155_s3 + $0x1fc] sm:$0xff]  }
 0x291   :  { %4914 = vmatmul.mubr.msk.bf16.vlgmr.msra.gmra.mrb[32].mxu1 %vm2109_vm5, %v2950_v9  ;;  %4919 = vmatprep.subr.bf16.mxu0 %v5610_v43  ;;  %v3699_v9 = vsel %vm2113_vm1, %v5558_v28, 0 }
 0x292   :  { %4928 = vmatpush3.bf16.msra.mxu1 %v5525_v18  ;;  %4933 = vmatprep.mubr.msk.bf16.mxu1 %vm5611_vm2, %v5610_v43  ;;  %v5559_v18 = vld [vmem:[%s7155_s3 + $0x204] ss:$0 sps:$4 sm:$0x33]  }
 0x293   :  { %4929 = vmatprep.subr.bf16.mxu1 %v5610_v43 }
 0x294   :  { %4920 = vmatpush3.bf16.msra.mxu0 %v5526_v35  ;;  %v3764_v35 = vsel %vm2113_vm1, %v5559_v18, 0 }
 0x295   :  { %4921 = vmatprep.subr.bf16.mxu0 %v5610_v43 }
 0x296   :  { %4930 = vmatpush3.bf16.msra.mxu1 %v5527_v33  ;;  %v3679_v33 = vpack.c.b16 %v6721_v45, %v6721_v45  ;;  %v5564_v45 = vld [vmem:[%s7155_s3 + $0x218] ss:$0 sps:$4 sm:$0x33]  }
 0x297   :  { %4931 = vmatprep.subr.bf16.mxu1 %v5610_v43 }
 0x298   :  { %4922 = vmatpush3.bf16.msra.mxu0 %v3036_v3  ;;  %v3744_v3 = vpack.c.b16 %v6725_v46, %v6725_v46  ;;  %v5563_v46 = vld [vmem:[%s7155_s3 + $0x224] sm:$0xff]  }
 0x299   :  { %4937 = vmatprep.subr.bf16.mxu0 %v5610_v43 }
 0x29a   :  { %4932 = vmatpush3.bf16.msra.mxu1 %v3102_v10  ;;  %v5562_v10 = vld [vmem:[%s7155_s3 + $0x210] sm:$0xff]  }
 0x29b   :  { %4924 = vmatmul.mubr.msk.bf16.vlgmr.msra.gmra.mrb[36].mxu0 %vm2109_vm5, %v3016_v14  ;;  %4947 = vmatprep.subr.bf16.mxu1 %v5610_v43  ;;  %v3830_v14 = vsel %vm2113_vm1, %v5564_v45, 0 }
 0x29c   :  { %4938 = vmatpush3.bf16.msra.mxu0 %v5530_v12  ;;  %4943 = vmatprep.mubr.msk.bf16.mxu0 %vm5611_vm2, %v5610_v43  ;;  %v5565_v12 = vld [vmem:[%s7155_s3 + $0x22c] ss:$0 sps:$4 sm:$0x33]  }
 0x29d   :  { %4934 = vmatmul.mubr.msk.bf16.vlgmr.msra.gmra.mrb[36].mxu1 %vm2109_vm5, %v3082_v16  ;;  %4939 = vmatprep.subr.bf16.mxu0 %v5610_v43  ;;  %v5566_v16 = vld [vmem:[%s7155_s3 + $0x230] sm:$0xff]  }
 0x29e   :  { %4948 = vmatpush3.bf16.msra.mxu1 %v5531_v15  ;;  %4953 = vmatprep.mubr.msk.bf16.mxu1 %vm5611_vm2, %v5610_v43  ;;  %v3896_v15 = vsel %vm2113_vm1, %v5565_v12, 0 }
 0x29f   :  { %4949 = vmatprep.subr.bf16.mxu1 %v5610_v43 }
 0x2a0   :  { %4940 = vmatpush3.bf16.msra.mxu0 %v5532_v22  ;;  %v3810_v22 = vpack.c.b16 %v6728_v47, %v6728_v47  ;;  %v5570_v47 = vld [vmem:[%s7155_s3 + $0x240] ss:$0 sps:$4 sm:$0x33]  }
 0x2a1   :  { %4941 = vmatprep.subr.bf16.mxu0 %v5610_v43 }
 0x2a2   :  { %4950 = vmatpush3.bf16.msra.mxu1 %v5533_v49  ;;  %v3876_v49 = vpack.c.b16 %v6734_v44, %v6734_v44  ;;  %v5569_v44 = vld [vmem:[%s7155_s3 + $0x24c] sm:$0xff]  }
 0x2a3   :  { %4951 = vmatprep.subr.bf16.mxu1 %v5610_v43 }
 0x2a4   :  { %4942 = vmatpush3.bf16.msra.mxu0 %v3171_v25  ;;  %v5571_v25 = vld [vmem:[%s7155_s3 + $0x254] ss:$0 sps:$4 sm:$0x33]  }
 0x2a5   :  { %4957 = vmatprep.subr.bf16.mxu0 %v5610_v43 }
 0x2a6   :  { %4952 = vmatpush3.bf16.msra.mxu1 %v3236_v34  ;;  %v3962_v34 = vsel %vm2113_vm1, %v5570_v47, 0 }
 0x2a7   :  { %4944 = vmatmul.mubr.msk.bf16.vlgmr.msra.gmra.mrb[40].mxu0 %vm2109_vm5, %v3151_v8  ;;  %4967 = vmatprep.subr.bf16.mxu1 %v5610_v43  ;;  %v5572_v8 = vld [vmem:[%s7155_s3 + $0x258] sm:$0xff]  }
 0x2a8   :  { %4958 = vmatpush3.bf16.msra.mxu0 %v5536_v39  ;;  %4963 = vmatprep.mubr.msk.bf16.mxu0 %vm5611_vm2, %v5610_v43  ;;  %v4028_v39 = vsel %vm2113_vm1, %v5571_v25, 0 }
 0x2a9   :  { %4954 = vmatmul.mubr.msk.bf16.vlgmr.msra.gmra.mrb[40].mxu1 %vm2109_vm5, %v3216_v32  ;;  %4959 = vmatprep.subr.bf16.mxu0 %v5610_v43  ;;  %v5573_v32 = vld [vmem:[%s7155_s3 + $0x26c] sm:$0xff]  }
 0x2aa   :  { %4968 = vmatpush3.bf16.msra.mxu1 %v5537_v29  ;;  %4973 = vmatprep.mubr.msk.bf16.mxu1 %vm5611_vm2, %v5610_v43  ;;  %v3942_v29 = vpack.c.b16 %v6745_v54, %v6745_v54  ;;  %v5576_v54 = vld [vmem:[%s7155_s3 + $0x268] ss:$0 sps:$4 sm:$0x33]  }
 0x2ab   :  { %4969 = vmatprep.subr.bf16.mxu1 %v5610_v43  ;;  %v4094_v41 = vsel %vm2113_vm1, %v5576_v54, 0 }
 0x2ac   :  { %4960 = vmatpush3.bf16.msra.mxu0 %v5538_v36  ;;  %v4008_v36 = vpack.c.b16 %v6748_v55, %v6748_v55  ;;  %v5575_v55 = vld [vmem:[%s7155_s3 + $0x274] sm:$0xff]  }
 0x2ad   :  { %4961 = vmatprep.subr.bf16.mxu0 %v5610_v43 }
 0x2ae   :  { %4970 = vmatpush3.bf16.msra.mxu1 %v5539_v17  ;;  %v5577_v17 = vld [vmem:[%s7155_s3 + $0x27c] ss:$0 sps:$4 sm:$0x33]  }
 0x2af   :  { %4971 = vmatprep.subr.bf16.mxu1 %v5610_v43 }
 0x2b0   :  { %4962 = vmatpush3.bf16.msra.mxu0 %v3302_v42  ;;  %v4160_v42 = vsel %vm2113_vm1, %v5577_v17, 0 }
 0x2b1   :  { %4977 = vmatprep.subr.bf16.mxu0 %v5610_v43 }
 0x2b2   :  { %4972 = vmatpush3.bf16.msra.mxu1 %v3368_v48  ;;  %v4074_v48 = vpack.c.b16 %v6755_v58, %v6755_v58 }
 0x2b3   :  { %4964 = vmatmul.mubr.msk.bf16.vlgmr.msra.gmra.mrb[44].mxu0 %vm2109_vm5, %v3282_v4  ;;  %4987 = vmatprep.subr.bf16.mxu1 %v5610_v43 }
 0x2b4   :  { %4978 = vmatpush3.bf16.msra.mxu0 %v5542_v31  ;;  %4983 = vmatprep.mubr.msk.bf16.mxu0 %vm5611_vm2, %v5610_v43  ;;  %v4140_v31 = vpack.c.b16 %v6761_v60, %v6761_v60 }
 0x2b5   :  { %4974 = vmatmul.mubr.msk.bf16.vlgmr.msra.gmra.mrb[44].mxu1 %vm2109_vm5, %v3348_v50  ;;  %4979 = vmatprep.subr.bf16.mxu0 %v5610_v43 }
 0x2b6   :  { %4988 = vmatpush3.bf16.msra.mxu1 %v5543_v13  ;;  %4993 = vmatprep.mubr.msk.bf16.mxu1 %vm5611_vm2, %v5610_v43 }
 0x2b7   :  { %4989 = vmatprep.subr.bf16.mxu1 %v5610_v43 }
 0x2b8   :  { %4980 = vmatpush3.bf16.msra.mxu0 %v5544_v37 }
 0x2b9   :  { %4981 = vmatprep.subr.bf16.mxu0 %v5610_v43 }
 0x2ba   :  { %4990 = vmatpush3.bf16.msra.mxu1 %v5545_v21 }
 0x2bb   :  { %4991 = vmatprep.subr.bf16.mxu1 %v5610_v43 }
 0x2bc   :  { %4982 = vmatpush3.bf16.msra.mxu0 %v3434_v52 }
 0x2bd   :  { %4997 = vmatprep.subr.bf16.mxu0 %v5610_v43 }
 0x2be   :  { %4992 = vmatpush3.bf16.msra.mxu1 %v3500_v7 }
 0x2bf   :  { %4984 = vmatmul.mubr.msk.bf16.vlgmr.msra.gmra.mrb[48].mxu0 %vm2109_vm5, %v3414_v57  ;;  %5007 = vmatprep.subr.bf16.mxu1 %v5610_v43 }
 0x2c0   :  { %4998 = vmatpush3.bf16.msra.mxu0 %v5548_v56  ;;  %5003 = vmatprep.mubr.msk.bf16.mxu0 %vm5611_vm2, %v5610_v43 }
 0x2c1   :  { %4994 = vmatmul.mubr.msk.bf16.vlgmr.msra.gmra.mrb[48].mxu1 %vm2109_vm5, %v3480_v61  ;;  %4999 = vmatprep.subr.bf16.mxu0 %v5610_v43 }
 0x2c2   :  { %5008 = vmatpush3.bf16.msra.mxu1 %v5549_v59  ;;  %5013 = vmatprep.mubr.msk.bf16.mxu1 %vm5611_vm2, %v5610_v43 }
 0x2c3   :  { %5009 = vmatprep.subr.bf16.mxu1 %v5610_v43 }
 0x2c4   :  { %5000 = vmatpush3.bf16.msra.mxu0 %v5550_v62 }
 0x2c5   :  { %5001 = vmatprep.subr.bf16.mxu0 %v5610_v43 }
 0x2c6   :  { %5010 = vmatpush3.bf16.msra.mxu1 %v5551_v27 }
 0x2c7   :  { %5011 = vmatprep.subr.bf16.mxu1 %v5610_v43 }
 0x2c8   :  { %5002 = vmatpush3.bf16.msra.mxu0 %v3566_v63 }
 0x2c9   :  { %5017 = vmatprep.subr.bf16.mxu0 %v5610_v43 }
 0x2ca   :  { %5012 = vmatpush3.bf16.msra.mxu1 %v3632_v20 }
 0x2cb   :  { %5004 = vmatmul.mubr.msk.bf16.vlgmr.msra.gmra.mrb[52].mxu0 %vm2109_vm5, %v3546_v2  ;;  %5027 = vmatprep.subr.bf16.mxu1 %v5610_v43 }
 0x2cc   :  { %5018 = vmatpush3.bf16.msra.mxu0 %v5554_v1  ;;  %5023 = vmatprep.mubr.msk.bf16.mxu0 %vm5611_vm2, %v5610_v43 }
 0x2cd   :  { %5014 = vmatmul.mubr.msk.bf16.vlgmr.msra.gmra.mrb[52].mxu1 %vm2109_vm5, %v3612_v6  ;;  %5019 = vmatprep.subr.bf16.mxu0 %v5610_v43 }
 0x2ce   :  { %5028 = vmatpush3.bf16.msra.mxu1 %v5555_v5  ;;  %5033 = vmatprep.mubr.msk.bf16.mxu1 %vm5611_vm2, %v5610_v43 }
 0x2cf   :  { %5029 = vmatprep.subr.bf16.mxu1 %v5610_v43 }
 0x2d0   :  { %5020 = vmatpush3.bf16.msra.mxu0 %v5556_v0 }
 0x2d1   :  { %5021 = vmatprep.subr.bf16.mxu0 %v5610_v43 }
 0x2d2   :  { %5030 = vmatpush3.bf16.msra.mxu1 %v5557_v38 }
 0x2d3   :  { %5031 = vmatprep.subr.bf16.mxu1 %v5610_v43 }
 0x2d4   :  { %5022 = vmatpush3.bf16.msra.mxu0 %v3699_v9 }
 0x2d5   :  { %5037 = vmatprep.subr.bf16.mxu0 %v5610_v43 }
 0x2d6   :  { %5032 = vmatpush3.bf16.msra.mxu1 %v3764_v35 }
 0x2d7   :  { %5024 = vmatmul.mubr.msk.bf16.vlgmr.msra.gmra.mrb[56].mxu0 %vm2109_vm5, %v3679_v33  ;;  %5047 = vmatprep.subr.bf16.mxu1 %v5610_v43 }
 0x2d8   :  { %5038 = vmatpush3.bf16.msra.mxu0 %v5560_v30  ;;  %5043 = vmatprep.mubr.msk.bf16.mxu0 %vm5611_vm2, %v5610_v43 }
 0x2d9   :  { %5034 = vmatmul.mubr.msk.bf16.vlgmr.msra.gmra.mrb[56].mxu1 %vm2109_vm5, %v3744_v3  ;;  %5039 = vmatprep.subr.bf16.mxu0 %v5610_v43 }
 0x2da   :  { %5048 = vmatpush3.bf16.msra.mxu1 %v5561_v53  ;;  %5053 = vmatprep.mubr.msk.bf16.mxu1 %vm5611_vm2, %v5610_v43 }
 0x2db   :  { %5049 = vmatprep.subr.bf16.mxu1 %v5610_v43 }
 0x2dc   :  { %5040 = vmatpush3.bf16.msra.mxu0 %v5562_v10 }
 0x2dd   :  { %5041 = vmatprep.subr.bf16.mxu0 %v5610_v43 }
 0x2de   :  { %5050 = vmatpush3.bf16.msra.mxu1 %v5563_v46 }
 0x2df   :  { %5051 = vmatprep.subr.bf16.mxu1 %v5610_v43 }
 0x2e0   :  { %5042 = vmatpush3.bf16.msra.mxu0 %v3830_v14 }
 0x2e1   :  { %5057 = vmatprep.subr.bf16.mxu0 %v5610_v43 }
 0x2e2   :  { %5052 = vmatpush3.bf16.msra.mxu1 %v3896_v15 }
 0x2e3   :  { %5044 = vmatmul.mubr.msk.bf16.vlgmr.msra.gmra.mrb[60].mxu0 %vm2109_vm5, %v3810_v22  ;;  %5067 = vmatprep.subr.bf16.mxu1 %v5610_v43 }
 0x2e4   :  { %5058 = vmatpush3.bf16.msra.mxu0 %v5566_v16  ;;  %5063 = vmatprep.mubr.msk.bf16.mxu0 %vm5611_vm2, %v5610_v43 }
 0x2e5   :  { %5054 = vmatmul.mubr.msk.bf16.vlgmr.msra.gmra.mrb[60].mxu1 %vm2109_vm5, %v3876_v49  ;;  %5059 = vmatprep.subr.bf16.mxu0 %v5610_v43 }
 0x2e6   :  { %5068 = vmatpush3.bf16.msra.mxu1 %v5567_v40  ;;  %5073 = vmatprep.mubr.msk.bf16.mxu1 %vm5611_vm2, %v5610_v43 }
 0x2e7   :  { %5069 = vmatprep.subr.bf16.mxu1 %v5610_v43 }
 0x2e8   :  { %5060 = vmatpush3.bf16.msra.mxu0 %v5568_v24 }
 0x2e9   :  { %5061 = vmatprep.subr.bf16.mxu0 %v5610_v43 }
 0x2ea   :  { %5070 = vmatpush3.bf16.msra.mxu1 %v5569_v44 }
 0x2eb   :  { %5071 = vmatprep.subr.bf16.mxu1 %v5610_v43 }
 0x2ec   :  { %5062 = vmatpush3.bf16.msra.mxu0 %v3962_v34 }
 0x2ed   :  { %5077 = vmatprep.subr.bf16.mxu0 %v5610_v43 }
 0x2ee   :  { %5072 = vmatpush3.bf16.msra.mxu1 %v4028_v39 }
 0x2ef   :  { %5064 = vmatmul.mubr.msk.bf16.vlgmr.msra.gmra.mrb[64].mxu0 %vm2109_vm5, %v3942_v29  ;;  %5087 = vmatprep.subr.bf16.mxu1 %v5610_v43 }
 0x2f0   :  { %5078 = vmatpush3.bf16.msra.mxu0 %v5572_v8  ;;  %5083 = vmatprep.mubr.msk.bf16.mxu0 %vm5611_vm2, %v5610_v43 }
 0x2f1   :  { %5074 = vmatmul.mubr.msk.bf16.vlgmr.msra.gmra.mrb[64].mxu1 %vm2109_vm5, %v4008_v36  ;;  %5079 = vmatprep.subr.bf16.mxu0 %v5610_v43 }
 0x2f2   :  { %5088 = vmatpush3.bf16.msra.mxu1 %v5573_v32  ;;  %5093 = vmatprep.mubr.msk.bf16.mxu1 %vm5611_vm2, %v5610_v43 }
 0x2f3   :  { %5089 = vmatprep.subr.bf16.mxu1 %v5610_v43 }
 0x2f4   :  { %5080 = vmatpush3.bf16.msra.mxu0 %v5574_v11 }
 0x2f5   :  { %5081 = vmatprep.subr.bf16.mxu0 %v5610_v43 }
 0x2f6   :  { %5090 = vmatpush3.bf16.msra.mxu1 %v5575_v55 }
 0x2f7   :  { %5091 = vmatprep.subr.bf16.mxu1 %v5610_v43 }
 0x2f8   :  { %5082 = vmatpush3.bf16.msra.mxu0 %v4094_v41  ;;  %v5578_v41 = vld [vmem:[%s7157_s5] sm:$0xff]  }
 0x2f9   :  { %5097 = vmatprep.subr.bf16.mxu0 %v5610_v43 }
 0x2fa   :  { %5092 = vmatpush3.bf16.msra.mxu1 %v4160_v42 }
 0x2fb   :  { %5084 = vmatmul.mubr.msk.bf16.vlgmr.msra.gmra.mrb[68].mxu0 %vm2109_vm5, %v4074_v48  ;;  %v5579_v48 = vld [vmem:[%s7157_s5 + $0x8] sm:$0xff]  }
 0x2fc   :  { %5101 = vmatprep.mubr.msk.bf16.mxu0 %vm5611_vm2, %v5610_v43  ;;  %5098 = vmatpush3.bf16.msra.mxu0 %v5578_v41 }
 0x2fd   :  { %5094 = vmatmul.mubr.msk.bf16.vlgmr.msra.gmra.mrb[68].mxu1 %vm2109_vm5, %v4140_v31  ;;  %5099 = vmatprep.subr.bf16.mxu0 %v5610_v43 }
 0x300   :  { %5100 = vmatpush3.bf16.msra.mxu0 %v5579_v48 }
 0x31a   :  { %v2151_v4 = vpop.f32.mrb[8].mxu0 }
 0x31b   :  { %v4785_v13 = vpop.f32.mrb[9].mxu0 }
 0x31c   :  { %v2154_v50 = vpop.f32.mrb[10].mxu0  ;;  %v2215_v37 = vpop.f32.mrb[8].mxu1 }
 0x31d   :  { %v2216_v19 = vadd.f32 %v2215_v37, %v2151_v4  ;;  %v4786_v21 = vpop.f32.mrb[11].mxu0  ;;  %v4795_v58 = vpop.f32.mrb[9].mxu1 }
 0x31e   :  { %v2218_v51 = vpop.f32.mrb[10].mxu1 }
 0x31f   :  { %v4796_v52 = vpop.f32.mrb[11].mxu1 }
 0x326   :  { %v2280_v7 = vpop.f32.mrb[12].mxu0 }
 0x327   :  { %v2286_v56 = vadd.f32 %v2280_v7, %v2216_v19  ;;  %v4805_v57 = vpop.f32.mrb[13].mxu0 }
 0x328   :  { %v2283_v59 = vpop.f32.mrb[14].mxu0  ;;  %v2346_v61 = vpop.f32.mrb[12].mxu1 }
 0x329   :  { %v2352_v60 = vadd.f32 %v2346_v61, %v2286_v56  ;;  %v4806_v62 = vpop.f32.mrb[15].mxu0  ;;  %v4815_v26 = vpop.f32.mrb[13].mxu1 }
 0x32a   :  { %v2349_v27 = vpop.f32.mrb[14].mxu1 }
 0x32b   :  { %v4816_v23 = vpop.f32.mrb[15].mxu1 }
 0x332   :  { %v2412_v63 = vpop.f32.mrb[16].mxu0 }
 0x333   :  { %v2418_v20 = vadd.f32 %v2412_v63, %v2352_v60  ;;  %v4825_v1 = vpop.f32.mrb[17].mxu0 }
 0x334   :  { %v2415_v2 = vpop.f32.mrb[18].mxu0  ;;  %v2478_v5 = vpop.f32.mrb[16].mxu1 }
 0x335   :  { %v2484_v6 = vadd.f32 %v2478_v5, %v2418_v20  ;;  %v4826_v0 = vpop.f32.mrb[19].mxu0  ;;  %v4835_v28 = vpop.f32.mrb[17].mxu1 }
 0x336   :  { %v2481_v38 = vpop.f32.mrb[18].mxu1 }
 0x337   :  { %v4836_v18 = vpop.f32.mrb[19].mxu1 }
 0x33e   :  { %v2544_v9 = vpop.f32.mrb[20].mxu0 }
 0x33f   :  { %v2550_v35 = vadd.f32 %v2544_v9, %v2484_v6  ;;  %v4845_v30 = vpop.f32.mrb[21].mxu0 }
 0x340   :  { %v2547_v33 = vpop.f32.mrb[22].mxu0  ;;  %v2610_v53 = vpop.f32.mrb[20].mxu1 }
 0x341   :  { %v2616_v3 = vadd.f32 %v2610_v53, %v2550_v35  ;;  %v4846_v10 = vpop.f32.mrb[23].mxu0  ;;  %v4855_v45 = vpop.f32.mrb[21].mxu1 }
 0x342   :  { %v2613_v46 = vpop.f32.mrb[22].mxu1 }
 0x343   :  { %v4856_v12 = vpop.f32.mrb[23].mxu1 }
 0x34a   :  { %v2677_v14 = vpop.f32.mrb[24].mxu0 }
 0x34b   :  { %v2683_v15 = vadd.f32 %v2677_v14, %v2616_v3  ;;  %v4865_v16 = vpop.f32.mrb[25].mxu0 }
 0x34c   :  { %v2680_v22 = vpop.f32.mrb[26].mxu0  ;;  %v2742_v40 = vpop.f32.mrb[24].mxu1 }
 0x34d   :  { %v2748_v49 = vadd.f32 %v2742_v40, %v2683_v15  ;;  %v4866_v24 = vpop.f32.mrb[27].mxu0  ;;  %v4875_v47 = vpop.f32.mrb[25].mxu1 }
 0x34e   :  { %v2745_v44 = vpop.f32.mrb[26].mxu1 }
 0x34f   :  { %v4876_v25 = vpop.f32.mrb[27].mxu1 }
 0x356   :  { %v2808_v34 = vpop.f32.mrb[28].mxu0 }
 0x357   :  { %v2814_v39 = vadd.f32 %v2808_v34, %v2748_v49  ;;  %v4885_v8 = vpop.f32.mrb[29].mxu0 }
 0x358   :  { %v2811_v29 = vpop.f32.mrb[30].mxu0  ;;  %v2874_v32 = vpop.f32.mrb[28].mxu1 }
 0x359   :  { %v2880_v36 = vadd.f32 %v2874_v32, %v2814_v39  ;;  %v4886_v11 = vpop.f32.mrb[31].mxu0  ;;  %v4895_v54 = vpop.f32.mrb[29].mxu1 }
 0x35a   :  { %v2877_v55 = vpop.f32.mrb[30].mxu1 }
 0x35b   :  { %v4896_v17 = vpop.f32.mrb[31].mxu1 }
 0x362   :  { %v2940_v42 = vpop.f32.mrb[32].mxu0 }
 0x363   :  { %v2946_v31 = vadd.f32 %v2940_v42, %v2880_v36  ;;  %v4905_v4 = vpop.f32.mrb[33].mxu0 }
 0x364   :  { %v2943_v13 = vpop.f32.mrb[34].mxu0  ;;  %v3006_v50 = vpop.f32.mrb[32].mxu1 }
 0x365   :  { %v3012_v37 = vadd.f32 %v3006_v50, %v2946_v31  ;;  %v4906_v19 = vpop.f32.mrb[35].mxu0  ;;  %v4915_v21 = vpop.f32.mrb[33].mxu1 }
 0x366   :  { %v3009_v58 = vpop.f32.mrb[34].mxu1 }
 0x367   :  { %v4916_v51 = vpop.f32.mrb[35].mxu1 }
 0x36e   :  { %v3072_v52 = vpop.f32.mrb[36].mxu0 }
 0x36f   :  { %v3078_v7 = vadd.f32 %v3072_v52, %v3012_v37  ;;  %v4925_v56 = vpop.f32.mrb[37].mxu0 }
 0x370   :  { %v3075_v57 = vpop.f32.mrb[38].mxu0  ;;  %v3138_v59 = vpop.f32.mrb[36].mxu1 }
 0x371   :  { %v3144_v61 = vadd.f32 %v3138_v59, %v3078_v7  ;;  %v4926_v60 = vpop.f32.mrb[39].mxu0  ;;  %v4935_v62 = vpop.f32.mrb[37].mxu1 }
 0x372   :  { %v3141_v26 = vpop.f32.mrb[38].mxu1 }
 0x373   :  { %v4936_v27 = vpop.f32.mrb[39].mxu1 }
 0x37a   :  { %v3207_v23 = vpop.f32.mrb[40].mxu0 }
 0x37b   :  { %v3213_v43 = vadd.f32 %v3207_v23, %v3144_v61  ;;  %v4945_v63 = vpop.f32.mrb[41].mxu0 }
 0x37c   :  { %v3210_v20 = vpop.f32.mrb[42].mxu0  ;;  %v3272_v1 = vpop.f32.mrb[40].mxu1 }
 0x37d   :  { %v3278_v2 = vadd.f32 %v3272_v1, %v3213_v43  ;;  %v4946_v5 = vpop.f32.mrb[43].mxu0  ;;  %v4955_v6 = vpop.f32.mrb[41].mxu1 }
 0x37e   :  { %v3275_v0 = vpop.f32.mrb[42].mxu1 }
 0x37f   :  { %v4956_v28 = vpop.f32.mrb[43].mxu1 }
 0x386   :  { %v3338_v38 = vpop.f32.mrb[44].mxu0 }
 0x387   :  { %v3344_v18 = vadd.f32 %v3338_v38, %v3278_v2  ;;  %v4965_v9 = vpop.f32.mrb[45].mxu0 }
 0x388   :  { %v3341_v35 = vpop.f32.mrb[46].mxu0  ;;  %v3404_v30 = vpop.f32.mrb[44].mxu1 }
 0x389   :  { %v3410_v33 = vadd.f32 %v3404_v30, %v3344_v18  ;;  %v4966_v53 = vpop.f32.mrb[47].mxu0  ;;  %v4975_v3 = vpop.f32.mrb[45].mxu1  ;;  %v4641_v18 = vld [vmem:[%s7156_s4] ss:$0 sm:$0xff]  ;;  %s5582_s4 = scalar_lea.vmem %s4288_s0, 32 }
 0x38a   :  { %v3407_v10 = vpop.f32.mrb[46].mxu1  ;;  %p5583_p0 = scmp.ne.s32.totalorder %s4288_s0, %s5582_s4  ;;  %p5588_p2 = scmp.lt.s32.totalorder %s5582_s4, %s5582_s4 }
 0x38b   :  { %v4976_v45 = vpop.f32.mrb[47].mxu1 }
 0x38c   :  { %p5589_p3 = por %p5588_p2, %p5587_p1 }
 0x38e   :  { %p5590_p4 = pnand %p5589_p3, %p5583_p0 }
 0x392   :  { %v3470_v46 = vpop.f32.mrb[48].mxu0 }
 0x393   :  { %v3476_v12 = vadd.f32 %v3470_v46, %v3410_v33  ;;  %v4985_v14 = vpop.f32.mrb[49].mxu0  ;;  %v4642_v46 = vld [vmem:[%s7158_s6] ss:$0 sm:$0xff] }
 0x394   :  { %v3473_v15 = vpop.f32.mrb[50].mxu0  ;;  %v3536_v16 = vpop.f32.mrb[48].mxu1 }
 0x395   :  { %v3542_v22 = vadd.f32 %v3536_v16, %v3476_v12  ;;  %v4986_v40 = vpop.f32.mrb[51].mxu0  ;;  %v4995_v49 = vpop.f32.mrb[49].mxu1 }
 0x396   :  { %v3539_v24 = vpop.f32.mrb[50].mxu1 }
 0x397   :  { %v4996_v47 = vpop.f32.mrb[51].mxu1 }
 0x39e   :  { %v3602_v44 = vpop.f32.mrb[52].mxu0 }
 0x39f   :  { %v3608_v25 = vadd.f32 %v3602_v44, %v3542_v22  ;;  %v5005_v34 = vpop.f32.mrb[53].mxu0 }
 0x3a0   :  { %v3605_v39 = vpop.f32.mrb[54].mxu0  ;;  %v3668_v8 = vpop.f32.mrb[52].mxu1 }
 0x3a1   :  { %v3674_v29 = vadd.f32 %v3668_v8, %v3608_v25  ;;  %v5006_v32 = vpop.f32.mrb[55].mxu0  ;;  %v5015_v36 = vpop.f32.mrb[53].mxu1 }
 0x3a2   :  { %v3671_v11 = vpop.f32.mrb[54].mxu1 }
 0x3a3   :  { %v5016_v54 = vpop.f32.mrb[55].mxu1 }
 0x3aa   :  { %v3735_v55 = vpop.f32.mrb[56].mxu0 }
 0x3ab   :  { %v3741_v17 = vadd.f32 %v3735_v55, %v3674_v29  ;;  %v5025_v41 = vpop.f32.mrb[57].mxu0 }
 0x3ac   :  { %v3738_v42 = vpop.f32.mrb[58].mxu0  ;;  %v3800_v48 = vpop.f32.mrb[56].mxu1 }
 0x3ad   :  { %v3806_v31 = vadd.f32 %v3800_v48, %v3741_v17  ;;  %v5026_v4 = vpop.f32.mrb[59].mxu0  ;;  %v5035_v13 = vpop.f32.mrb[57].mxu1 }
 0x3ae   :  { %v3803_v50 = vpop.f32.mrb[58].mxu1 }
 0x3af   :  { %v5036_v37 = vpop.f32.mrb[59].mxu1 }
 0x3b6   :  { %v3866_v19 = vpop.f32.mrb[60].mxu0 }
 0x3b7   :  { %v3872_v21 = vadd.f32 %v3866_v19, %v3806_v31  ;;  %v5045_v58 = vpop.f32.mrb[61].mxu0 }
 0x3b8   :  { %v3869_v51 = vpop.f32.mrb[62].mxu0  ;;  %v3932_v52 = vpop.f32.mrb[60].mxu1 }
 0x3b9   :  { %v3938_v7 = vadd.f32 %v3932_v52, %v3872_v21  ;;  %v5046_v56 = vpop.f32.mrb[63].mxu0  ;;  %v5055_v57 = vpop.f32.mrb[61].mxu1 }
 0x3ba   :  { %v3935_v59 = vpop.f32.mrb[62].mxu1 }
 0x3bb   :  { %v5056_v61 = vpop.f32.mrb[63].mxu1 }
 0x3c2   :  { %v3998_v60 = vpop.f32.mrb[64].mxu0 }
 0x3c3   :  { %v4004_v62 = vadd.f32 %v3998_v60, %v3938_v7  ;;  %v5065_v26 = vpop.f32.mrb[65].mxu0 }
 0x3c4   :  { %v4001_v27 = vpop.f32.mrb[66].mxu0  ;;  %v4064_v23 = vpop.f32.mrb[64].mxu1 }
 0x3c5   :  { %v4070_v43 = vadd.f32 %v4064_v23, %v4004_v62  ;;  %v5066_v63 = vpop.f32.mrb[67].mxu0  ;;  %v5075_v20 = vpop.f32.mrb[65].mxu1 }
 0x3c6   :  { %v4067_v1 = vpop.f32.mrb[66].mxu1 }
 0x3c7   :  { %v5076_v2 = vpop.f32.mrb[67].mxu1 }
 0x3ce   :  { %v4130_v5 = vpop.f32.mrb[68].mxu0 }
 0x3cf   :  { %v4136_v6 = vadd.f32 %v4130_v5, %v4070_v43  ;;  %v5085_v0 = vpop.f32.mrb[69].mxu0 }
 0x3d0   :  { %v4133_v28 = vpop.f32.mrb[70].mxu0  ;;  %v4196_v38 = vpop.f32.mrb[68].mxu1 }
 0x3d1   :  { %v4202_v9 = vadd.f32 %v4196_v38, %v4136_v6  ;;  %v5086_v35 = vpop.f32.mrb[71].mxu0  ;;  %v5095_v30 = vpop.f32.mrb[69].mxu1 }
 0x3d2   :  { %v4199_v33 = vpop.f32.mrb[70].mxu1 }
 0x3d3   :  { %v4210_v53 = vadd.f32 %v4641_v18, %v4202_v9  ;;  %v5096_v3 = vpop.f32.mrb[71].mxu1 }
 0x3d5   :  { %5580 = vtanh.f32 %v4210_v53 }
 0x3df   :  { %v5581_v10 = vpop.eup %5580 }
 0x3e0   :  { %v4212_v45 = vpack.c.bf16 %v5581_v10, %v5581_v10 }
 0x3e2   :  { %5102 = vmatmul.mubr.msk.bf16.vlgmr.msra.gmra.mrb[72].mxu0 %vm814_vm0, %v4212_v45 }
 0x4b5   :  { %v4273_v12 = vpop.f32.mrb[72].mxu0 }
 0x4b6   :  { %v4274_v14 = vadd.f32 %v4642_v46, %v4273_v12  ;;  %v5103_v15 = vpop.f32.mrb[73].mxu0 }
 0x4b7   :  { %v4276_v16 = vpop.f32.mrb[74].mxu0 }
 0x4b8   :  { %v5104_v22 = vpop.f32.mrb[75].mxu0  ;;  %4280 = vst.msk [vmem:[#allocation2] sm:$0x3] %vm4279_vm6, %v4274_v14 }
 0x4b9   :  { %5593 = shalt.err (!%p5590_p4)
}
 0x4ba   :  { %s5594_s6 = scalar_lea.hbm %s7159_s7, 32 }
 0x4bb   :  { %p5595_p5 = scmp.ne.s32.totalorder %s7159_s7, %s5594_s6  ;;  %p5598_p6 = scmp.lt.u32.totalorder %s5594_s6, %s7159_s7 }
 0x4bd   :  { %p5600_p7 = pnand %p5598_p6, %p5595_p5 }
 0x4bf   :  { %5603 = shalt.err (!%p5600_p7)
}
 0x4c0   :  { %4290 = dma.vmem_to_hbm [thread:$0]  %s4288_s0, 32, %s7159_s7, [#allocation3]  }
 0x4c1   :  { %5604 = dma.done.wait [#allocation3], 32  }
 0x4c2   :  { %5605 = vsyncadd [#allocation3], 4294967264 }
 0x4c3   :  { %4294 = vsyncpa [#allocation3], 1 }

</bundles_post_ra>
